<compile_context>
chip_gen: v6e
topology: v6e:2x2x1
jax: 0.10.0
libtpu: 0.0.40
codegen_flags: <defaults>
</compile_context>

<pallas_src>
import functools

import numpy as np

import jax
import jax.numpy as jnp
from jax import lax
from jax.experimental import pallas as pl
from jax.experimental.pallas import tpu as pltpu


def _build_wmask(wsp, H, W):
    """Precompute masked conv weights: (2*K*K, H*W) f32.

    Row c*K*K + di*K + dj holds wsp[0, c, di, dj] * valid(i+di-pad, j+dj-pad)
    flattened over the lane-dense HW axis, so each conv tap in the kernel is a
    single full-width multiply (weight + zero-padding mask folded together).
    """
    K = wsp.shape[-1]
    pad = K // 2
    HW = H * W
    KK = K * K
    ii = np.arange(H).reshape(H, 1)
    jj = np.arange(W).reshape(1, W)
    valid = np.zeros((KK, HW), np.float32)
    for di in range(K):
        for dj in range(K):
            m = ((ii + di - pad >= 0) & (ii + di - pad < H) &
                 (jj + dj - pad >= 0) & (jj + dj - pad < W))
            valid[di * K + dj] = m.reshape(-1).astype(np.float32)
    valid = jnp.asarray(valid)                                   # (KK, HW)
    w = wsp.reshape(2, KK, 1).astype(jnp.float32)                # (2, KK, 1)
    return (w * valid[None, :, :]).reshape(2 * KK, HW)           # (2*KK, HW)


def _cbam_kernel(x_ref, w1_ref, w2_ref, wm_ref, o_ref, *, C, H, W, K, Bblk):
    """One batch block.

    x_ref  : (Bblk, C, H*W)   VMEM  -- lane-dense input slab
    w1_ref : (Cr, C)          VMEM  -- 1x1 conv (squeeze), bias-free
    w2_ref : (C, Cr)          VMEM  -- 1x1 conv (excite), bias-free
    wm_ref : (2*K*K, H*W)     VMEM  -- masked spatial-conv weights (max, avg)
    o_ref  : (Bblk, C, H*W)   VMEM
    """
    pad = K // 2
    HW = H * W
    KK = K * K

    x = x_ref[...].astype(jnp.float32)                           # (Bblk, C, HW)

    # ---------------- channel attention ----------------
    mx = jnp.max(x, axis=2)                                      # (Bblk, C)
    av = jnp.sum(x, axis=2) * (1.0 / HW)                         # (Bblk, C)
    pooled = jnp.concatenate([mx, av], axis=0)                   # (2*Bblk, C)

    w1 = w1_ref[...].astype(jnp.float32)                         # (Cr, C)
    w2 = w2_ref[...].astype(jnp.float32)                         # (C, Cr)

    # relu(pooled @ w1.T) @ w2.T, batched over the whole block.
    h = jnp.maximum(
        lax.dot_general(pooled, w1, (((1,), (1,)), ((), ())),
                        preferred_element_type=jnp.float32), 0.0)   # (2*Bblk, Cr)
    mlp = lax.dot_general(h, w2, (((1,), (1,)), ((), ())),
                          preferred_element_type=jnp.float32)       # (2*Bblk, C)
    ch_att = jax.nn.sigmoid(mlp[:Bblk] + mlp[Bblk:])             # (Bblk, C)

    xca = x * ch_att[:, :, None]                                 # (Bblk, C, HW)

    # ---------------- spatial attention ----------------
    sp_max = jnp.max(xca, axis=1)                                # (Bblk, HW)
    sp_avg = jnp.sum(xca, axis=1) * (1.0 / C)                    # (Bblk, HW)

    # KxK "same" conv, fully lane-dense: each tap is a circular lane roll of
    # the flattened plane (XLU) times a precomputed masked weight row (VPU).
    # 4 accumulators break the 49-deep serial add chain.
    NACC = min(4, KK)
    accs = [jnp.zeros((Bblk, HW), jnp.float32) for _ in range(NACC)]
    t = 0
    for di in range(K):
        for dj in range(K):
            idx = di * K + dj
            shift = (di - pad) * W + (dj - pad)
            r = (-shift) % HW                                    # static python int
            if r == 0:
                rmax, ravg = sp_max, sp_avg
            else:
                rmax = pltpu.roll(sp_max, shift=r, axis=1)       # rmax[p] = sp_max[p+shift]
                ravg = pltpu.roll(sp_avg, shift=r, axis=1)
            wm_mx = wm_ref[pl.ds(idx, 1), :]                     # (1, HW) masked weight
            wm_av = wm_ref[pl.ds(KK + idx, 1), :]                # (1, HW)
            accs[t % NACC] = accs[t % NACC] + (rmax * wm_mx + ravg * wm_av)
            t += 1
    # Tree-sum the accumulators.
    while len(accs) > 1:
        nxt = [accs[i] + accs[i + 1] for i in range(0, len(accs) - 1, 2)]
        if len(accs) % 2:
            nxt.append(accs[-1])
        accs = nxt
    conv = accs[0]                                               # (Bblk, HW)

    sp_att = jax.nn.sigmoid(conv)[:, None, :]                    # (Bblk, 1, HW)
    o_ref[...] = (xca * sp_att).astype(o_ref.dtype)              # lane-dense store


def cbam2d_pallas(x, w1, w2, wsp, *, batch_block=None):
    """x: (B, C, H, W); w1: (Cr, C); w2: (C, Cr); wsp: (1, 2, K, K)."""
    B, C, H, W = x.shape
    Cr = w1.shape[0]
    K = wsp.shape[-1]
    HW = H * W
    KK = K * K

    # Lane-dense layout: fold (H, W) onto the lane axis.
    x2 = x.reshape(B, C, HW)
    wmask = _build_wmask(wsp, H, W)                              # (2*KK, HW) f32

    # Chip-aware VMEM budgets (leave headroom below physical capacity:
    # ~48 MiB on v7x / 64 MiB physical, up to 96 MiB on v5e/v6e / 128 MiB).
    try:
        phys = int(pltpu.get_tpu_info().vmem_capacity_bytes)
    except Exception:
        phys = 64 * 1024 * 1024
    vmem_cap = min(96 * 1024 * 1024, (phys * 3) // 4)
    block_budget = max(8 * 1024 * 1024, vmem_cap // 3)           # in+out, double-buffered

    per_elem = C * HW * 4                                        # f32 bytes / batch element
    if batch_block is None:
        bb = max(1, min(B, block_budget // max(1, 4 * per_elem)))
        if B >= 2:
            bb = min(bb, pl.cdiv(B, 2))                          # grid >= 2 -> megacore sharding
        bb = min(bb, 16)                                         # bound accumulator vreg footprint
        while B % bb:                                            # keep full blocks only
            bb -= 1
        batch_block = bb
    Bblk = batch_block
    grid = (B // Bblk,)

    slab_bytes = Bblk * per_elem
    vmem_limit = int(min(vmem_cap,
                         max(32 * 1024 * 1024,
                             6 * slab_bytes + 2 * KK * HW * 4 + (4 << 20))))

    kernel = functools.partial(_cbam_kernel, C=C, H=H, W=W, K=K, Bblk=Bblk)

    out2 = pl.pallas_call(
        kernel,
        out_shape=jax.ShapeDtypeStruct((B, C, HW), x.dtype),
        grid_spec=pltpu.PrefetchScalarGridSpec(
            num_scalar_prefetch=0,
            grid=grid,
            in_specs=[
                pl.BlockSpec((Bblk, C, HW), lambda b: (b, 0, 0)),     # lane-dense input
                pl.BlockSpec((Cr, C), lambda b: (0, 0)),
                pl.BlockSpec((C, Cr), lambda b: (0, 0)),
                pl.BlockSpec((2 * KK, HW), lambda b: (0, 0)),         # masked conv weights
            ],
            out_specs=pl.BlockSpec((Bblk, C, HW), lambda b: (b, 0, 0)),
        ),
        compiler_params=pltpu.CompilerParams(
            dimension_semantics=("parallel",),                        # batch is independent
            vmem_limit_bytes=vmem_limit,
        ),
    )(x2, w1, w2, wmask)

    return out2.reshape(B, C, H, W)


def cbam2d_ref(x, w1, w2, wsp):
    """Pure-JAX reference matching the PyTorch CBAM forward (bias-free convs)."""
    B, C, H, W = x.shape
    K = wsp.shape[-1]
    mx = jnp.max(x, axis=(2, 3))                                 # (B, C)
    av = jnp.mean(x, axis=(2, 3))                                # (B, C)

    def mlp(v):                                                  # (B, C) -> (B, C)
        h = jnp.maximum(v @ w1.T, 0.0)
        return h @ w2.T

    ch_att = jax.nn.sigmoid(mlp(mx) + mlp(av))                   # (B, C)
    xca = x * ch_att[:, :, None, None]

    sp_max = jnp.max(xca, axis=1, keepdims=True)
    sp_avg = jnp.mean(xca, axis=1, keepdims=True)
    sp_in = jnp.concatenate([sp_max, sp_avg], axis=1)            # (B, 2, H, W)
    conv = lax.conv_general_dilated(
        sp_in, wsp, window_strides=(1, 1),
        padding=[(K // 2, K // 2), (K // 2, K // 2)],
        dimension_numbers=("NCHW", "OIHW", "NCHW"))
    sp_att = jax.nn.sigmoid(conv)                                # (B, 1, H, W)
    return xca * sp_att


if __name__ == "__main__":
    B, C, H, W = 2, 16, 16, 16
    reduction, spatial_kernel = 4, 7
    Cr = C // reduction

    key = jax.random.PRNGKey(0)
    kx, k1, k2, k3 = jax.random.split(key, 4)
    x = jax.random.normal(kx, (B, C, H, W), jnp.float32)
    w1 = jax.random.normal(k1, (Cr, C), jnp.float32) * (1.0 / (C ** 0.5))    # Conv2d(C, Cr, 1), bias=False
    w2 = jax.random.normal(k2, (C, Cr), jnp.float32) * (1.0 / (Cr ** 0.5))   # Conv2d(Cr, C, 1), bias=False
    wsp = jax.random.normal(k3, (1, 2, spatial_kernel, spatial_kernel), jnp.float32) * 0.1
    # TODO(synk): verify the original CBAM spatial conv is bias-free; kernel and
    # reference consistently omit conv biases.

    out = cbam2d_pallas(x, w1, w2, wsp)
    out = jax.block_until_ready(out)

    ref = cbam2d_ref(x, w1, w2, wsp)
    assert out.shape == (B, C, H, W)
    assert jnp.allclose(out, ref, rtol=1e-4, atol=1e-4), float(jnp.max(jnp.abs(out - ref)))

    print("KERNEL_OK")
</pallas_src>

<mosaic_0001>
module attributes {stable_mosaic.version = 11 : i64} {
  func.func @_cbam_kernel(%arg0: i32, %arg1: memref<1x16x256xf32, #tpu.memory_space<vmem>>, %arg2: memref<4x16xf32, #tpu.memory_space<vmem>>, %arg3: memref<16x4xf32, #tpu.memory_space<vmem>>, %arg4: memref<98x256xf32, #tpu.memory_space<vmem>>, %arg5: memref<1x16x256xf32, #tpu.memory_space<vmem>>) attributes {dimension_semantics = [#tpu.dimension_semantics<parallel>], iteration_bounds = array<i64: 2>, scalar_prefetch = 0 : i64, scratch_operands = 0 : i64, tpu.core_type = #tpu.core_type<tc>, window_params = [{transform_indices = @transform_0, window_bounds = array<i64: 1, 16, 256>}, {pipeline_mode = #tpu.pipeline_mode<synchronous>, transform_indices = @transform_1, window_bounds = array<i64: 4, 16>}, {pipeline_mode = #tpu.pipeline_mode<synchronous>, transform_indices = @transform_2, window_bounds = array<i64: 16, 4>}, {pipeline_mode = #tpu.pipeline_mode<synchronous>, transform_indices = @transform_3, window_bounds = array<i64: 98, 256>}, {transform_indices = @transform_4, window_bounds = array<i64: 1, 16, 256>}]} {
    %c0 = arith.constant 0 : index
    %c0_0 = arith.constant 0 : index
    %c0_1 = arith.constant 0 : index
    %0 = vector.load %arg1[%c0, %c0_0, %c0_1] : memref<1x16x256xf32, #tpu.memory_space<vmem>>, vector<1x16x256xf32>
    %cst = arith.constant dense<0xFF800000> : vector<1x16xf32>
    %1 = vector.multi_reduction <maximumf>, %0, %cst [2] : vector<1x16x256xf32> to vector<1x16xf32>
    %cst_2 = arith.constant dense<0.000000e+00> : vector<1x16xf32>
    %2 = vector.multi_reduction <add>, %0, %cst_2 [2] : vector<1x16x256xf32> to vector<1x16xf32>
    %cst_3 = arith.constant 3.906250e-03 : f32
    %3 = vector.broadcast %cst_3 : f32 to vector<1x16xf32>
    %4 = arith.mulf %2, %3 : vector<1x16xf32>
    %5 = tpu.concatenate %1, %4 in 0 : vector<1x16xf32>, vector<1x16xf32> -> vector<2x16xf32>
    %c0_4 = arith.constant 0 : index
    %c0_5 = arith.constant 0 : index
    %6 = vector.load %arg2[%c0_4, %c0_5] : memref<4x16xf32, #tpu.memory_space<vmem>>, vector<4x16xf32>
    %c0_6 = arith.constant 0 : index
    %c0_7 = arith.constant 0 : index
    %7 = vector.load %arg3[%c0_6, %c0_7] : memref<16x4xf32, #tpu.memory_space<vmem>>, vector<16x4xf32>
    %cst_8 = arith.constant dense<0.000000e+00> : vector<2x4xf32>
    %8 = tpu.matmul %5, %6, %cst_8 {dimension_numbers = #tpu.dot_dimension_numbers<[1], [1], [0], [0], [0, 0, 1, 0], [], []>} : vector<2x16xf32>, vector<4x16xf32>, vector<2x4xf32> -> vector<2x4xf32>
    %cst_9 = arith.constant 0.000000e+00 : f32
    %9 = vector.broadcast %cst_9 : f32 to vector<2x4xf32>
    %10 = arith.maximumf %8, %9 : vector<2x4xf32>
    %cst_10 = arith.constant dense<0.000000e+00> : vector<2x16xf32>
    %11 = tpu.matmul %10, %7, %cst_10 {dimension_numbers = #tpu.dot_dimension_numbers<[1], [1], [0], [0], [0, 0, 1, 0], [], []>} : vector<2x4xf32>, vector<16x4xf32>, vector<2x16xf32> -> vector<2x16xf32>
    %12 = vector.extract_strided_slice %11 {offsets = [0, 0], sizes = [1, 16], strides = [1, 1]} : vector<2x16xf32> to vector<1x16xf32>
    %13 = vector.extract_strided_slice %11 {offsets = [1, 0], sizes = [1, 16], strides = [1, 1]} : vector<2x16xf32> to vector<1x16xf32>
    %14 = arith.addf %12, %13 : vector<1x16xf32>
    %15 = arith.negf %14 : vector<1x16xf32>
    %16 = math.exp %15 : vector<1x16xf32>
    %cst_11 = arith.constant 1.000000e+00 : f32
    %17 = vector.broadcast %cst_11 : f32 to vector<1x16xf32>
    %18 = arith.addf %17, %16 : vector<1x16xf32>
    %19 = arith.divf %17, %18 : vector<1x16xf32>
    %20 = vector.shape_cast %19 : vector<1x16xf32> to vector<1x16x1xf32>
    %21 = vector.broadcast %20 : vector<1x16x1xf32> to vector<1x16x256xf32>
    %22 = arith.mulf %0, %21 : vector<1x16x256xf32>
    %cst_12 = arith.constant dense<0xFF800000> : vector<1x256xf32>
    %23 = vector.multi_reduction <maximumf>, %22, %cst_12 [1] : vector<1x16x256xf32> to vector<1x256xf32>
    %cst_13 = arith.constant dense<0.000000e+00> : vector<1x256xf32>
    %24 = vector.multi_reduction <add>, %22, %cst_13 [1] : vector<1x16x256xf32> to vector<1x256xf32>
    %cst_14 = arith.constant 6.250000e-02 : f32
    %25 = vector.broadcast %cst_14 : f32 to vector<1x256xf32>
    %26 = arith.mulf %24, %25 : vector<1x256xf32>
    %cst_15 = arith.constant 0.000000e+00 : f32
    %27 = vector.broadcast %cst_15 : f32 to vector<1x256xf32>
    %cst_16 = arith.constant 0.000000e+00 : f32
    %28 = vector.broadcast %cst_16 : f32 to vector<1x256xf32>
    %cst_17 = arith.constant 0.000000e+00 : f32
    %29 = vector.broadcast %cst_17 : f32 to vector<1x256xf32>
    %cst_18 = arith.constant 0.000000e+00 : f32
    %30 = vector.broadcast %cst_18 : f32 to vector<1x256xf32>
    %c51_i32 = arith.constant 51 : i32
    %31 = tpu.dynamic_rotate %23 by %c51_i32 dim 1 : vector<1x256xf32>, i32 -> vector<1x256xf32>
    %c51_i32_19 = arith.constant 51 : i32
    %32 = tpu.dynamic_rotate %26 by %c51_i32_19 dim 1 : vector<1x256xf32>, i32 -> vector<1x256xf32>
    %c0_20 = arith.constant 0 : index
    %c0_21 = arith.constant 0 : index
    %33 = vector.load %arg4[%c0_20, %c0_21] : memref<98x256xf32, #tpu.memory_space<vmem>>, vector<1x256xf32>
    %c49 = arith.constant 49 : index
    %c0_22 = arith.constant 0 : index
    %34 = vector.load %arg4[%c49, %c0_22] : memref<98x256xf32, #tpu.memory_space<vmem>>, vector<1x256xf32>
    %35 = arith.mulf %31, %33 : vector<1x256xf32>
    %36 = arith.mulf %32, %34 : vector<1x256xf32>
    %37 = arith.addf %35, %36 : vector<1x256xf32>
    %38 = arith.addf %27, %37 : vector<1x256xf32>
    %c50_i32 = arith.constant 50 : i32
    %39 = tpu.dynamic_rotate %23 by %c50_i32 dim 1 : vector<1x256xf32>, i32 -> vector<1x256xf32>
    %c50_i32_23 = arith.constant 50 : i32
    %40 = tpu.dynamic_rotate %26 by %c50_i32_23 dim 1 : vector<1x256xf32>, i32 -> vector<1x256xf32>
    %c1 = arith.constant 1 : index
    %c0_24 = arith.constant 0 : index
    %41 = vector.load %arg4[%c1, %c0_24] : memref<98x256xf32, #tpu.memory_space<vmem>>, vector<1x256xf32>
    %c50 = arith.constant 50 : index
    %c0_25 = arith.constant 0 : index
    %42 = vector.load %arg4[%c50, %c0_25] : memref<98x256xf32, #tpu.memory_space<vmem>>, vector<1x256xf32>
    %43 = arith.mulf %39, %41 : vector<1x256xf32>
    %44 = arith.mulf %40, %42 : vector<1x256xf32>
    %45 = arith.addf %43, %44 : vector<1x256xf32>
    %46 = arith.addf %28, %45 : vector<1x256xf32>
    %c49_i32 = arith.constant 49 : i32
    %47 = tpu.dynamic_rotate %23 by %c49_i32 dim 1 : vector<1x256xf32>, i32 -> vector<1x256xf32>
    %c49_i32_26 = arith.constant 49 : i32
    %48 = tpu.dynamic_rotate %26 by %c49_i32_26 dim 1 : vector<1x256xf32>, i32 -> vector<1x256xf32>
    %c2 = arith.constant 2 : index
    %c0_27 = arith.constant 0 : index
    %49 = vector.load %arg4[%c2, %c0_27] : memref<98x256xf32, #tpu.memory_space<vmem>>, vector<1x256xf32>
    %c51 = arith.constant 51 : index
    %c0_28 = arith.constant 0 : index
    %50 = vector.load %arg4[%c51, %c0_28] : memref<98x256xf32, #tpu.memory_space<vmem>>, vector<1x256xf32>
    %51 = arith.mulf %47, %49 : vector<1x256xf32>
    %52 = arith.mulf %48, %50 : vector<1x256xf32>
    %53 = arith.addf %51, %52 : vector<1x256xf32>
    %54 = arith.addf %29, %53 : vector<1x256xf32>
    %c48_i32 = arith.constant 48 : i32
    %55 = tpu.dynamic_rotate %23 by %c48_i32 dim 1 : vector<1x256xf32>, i32 -> vector<1x256xf32>
    %c48_i32_29 = arith.constant 48 : i32
    %56 = tpu.dynamic_rotate %26 by %c48_i32_29 dim 1 : vector<1x256xf32>, i32 -> vector<1x256xf32>
    %c3 = arith.constant 3 : index
    %c0_30 = arith.constant 0 : index
    %57 = vector.load %arg4[%c3, %c0_30] : memref<98x256xf32, #tpu.memory_space<vmem>>, vector<1x256xf32>
    %c52 = arith.constant 52 : index
    %c0_31 = arith.constant 0 : index
    %58 = vector.load %arg4[%c52, %c0_31] : memref<98x256xf32, #tpu.memory_space<vmem>>, vector<1x256xf32>
    %59 = arith.mulf %55, %57 : vector<1x256xf32>
    %60 = arith.mulf %56, %58 : vector<1x256xf32>
    %61 = arith.addf %59, %60 : vector<1x256xf32>
    %62 = arith.addf %30, %61 : vector<1x256xf32>
    %c47_i32 = arith.constant 47 : i32
    %63 = tpu.dynamic_rotate %23 by %c47_i32 dim 1 : vector<1x256xf32>, i32 -> vector<1x256xf32>
    %c47_i32_32 = arith.constant 47 : i32
    %64 = tpu.dynamic_rotate %26 by %c47_i32_32 dim 1 : vector<1x256xf32>, i32 -> vector<1x256xf32>
    %c4 = arith.constant 4 : index
    %c0_33 = arith.constant 0 : index
    %65 = vector.load %arg4[%c4, %c0_33] : memref<98x256xf32, #tpu.memory_space<vmem>>, vector<1x256xf32>
    %c53 = arith.constant 53 : index
    %c0_34 = arith.constant 0 : index
    %66 = vector.load %arg4[%c53, %c0_34] : memref<98x256xf32, #tpu.memory_space<vmem>>, vector<1x256xf32>
    %67 = arith.mulf %63, %65 : vector<1x256xf32>
    %68 = arith.mulf %64, %66 : vector<1x256xf32>
    %69 = arith.addf %67, %68 : vector<1x256xf32>
    %70 = arith.addf %38, %69 : vector<1x256xf32>
    %c46_i32 = arith.constant 46 : i32
    %71 = tpu.dynamic_rotate %23 by %c46_i32 dim 1 : vector<1x256xf32>, i32 -> vector<1x256xf32>
    %c46_i32_35 = arith.constant 46 : i32
    %72 = tpu.dynamic_rotate %26 by %c46_i32_35 dim 1 : vector<1x256xf32>, i32 -> vector<1x256xf32>
    %c5 = arith.constant 5 : index
    %c0_36 = arith.constant 0 : index
    %73 = vector.load %arg4[%c5, %c0_36] : memref<98x256xf32, #tpu.memory_space<vmem>>, vector<1x256xf32>
    %c54 = arith.constant 54 : index
    %c0_37 = arith.constant 0 : index
    %74 = vector.load %arg4[%c54, %c0_37] : memref<98x256xf32, #tpu.memory_space<vmem>>, vector<1x256xf32>
    %75 = arith.mulf %71, %73 : vector<1x256xf32>
    %76 = arith.mulf %72, %74 : vector<1x256xf32>
    %77 = arith.addf %75, %76 : vector<1x256xf32>
    %78 = arith.addf %46, %77 : vector<1x256xf32>
    %c45_i32 = arith.constant 45 : i32
    %79 = tpu.dynamic_rotate %23 by %c45_i32 dim 1 : vector<1x256xf32>, i32 -> vector<1x256xf32>
    %c45_i32_38 = arith.constant 45 : i32
    %80 = tpu.dynamic_rotate %26 by %c45_i32_38 dim 1 : vector<1x256xf32>, i32 -> vector<1x256xf32>
    %c6 = arith.constant 6 : index
    %c0_39 = arith.constant 0 : index
    %81 = vector.load %arg4[%c6, %c0_39] : memref<98x256xf32, #tpu.memory_space<vmem>>, vector<1x256xf32>
    %c55 = arith.constant 55 : index
    %c0_40 = arith.constant 0 : index
    %82 = vector.load %arg4[%c55, %c0_40] : memref<98x256xf32, #tpu.memory_space<vmem>>, vector<1x256xf32>
    %83 = arith.mulf %79, %81 : vector<1x256xf32>
    %84 = arith.mulf %80, %82 : vector<1x256xf32>
    %85 = arith.addf %83, %84 : vector<1x256xf32>
    %86 = arith.addf %54, %85 : vector<1x256xf32>
    %c35_i32 = arith.constant 35 : i32
    %87 = tpu.dynamic_rotate %23 by %c35_i32 dim 1 : vector<1x256xf32>, i32 -> vector<1x256xf32>
    %c35_i32_41 = arith.constant 35 : i32
    %88 = tpu.dynamic_rotate %26 by %c35_i32_41 dim 1 : vector<1x256xf32>, i32 -> vector<1x256xf32>
    %c7 = arith.constant 7 : index
    %c0_42 = arith.constant 0 : index
    %89 = vector.load %arg4[%c7, %c0_42] : memref<98x256xf32, #tpu.memory_space<vmem>>, vector<1x256xf32>
    %c56 = arith.constant 56 : index
    %c0_43 = arith.constant 0 : index
    %90 = vector.load %arg4[%c56, %c0_43] : memref<98x256xf32, #tpu.memory_space<vmem>>, vector<1x256xf32>
    %91 = arith.mulf %87, %89 : vector<1x256xf32>
    %92 = arith.mulf %88, %90 : vector<1x256xf32>
    %93 = arith.addf %91, %92 : vector<1x256xf32>
    %94 = arith.addf %62, %93 : vector<1x256xf32>
    %c34_i32 = arith.constant 34 : i32
    %95 = tpu.dynamic_rotate %23 by %c34_i32 dim 1 : vector<1x256xf32>, i32 -> vector<1x256xf32>
    %c34_i32_44 = arith.constant 34 : i32
    %96 = tpu.dynamic_rotate %26 by %c34_i32_44 dim 1 : vector<1x256xf32>, i32 -> vector<1x256xf32>
    %c8 = arith.constant 8 : index
    %c0_45 = arith.constant 0 : index
    %97 = vector.load %arg4[%c8, %c0_45] : memref<98x256xf32, #tpu.memory_space<vmem>>, vector<1x256xf32>
    %c57 = arith.constant 57 : index
    %c0_46 = arith.constant 0 : index
    %98 = vector.load %arg4[%c57, %c0_46] : memref<98x256xf32, #tpu.memory_space<vmem>>, vector<1x256xf32>
    %99 = arith.mulf %95, %97 : vector<1x256xf32>
    %100 = arith.mulf %96, %98 : vector<1x256xf32>
    %101 = arith.addf %99, %100 : vector<1x256xf32>
    %102 = arith.addf %70, %101 : vector<1x256xf32>
    %c33_i32 = arith.constant 33 : i32
    %103 = tpu.dynamic_rotate %23 by %c33_i32 dim 1 : vector<1x256xf32>, i32 -> vector<1x256xf32>
    %c33_i32_47 = arith.constant 33 : i32
    %104 = tpu.dynamic_rotate %26 by %c33_i32_47 dim 1 : vector<1x256xf32>, i32 -> vector<1x256xf32>
    %c9 = arith.constant 9 : index
    %c0_48 = arith.constant 0 : index
    %105 = vector.load %arg4[%c9, %c0_48] : memref<98x256xf32, #tpu.memory_space<vmem>>, vector<1x256xf32>
    %c58 = arith.constant 58 : index
    %c0_49 = arith.constant 0 : index
    %106 = vector.load %arg4[%c58, %c0_49] : memref<98x256xf32, #tpu.memory_space<vmem>>, vector<1x256xf32>
    %107 = arith.mulf %103, %105 : vector<1x256xf32>
    %108 = arith.mulf %104, %106 : vector<1x256xf32>
    %109 = arith.addf %107, %108 : vector<1x256xf32>
    %110 = arith.addf %78, %109 : vector<1x256xf32>
    %c32_i32 = arith.constant 32 : i32
    %111 = tpu.dynamic_rotate %23 by %c32_i32 dim 1 : vector<1x256xf32>, i32 -> vector<1x256xf32>
    %c32_i32_50 = arith.constant 32 : i32
    %112 = tpu.dynamic_rotate %26 by %c32_i32_50 dim 1 : vector<1x256xf32>, i32 -> vector<1x256xf32>
    %c10 = arith.constant 10 : index
    %c0_51 = arith.constant 0 : index
    %113 = vector.load %arg4[%c10, %c0_51] : memref<98x256xf32, #tpu.memory_space<vmem>>, vector<1x256xf32>
    %c59 = arith.constant 59 : index
    %c0_52 = arith.constant 0 : index
    %114 = vector.load %arg4[%c59, %c0_52] : memref<98x256xf32, #tpu.memory_space<vmem>>, vector<1x256xf32>
    %115 = arith.mulf %111, %113 : vector<1x256xf32>
    %116 = arith.mulf %112, %114 : vector<1x256xf32>
    %117 = arith.addf %115, %116 : vector<1x256xf32>
    %118 = arith.addf %86, %117 : vector<1x256xf32>
    %c31_i32 = arith.constant 31 : i32
    %119 = tpu.dynamic_rotate %23 by %c31_i32 dim 1 : vector<1x256xf32>, i32 -> vector<1x256xf32>
    %c31_i32_53 = arith.constant 31 : i32
    %120 = tpu.dynamic_rotate %26 by %c31_i32_53 dim 1 : vector<1x256xf32>, i32 -> vector<1x256xf32>
    %c11 = arith.constant 11 : index
    %c0_54 = arith.constant 0 : index
    %121 = vector.load %arg4[%c11, %c0_54] : memref<98x256xf32, #tpu.memory_space<vmem>>, vector<1x256xf32>
    %c60 = arith.constant 60 : index
    %c0_55 = arith.constant 0 : index
    %122 = vector.load %arg4[%c60, %c0_55] : memref<98x256xf32, #tpu.memory_space<vmem>>, vector<1x256xf32>
    %123 = arith.mulf %119, %121 : vector<1x256xf32>
    %124 = arith.mulf %120, %122 : vector<1x256xf32>
    %125 = arith.addf %123, %124 : vector<1x256xf32>
    %126 = arith.addf %94, %125 : vector<1x256xf32>
    %c30_i32 = arith.constant 30 : i32
    %127 = tpu.dynamic_rotate %23 by %c30_i32 dim 1 : vector<1x256xf32>, i32 -> vector<1x256xf32>
    %c30_i32_56 = arith.constant 30 : i32
    %128 = tpu.dynamic_rotate %26 by %c30_i32_56 dim 1 : vector<1x256xf32>, i32 -> vector<1x256xf32>
    %c12 = arith.constant 12 : index
    %c0_57 = arith.constant 0 : index
    %129 = vector.load %arg4[%c12, %c0_57] : memref<98x256xf32, #tpu.memory_space<vmem>>, vector<1x256xf32>
    %c61 = arith.constant 61 : index
    %c0_58 = arith.constant 0 : index
    %130 = vector.load %arg4[%c61, %c0_58] : memref<98x256xf32, #tpu.memory_space<vmem>>, vector<1x256xf32>
    %131 = arith.mulf %127, %129 : vector<1x256xf32>
    %132 = arith.mulf %128, %130 : vector<1x256xf32>
    %133 = arith.addf %131, %132 : vector<1x256xf32>
    %134 = arith.addf %102, %133 : vector<1x256xf32>
    %c29_i32 = arith.constant 29 : i32
    %135 = tpu.dynamic_rotate %23 by %c29_i32 dim 1 : vector<1x256xf32>, i32 -> vector<1x256xf32>
    %c29_i32_59 = arith.constant 29 : i32
    %136 = tpu.dynamic_rotate %26 by %c29_i32_59 dim 1 : vector<1x256xf32>, i32 -> vector<1x256xf32>
    %c13 = arith.constant 13 : index
    %c0_60 = arith.constant 0 : index
    %137 = vector.load %arg4[%c13, %c0_60] : memref<98x256xf32, #tpu.memory_space<vmem>>, vector<1x256xf32>
    %c62 = arith.constant 62 : index
    %c0_61 = arith.constant 0 : index
    %138 = vector.load %arg4[%c62, %c0_61] : memref<98x256xf32, #tpu.memory_space<vmem>>, vector<1x256xf32>
    %139 = arith.mulf %135, %137 : vector<1x256xf32>
    %140 = arith.mulf %136, %138 : vector<1x256xf32>
    %141 = arith.addf %139, %140 : vector<1x256xf32>
    %142 = arith.addf %110, %141 : vector<1x256xf32>
    %c19_i32 = arith.constant 19 : i32
    %143 = tpu.dynamic_rotate %23 by %c19_i32 dim 1 : vector<1x256xf32>, i32 -> vector<1x256xf32>
    %c19_i32_62 = arith.constant 19 : i32
    %144 = tpu.dynamic_rotate %26 by %c19_i32_62 dim 1 : vector<1x256xf32>, i32 -> vector<1x256xf32>
    %c14 = arith.constant 14 : index
    %c0_63 = arith.constant 0 : index
    %145 = vector.load %arg4[%c14, %c0_63] : memref<98x256xf32, #tpu.memory_space<vmem>>, vector<1x256xf32>
    %c63 = arith.constant 63 : index
    %c0_64 = arith.constant 0 : index
    %146 = vector.load %arg4[%c63, %c0_64] : memref<98x256xf32, #tpu.memory_space<vmem>>, vector<1x256xf32>
    %147 = arith.mulf %143, %145 : vector<1x256xf32>
    %148 = arith.mulf %144, %146 : vector<1x256xf32>
    %149 = arith.addf %147, %148 : vector<1x256xf32>
    %150 = arith.addf %118, %149 : vector<1x256xf32>
    %c18_i32 = arith.constant 18 : i32
    %151 = tpu.dynamic_rotate %23 by %c18_i32 dim 1 : vector<1x256xf32>, i32 -> vector<1x256xf32>
    %c18_i32_65 = arith.constant 18 : i32
    %152 = tpu.dynamic_rotate %26 by %c18_i32_65 dim 1 : vector<1x256xf32>, i32 -> vector<1x256xf32>
    %c15 = arith.constant 15 : index
    %c0_66 = arith.constant 0 : index
    %153 = vector.load %arg4[%c15, %c0_66] : memref<98x256xf32, #tpu.memory_space<vmem>>, vector<1x256xf32>
    %c64 = arith.constant 64 : index
    %c0_67 = arith.constant 0 : index
    %154 = vector.load %arg4[%c64, %c0_67] : memref<98x256xf32, #tpu.memory_space<vmem>>, vector<1x256xf32>
    %155 = arith.mulf %151, %153 : vector<1x256xf32>
    %156 = arith.mulf %152, %154 : vector<1x256xf32>
    %157 = arith.addf %155, %156 : vector<1x256xf32>
    %158 = arith.addf %126, %157 : vector<1x256xf32>
    %c17_i32 = arith.constant 17 : i32
    %159 = tpu.dynamic_rotate %23 by %c17_i32 dim 1 : vector<1x256xf32>, i32 -> vector<1x256xf32>
    %c17_i32_68 = arith.constant 17 : i32
    %160 = tpu.dynamic_rotate %26 by %c17_i32_68 dim 1 : vector<1x256xf32>, i32 -> vector<1x256xf32>
    %c16 = arith.constant 16 : index
    %c0_69 = arith.constant 0 : index
    %161 = vector.load %arg4[%c16, %c0_69] : memref<98x256xf32, #tpu.memory_space<vmem>>, vector<1x256xf32>
    %c65 = arith.constant 65 : index
    %c0_70 = arith.constant 0 : index
    %162 = vector.load %arg4[%c65, %c0_70] : memref<98x256xf32, #tpu.memory_space<vmem>>, vector<1x256xf32>
    %163 = arith.mulf %159, %161 : vector<1x256xf32>
    %164 = arith.mulf %160, %162 : vector<1x256xf32>
    %165 = arith.addf %163, %164 : vector<1x256xf32>
    %166 = arith.addf %134, %165 : vector<1x256xf32>
    %c16_i32 = arith.constant 16 : i32
    %167 = tpu.dynamic_rotate %23 by %c16_i32 dim 1 : vector<1x256xf32>, i32 -> vector<1x256xf32>
    %c16_i32_71 = arith.constant 16 : i32
    %168 = tpu.dynamic_rotate %26 by %c16_i32_71 dim 1 : vector<1x256xf32>, i32 -> vector<1x256xf32>
    %c17 = arith.constant 17 : index
    %c0_72 = arith.constant 0 : index
    %169 = vector.load %arg4[%c17, %c0_72] : memref<98x256xf32, #tpu.memory_space<vmem>>, vector<1x256xf32>
    %c66 = arith.constant 66 : index
    %c0_73 = arith.constant 0 : index
    %170 = vector.load %arg4[%c66, %c0_73] : memref<98x256xf32, #tpu.memory_space<vmem>>, vector<1x256xf32>
    %171 = arith.mulf %167, %169 : vector<1x256xf32>
    %172 = arith.mulf %168, %170 : vector<1x256xf32>
    %173 = arith.addf %171, %172 : vector<1x256xf32>
    %174 = arith.addf %142, %173 : vector<1x256xf32>
    %c15_i32 = arith.constant 15 : i32
    %175 = tpu.dynamic_rotate %23 by %c15_i32 dim 1 : vector<1x256xf32>, i32 -> vector<1x256xf32>
    %c15_i32_74 = arith.constant 15 : i32
    %176 = tpu.dynamic_rotate %26 by %c15_i32_74 dim 1 : vector<1x256xf32>, i32 -> vector<1x256xf32>
    %c18 = arith.constant 18 : index
    %c0_75 = arith.constant 0 : index
    %177 = vector.load %arg4[%c18, %c0_75] : memref<98x256xf32, #tpu.memory_space<vmem>>, vector<1x256xf32>
    %c67 = arith.constant 67 : index
    %c0_76 = arith.constant 0 : index
    %178 = vector.load %arg4[%c67, %c0_76] : memref<98x256xf32, #tpu.memory_space<vmem>>, vector<1x256xf32>
    %179 = arith.mulf %175, %177 : vector<1x256xf32>
    %180 = arith.mulf %176, %178 : vector<1x256xf32>
    %181 = arith.addf %179, %180 : vector<1x256xf32>
    %182 = arith.addf %150, %181 : vector<1x256xf32>
    %c14_i32 = arith.constant 14 : i32
    %183 = tpu.dynamic_rotate %23 by %c14_i32 dim 1 : vector<1x256xf32>, i32 -> vector<1x256xf32>
    %c14_i32_77 = arith.constant 14 : i32
    %184 = tpu.dynamic_rotate %26 by %c14_i32_77 dim 1 : vector<1x256xf32>, i32 -> vector<1x256xf32>
    %c19 = arith.constant 19 : index
    %c0_78 = arith.constant 0 : index
    %185 = vector.load %arg4[%c19, %c0_78] : memref<98x256xf32, #tpu.memory_space<vmem>>, vector<1x256xf32>
    %c68 = arith.constant 68 : index
    %c0_79 = arith.constant 0 : index
    %186 = vector.load %arg4[%c68, %c0_79] : memref<98x256xf32, #tpu.memory_space<vmem>>, vector<1x256xf32>
    %187 = arith.mulf %183, %185 : vector<1x256xf32>
    %188 = arith.mulf %184, %186 : vector<1x256xf32>
    %189 = arith.addf %187, %188 : vector<1x256xf32>
    %190 = arith.addf %158, %189 : vector<1x256xf32>
    %c13_i32 = arith.constant 13 : i32
    %191 = tpu.dynamic_rotate %23 by %c13_i32 dim 1 : vector<1x256xf32>, i32 -> vector<1x256xf32>
    %c13_i32_80 = arith.constant 13 : i32
    %192 = tpu.dynamic_rotate %26 by %c13_i32_80 dim 1 : vector<1x256xf32>, i32 -> vector<1x256xf32>
    %c20 = arith.constant 20 : index
    %c0_81 = arith.constant 0 : index
    %193 = vector.load %arg4[%c20, %c0_81] : memref<98x256xf32, #tpu.memory_space<vmem>>, vector<1x256xf32>
    %c69 = arith.constant 69 : index
    %c0_82 = arith.constant 0 : index
    %194 = vector.load %arg4[%c69, %c0_82] : memref<98x256xf32, #tpu.memory_space<vmem>>, vector<1x256xf32>
    %195 = arith.mulf %191, %193 : vector<1x256xf32>
    %196 = arith.mulf %192, %194 : vector<1x256xf32>
    %197 = arith.addf %195, %196 : vector<1x256xf32>
    %198 = arith.addf %166, %197 : vector<1x256xf32>
    %c3_i32 = arith.constant 3 : i32
    %199 = tpu.dynamic_rotate %23 by %c3_i32 dim 1 : vector<1x256xf32>, i32 -> vector<1x256xf32>
    %c3_i32_83 = arith.constant 3 : i32
    %200 = tpu.dynamic_rotate %26 by %c3_i32_83 dim 1 : vector<1x256xf32>, i32 -> vector<1x256xf32>
    %c21 = arith.constant 21 : index
    %c0_84 = arith.constant 0 : index
    %201 = vector.load %arg4[%c21, %c0_84] : memref<98x256xf32, #tpu.memory_space<vmem>>, vector<1x256xf32>
    %c70 = arith.constant 70 : index
    %c0_85 = arith.constant 0 : index
    %202 = vector.load %arg4[%c70, %c0_85] : memref<98x256xf32, #tpu.memory_space<vmem>>, vector<1x256xf32>
    %203 = arith.mulf %199, %201 : vector<1x256xf32>
    %204 = arith.mulf %200, %202 : vector<1x256xf32>
    %205 = arith.addf %203, %204 : vector<1x256xf32>
    %206 = arith.addf %174, %205 : vector<1x256xf32>
    %c2_i32 = arith.constant 2 : i32
    %207 = tpu.dynamic_rotate %23 by %c2_i32 dim 1 : vector<1x256xf32>, i32 -> vector<1x256xf32>
    %c2_i32_86 = arith.constant 2 : i32
    %208 = tpu.dynamic_rotate %26 by %c2_i32_86 dim 1 : vector<1x256xf32>, i32 -> vector<1x256xf32>
    %c22 = arith.constant 22 : index
    %c0_87 = arith.constant 0 : index
    %209 = vector.load %arg4[%c22, %c0_87] : memref<98x256xf32, #tpu.memory_space<vmem>>, vector<1x256xf32>
    %c71 = arith.constant 71 : index
    %c0_88 = arith.constant 0 : index
    %210 = vector.load %arg4[%c71, %c0_88] : memref<98x256xf32, #tpu.memory_space<vmem>>, vector<1x256xf32>
    %211 = arith.mulf %207, %209 : vector<1x256xf32>
    %212 = arith.mulf %208, %210 : vector<1x256xf32>
    %213 = arith.addf %211, %212 : vector<1x256xf32>
    %214 = arith.addf %182, %213 : vector<1x256xf32>
    %c1_i32 = arith.constant 1 : i32
    %215 = tpu.dynamic_rotate %23 by %c1_i32 dim 1 : vector<1x256xf32>, i32 -> vector<1x256xf32>
    %c1_i32_89 = arith.constant 1 : i32
    %216 = tpu.dynamic_rotate %26 by %c1_i32_89 dim 1 : vector<1x256xf32>, i32 -> vector<1x256xf32>
    %c23 = arith.constant 23 : index
    %c0_90 = arith.constant 0 : index
    %217 = vector.load %arg4[%c23, %c0_90] : memref<98x256xf32, #tpu.memory_space<vmem>>, vector<1x256xf32>
    %c72 = arith.constant 72 : index
    %c0_91 = arith.constant 0 : index
    %218 = vector.load %arg4[%c72, %c0_91] : memref<98x256xf32, #tpu.memory_space<vmem>>, vector<1x256xf32>
    %219 = arith.mulf %215, %217 : vector<1x256xf32>
    %220 = arith.mulf %216, %218 : vector<1x256xf32>
    %221 = arith.addf %219, %220 : vector<1x256xf32>
    %222 = arith.addf %190, %221 : vector<1x256xf32>
    %c24 = arith.constant 24 : index
    %c0_92 = arith.constant 0 : index
    %223 = vector.load %arg4[%c24, %c0_92] : memref<98x256xf32, #tpu.memory_space<vmem>>, vector<1x256xf32>
    %c73 = arith.constant 73 : index
    %c0_93 = arith.constant 0 : index
    %224 = vector.load %arg4[%c73, %c0_93] : memref<98x256xf32, #tpu.memory_space<vmem>>, vector<1x256xf32>
    %225 = arith.mulf %23, %223 : vector<1x256xf32>
    %226 = arith.mulf %26, %224 : vector<1x256xf32>
    %227 = arith.addf %225, %226 : vector<1x256xf32>
    %228 = arith.addf %198, %227 : vector<1x256xf32>
    %c255_i32 = arith.constant 255 : i32
    %229 = tpu.dynamic_rotate %23 by %c255_i32 dim 1 : vector<1x256xf32>, i32 -> vector<1x256xf32>
    %c255_i32_94 = arith.constant 255 : i32
    %230 = tpu.dynamic_rotate %26 by %c255_i32_94 dim 1 : vector<1x256xf32>, i32 -> vector<1x256xf32>
    %c25 = arith.constant 25 : index
    %c0_95 = arith.constant 0 : index
    %231 = vector.load %arg4[%c25, %c0_95] : memref<98x256xf32, #tpu.memory_space<vmem>>, vector<1x256xf32>
    %c74 = arith.constant 74 : index
    %c0_96 = arith.constant 0 : index
    %232 = vector.load %arg4[%c74, %c0_96] : memref<98x256xf32, #tpu.memory_space<vmem>>, vector<1x256xf32>
    %233 = arith.mulf %229, %231 : vector<1x256xf32>
    %234 = arith.mulf %230, %232 : vector<1x256xf32>
    %235 = arith.addf %233, %234 : vector<1x256xf32>
    %236 = arith.addf %206, %235 : vector<1x256xf32>
    %c254_i32 = arith.constant 254 : i32
    %237 = tpu.dynamic_rotate %23 by %c254_i32 dim 1 : vector<1x256xf32>, i32 -> vector<1x256xf32>
    %c254_i32_97 = arith.constant 254 : i32
    %238 = tpu.dynamic_rotate %26 by %c254_i32_97 dim 1 : vector<1x256xf32>, i32 -> vector<1x256xf32>
    %c26 = arith.constant 26 : index
    %c0_98 = arith.constant 0 : index
    %239 = vector.load %arg4[%c26, %c0_98] : memref<98x256xf32, #tpu.memory_space<vmem>>, vector<1x256xf32>
    %c75 = arith.constant 75 : index
    %c0_99 = arith.constant 0 : index
    %240 = vector.load %arg4[%c75, %c0_99] : memref<98x256xf32, #tpu.memory_space<vmem>>, vector<1x256xf32>
    %241 = arith.mulf %237, %239 : vector<1x256xf32>
    %242 = arith.mulf %238, %240 : vector<1x256xf32>
    %243 = arith.addf %241, %242 : vector<1x256xf32>
    %244 = arith.addf %214, %243 : vector<1x256xf32>
    %c253_i32 = arith.constant 253 : i32
    %245 = tpu.dynamic_rotate %23 by %c253_i32 dim 1 : vector<1x256xf32>, i32 -> vector<1x256xf32>
    %c253_i32_100 = arith.constant 253 : i32
    %246 = tpu.dynamic_rotate %26 by %c253_i32_100 dim 1 : vector<1x256xf32>, i32 -> vector<1x256xf32>
    %c27 = arith.constant 27 : index
    %c0_101 = arith.constant 0 : index
    %247 = vector.load %arg4[%c27, %c0_101] : memref<98x256xf32, #tpu.memory_space<vmem>>, vector<1x256xf32>
    %c76 = arith.constant 76 : index
    %c0_102 = arith.constant 0 : index
    %248 = vector.load %arg4[%c76, %c0_102] : memref<98x256xf32, #tpu.memory_space<vmem>>, vector<1x256xf32>
    %249 = arith.mulf %245, %247 : vector<1x256xf32>
    %250 = arith.mulf %246, %248 : vector<1x256xf32>
    %251 = arith.addf %249, %250 : vector<1x256xf32>
    %252 = arith.addf %222, %251 : vector<1x256xf32>
    %c243_i32 = arith.constant 243 : i32
    %253 = tpu.dynamic_rotate %23 by %c243_i32 dim 1 : vector<1x256xf32>, i32 -> vector<1x256xf32>
    %c243_i32_103 = arith.constant 243 : i32
    %254 = tpu.dynamic_rotate %26 by %c243_i32_103 dim 1 : vector<1x256xf32>, i32 -> vector<1x256xf32>
    %c28 = arith.constant 28 : index
    %c0_104 = arith.constant 0 : index
    %255 = vector.load %arg4[%c28, %c0_104] : memref<98x256xf32, #tpu.memory_space<vmem>>, vector<1x256xf32>
    %c77 = arith.constant 77 : index
    %c0_105 = arith.constant 0 : index
    %256 = vector.load %arg4[%c77, %c0_105] : memref<98x256xf32, #tpu.memory_space<vmem>>, vector<1x256xf32>
    %257 = arith.mulf %253, %255 : vector<1x256xf32>
    %258 = arith.mulf %254, %256 : vector<1x256xf32>
    %259 = arith.addf %257, %258 : vector<1x256xf32>
    %260 = arith.addf %228, %259 : vector<1x256xf32>
    %c242_i32 = arith.constant 242 : i32
    %261 = tpu.dynamic_rotate %23 by %c242_i32 dim 1 : vector<1x256xf32>, i32 -> vector<1x256xf32>
    %c242_i32_106 = arith.constant 242 : i32
    %262 = tpu.dynamic_rotate %26 by %c242_i32_106 dim 1 : vector<1x256xf32>, i32 -> vector<1x256xf32>
    %c29 = arith.constant 29 : index
    %c0_107 = arith.constant 0 : index
    %263 = vector.load %arg4[%c29, %c0_107] : memref<98x256xf32, #tpu.memory_space<vmem>>, vector<1x256xf32>
    %c78 = arith.constant 78 : index
    %c0_108 = arith.constant 0 : index
    %264 = vector.load %arg4[%c78, %c0_108] : memref<98x256xf32, #tpu.memory_space<vmem>>, vector<1x256xf32>
    %265 = arith.mulf %261, %263 : vector<1x256xf32>
    %266 = arith.mulf %262, %264 : vector<1x256xf32>
    %267 = arith.addf %265, %266 : vector<1x256xf32>
    %268 = arith.addf %236, %267 : vector<1x256xf32>
    %c241_i32 = arith.constant 241 : i32
    %269 = tpu.dynamic_rotate %23 by %c241_i32 dim 1 : vector<1x256xf32>, i32 -> vector<1x256xf32>
    %c241_i32_109 = arith.constant 241 : i32
    %270 = tpu.dynamic_rotate %26 by %c241_i32_109 dim 1 : vector<1x256xf32>, i32 -> vector<1x256xf32>
    %c30 = arith.constant 30 : index
    %c0_110 = arith.constant 0 : index
    %271 = vector.load %arg4[%c30, %c0_110] : memref<98x256xf32, #tpu.memory_space<vmem>>, vector<1x256xf32>
    %c79 = arith.constant 79 : index
    %c0_111 = arith.constant 0 : index
    %272 = vector.load %arg4[%c79, %c0_111] : memref<98x256xf32, #tpu.memory_space<vmem>>, vector<1x256xf32>
    %273 = arith.mulf %269, %271 : vector<1x256xf32>
    %274 = arith.mulf %270, %272 : vector<1x256xf32>
    %275 = arith.addf %273, %274 : vector<1x256xf32>
    %276 = arith.addf %244, %275 : vector<1x256xf32>
    %c240_i32 = arith.constant 240 : i32
    %277 = tpu.dynamic_rotate %23 by %c240_i32 dim 1 : vector<1x256xf32>, i32 -> vector<1x256xf32>
    %c240_i32_112 = arith.constant 240 : i32
    %278 = tpu.dynamic_rotate %26 by %c240_i32_112 dim 1 : vector<1x256xf32>, i32 -> vector<1x256xf32>
    %c31 = arith.constant 31 : index
    %c0_113 = arith.constant 0 : index
    %279 = vector.load %arg4[%c31, %c0_113] : memref<98x256xf32, #tpu.memory_space<vmem>>, vector<1x256xf32>
    %c80 = arith.constant 80 : index
    %c0_114 = arith.constant 0 : index
    %280 = vector.load %arg4[%c80, %c0_114] : memref<98x256xf32, #tpu.memory_space<vmem>>, vector<1x256xf32>
    %281 = arith.mulf %277, %279 : vector<1x256xf32>
    %282 = arith.mulf %278, %280 : vector<1x256xf32>
    %283 = arith.addf %281, %282 : vector<1x256xf32>
    %284 = arith.addf %252, %283 : vector<1x256xf32>
    %c239_i32 = arith.constant 239 : i32
    %285 = tpu.dynamic_rotate %23 by %c239_i32 dim 1 : vector<1x256xf32>, i32 -> vector<1x256xf32>
    %c239_i32_115 = arith.constant 239 : i32
    %286 = tpu.dynamic_rotate %26 by %c239_i32_115 dim 1 : vector<1x256xf32>, i32 -> vector<1x256xf32>
    %c32 = arith.constant 32 : index
    %c0_116 = arith.constant 0 : index
    %287 = vector.load %arg4[%c32, %c0_116] : memref<98x256xf32, #tpu.memory_space<vmem>>, vector<1x256xf32>
    %c81 = arith.constant 81 : index
    %c0_117 = arith.constant 0 : index
    %288 = vector.load %arg4[%c81, %c0_117] : memref<98x256xf32, #tpu.memory_space<vmem>>, vector<1x256xf32>
    %289 = arith.mulf %285, %287 : vector<1x256xf32>
    %290 = arith.mulf %286, %288 : vector<1x256xf32>
    %291 = arith.addf %289, %290 : vector<1x256xf32>
    %292 = arith.addf %260, %291 : vector<1x256xf32>
    %c238_i32 = arith.constant 238 : i32
    %293 = tpu.dynamic_rotate %23 by %c238_i32 dim 1 : vector<1x256xf32>, i32 -> vector<1x256xf32>
    %c238_i32_118 = arith.constant 238 : i32
    %294 = tpu.dynamic_rotate %26 by %c238_i32_118 dim 1 : vector<1x256xf32>, i32 -> vector<1x256xf32>
    %c33 = arith.constant 33 : index
    %c0_119 = arith.constant 0 : index
    %295 = vector.load %arg4[%c33, %c0_119] : memref<98x256xf32, #tpu.memory_space<vmem>>, vector<1x256xf32>
    %c82 = arith.constant 82 : index
    %c0_120 = arith.constant 0 : index
    %296 = vector.load %arg4[%c82, %c0_120] : memref<98x256xf32, #tpu.memory_space<vmem>>, vector<1x256xf32>
    %297 = arith.mulf %293, %295 : vector<1x256xf32>
    %298 = arith.mulf %294, %296 : vector<1x256xf32>
    %299 = arith.addf %297, %298 : vector<1x256xf32>
    %300 = arith.addf %268, %299 : vector<1x256xf32>
    %c237_i32 = arith.constant 237 : i32
    %301 = tpu.dynamic_rotate %23 by %c237_i32 dim 1 : vector<1x256xf32>, i32 -> vector<1x256xf32>
    %c237_i32_121 = arith.constant 237 : i32
    %302 = tpu.dynamic_rotate %26 by %c237_i32_121 dim 1 : vector<1x256xf32>, i32 -> vector<1x256xf32>
    %c34 = arith.constant 34 : index
    %c0_122 = arith.constant 0 : index
    %303 = vector.load %arg4[%c34, %c0_122] : memref<98x256xf32, #tpu.memory_space<vmem>>, vector<1x256xf32>
    %c83 = arith.constant 83 : index
    %c0_123 = arith.constant 0 : index
    %304 = vector.load %arg4[%c83, %c0_123] : memref<98x256xf32, #tpu.memory_space<vmem>>, vector<1x256xf32>
    %305 = arith.mulf %301, %303 : vector<1x256xf32>
    %306 = arith.mulf %302, %304 : vector<1x256xf32>
    %307 = arith.addf %305, %306 : vector<1x256xf32>
    %308 = arith.addf %276, %307 : vector<1x256xf32>
    %c227_i32 = arith.constant 227 : i32
    %309 = tpu.dynamic_rotate %23 by %c227_i32 dim 1 : vector<1x256xf32>, i32 -> vector<1x256xf32>
    %c227_i32_124 = arith.constant 227 : i32
    %310 = tpu.dynamic_rotate %26 by %c227_i32_124 dim 1 : vector<1x256xf32>, i32 -> vector<1x256xf32>
    %c35 = arith.constant 35 : index
    %c0_125 = arith.constant 0 : index
    %311 = vector.load %arg4[%c35, %c0_125] : memref<98x256xf32, #tpu.memory_space<vmem>>, vector<1x256xf32>
    %c84 = arith.constant 84 : index
    %c0_126 = arith.constant 0 : index
    %312 = vector.load %arg4[%c84, %c0_126] : memref<98x256xf32, #tpu.memory_space<vmem>>, vector<1x256xf32>
    %313 = arith.mulf %309, %311 : vector<1x256xf32>
    %314 = arith.mulf %310, %312 : vector<1x256xf32>
    %315 = arith.addf %313, %314 : vector<1x256xf32>
    %316 = arith.addf %284, %315 : vector<1x256xf32>
    %c226_i32 = arith.constant 226 : i32
    %317 = tpu.dynamic_rotate %23 by %c226_i32 dim 1 : vector<1x256xf32>, i32 -> vector<1x256xf32>
    %c226_i32_127 = arith.constant 226 : i32
    %318 = tpu.dynamic_rotate %26 by %c226_i32_127 dim 1 : vector<1x256xf32>, i32 -> vector<1x256xf32>
    %c36 = arith.constant 36 : index
    %c0_128 = arith.constant 0 : index
    %319 = vector.load %arg4[%c36, %c0_128] : memref<98x256xf32, #tpu.memory_space<vmem>>, vector<1x256xf32>
    %c85 = arith.constant 85 : index
    %c0_129 = arith.constant 0 : index
    %320 = vector.load %arg4[%c85, %c0_129] : memref<98x256xf32, #tpu.memory_space<vmem>>, vector<1x256xf32>
    %321 = arith.mulf %317, %319 : vector<1x256xf32>
    %322 = arith.mulf %318, %320 : vector<1x256xf32>
    %323 = arith.addf %321, %322 : vector<1x256xf32>
    %324 = arith.addf %292, %323 : vector<1x256xf32>
    %c225_i32 = arith.constant 225 : i32
    %325 = tpu.dynamic_rotate %23 by %c225_i32 dim 1 : vector<1x256xf32>, i32 -> vector<1x256xf32>
    %c225_i32_130 = arith.constant 225 : i32
    %326 = tpu.dynamic_rotate %26 by %c225_i32_130 dim 1 : vector<1x256xf32>, i32 -> vector<1x256xf32>
    %c37 = arith.constant 37 : index
    %c0_131 = arith.constant 0 : index
    %327 = vector.load %arg4[%c37, %c0_131] : memref<98x256xf32, #tpu.memory_space<vmem>>, vector<1x256xf32>
    %c86 = arith.constant 86 : index
    %c0_132 = arith.constant 0 : index
    %328 = vector.load %arg4[%c86, %c0_132] : memref<98x256xf32, #tpu.memory_space<vmem>>, vector<1x256xf32>
    %329 = arith.mulf %325, %327 : vector<1x256xf32>
    %330 = arith.mulf %326, %328 : vector<1x256xf32>
    %331 = arith.addf %329, %330 : vector<1x256xf32>
    %332 = arith.addf %300, %331 : vector<1x256xf32>
    %c224_i32 = arith.constant 224 : i32
    %333 = tpu.dynamic_rotate %23 by %c224_i32 dim 1 : vector<1x256xf32>, i32 -> vector<1x256xf32>
    %c224_i32_133 = arith.constant 224 : i32
    %334 = tpu.dynamic_rotate %26 by %c224_i32_133 dim 1 : vector<1x256xf32>, i32 -> vector<1x256xf32>
    %c38 = arith.constant 38 : index
    %c0_134 = arith.constant 0 : index
    %335 = vector.load %arg4[%c38, %c0_134] : memref<98x256xf32, #tpu.memory_space<vmem>>, vector<1x256xf32>
    %c87 = arith.constant 87 : index
    %c0_135 = arith.constant 0 : index
    %336 = vector.load %arg4[%c87, %c0_135] : memref<98x256xf32, #tpu.memory_space<vmem>>, vector<1x256xf32>
    %337 = arith.mulf %333, %335 : vector<1x256xf32>
    %338 = arith.mulf %334, %336 : vector<1x256xf32>
    %339 = arith.addf %337, %338 : vector<1x256xf32>
    %340 = arith.addf %308, %339 : vector<1x256xf32>
    %c223_i32 = arith.constant 223 : i32
    %341 = tpu.dynamic_rotate %23 by %c223_i32 dim 1 : vector<1x256xf32>, i32 -> vector<1x256xf32>
    %c223_i32_136 = arith.constant 223 : i32
    %342 = tpu.dynamic_rotate %26 by %c223_i32_136 dim 1 : vector<1x256xf32>, i32 -> vector<1x256xf32>
    %c39 = arith.constant 39 : index
    %c0_137 = arith.constant 0 : index
    %343 = vector.load %arg4[%c39, %c0_137] : memref<98x256xf32, #tpu.memory_space<vmem>>, vector<1x256xf32>
    %c88 = arith.constant 88 : index
    %c0_138 = arith.constant 0 : index
    %344 = vector.load %arg4[%c88, %c0_138] : memref<98x256xf32, #tpu.memory_space<vmem>>, vector<1x256xf32>
    %345 = arith.mulf %341, %343 : vector<1x256xf32>
    %346 = arith.mulf %342, %344 : vector<1x256xf32>
    %347 = arith.addf %345, %346 : vector<1x256xf32>
    %348 = arith.addf %316, %347 : vector<1x256xf32>
    %c222_i32 = arith.constant 222 : i32
    %349 = tpu.dynamic_rotate %23 by %c222_i32 dim 1 : vector<1x256xf32>, i32 -> vector<1x256xf32>
    %c222_i32_139 = arith.constant 222 : i32
    %350 = tpu.dynamic_rotate %26 by %c222_i32_139 dim 1 : vector<1x256xf32>, i32 -> vector<1x256xf32>
    %c40 = arith.constant 40 : index
    %c0_140 = arith.constant 0 : index
    %351 = vector.load %arg4[%c40, %c0_140] : memref<98x256xf32, #tpu.memory_space<vmem>>, vector<1x256xf32>
    %c89 = arith.constant 89 : index
    %c0_141 = arith.constant 0 : index
    %352 = vector.load %arg4[%c89, %c0_141] : memref<98x256xf32, #tpu.memory_space<vmem>>, vector<1x256xf32>
    %353 = arith.mulf %349, %351 : vector<1x256xf32>
    %354 = arith.mulf %350, %352 : vector<1x256xf32>
    %355 = arith.addf %353, %354 : vector<1x256xf32>
    %356 = arith.addf %324, %355 : vector<1x256xf32>
    %c221_i32 = arith.constant 221 : i32
    %357 = tpu.dynamic_rotate %23 by %c221_i32 dim 1 : vector<1x256xf32>, i32 -> vector<1x256xf32>
    %c221_i32_142 = arith.constant 221 : i32
    %358 = tpu.dynamic_rotate %26 by %c221_i32_142 dim 1 : vector<1x256xf32>, i32 -> vector<1x256xf32>
    %c41 = arith.constant 41 : index
    %c0_143 = arith.constant 0 : index
    %359 = vector.load %arg4[%c41, %c0_143] : memref<98x256xf32, #tpu.memory_space<vmem>>, vector<1x256xf32>
    %c90 = arith.constant 90 : index
    %c0_144 = arith.constant 0 : index
    %360 = vector.load %arg4[%c90, %c0_144] : memref<98x256xf32, #tpu.memory_space<vmem>>, vector<1x256xf32>
    %361 = arith.mulf %357, %359 : vector<1x256xf32>
    %362 = arith.mulf %358, %360 : vector<1x256xf32>
    %363 = arith.addf %361, %362 : vector<1x256xf32>
    %364 = arith.addf %332, %363 : vector<1x256xf32>
    %c211_i32 = arith.constant 211 : i32
    %365 = tpu.dynamic_rotate %23 by %c211_i32 dim 1 : vector<1x256xf32>, i32 -> vector<1x256xf32>
    %c211_i32_145 = arith.constant 211 : i32
    %366 = tpu.dynamic_rotate %26 by %c211_i32_145 dim 1 : vector<1x256xf32>, i32 -> vector<1x256xf32>
    %c42 = arith.constant 42 : index
    %c0_146 = arith.constant 0 : index
    %367 = vector.load %arg4[%c42, %c0_146] : memref<98x256xf32, #tpu.memory_space<vmem>>, vector<1x256xf32>
    %c91 = arith.constant 91 : index
    %c0_147 = arith.constant 0 : index
    %368 = vector.load %arg4[%c91, %c0_147] : memref<98x256xf32, #tpu.memory_space<vmem>>, vector<1x256xf32>
    %369 = arith.mulf %365, %367 : vector<1x256xf32>
    %370 = arith.mulf %366, %368 : vector<1x256xf32>
    %371 = arith.addf %369, %370 : vector<1x256xf32>
    %372 = arith.addf %340, %371 : vector<1x256xf32>
    %c210_i32 = arith.constant 210 : i32
    %373 = tpu.dynamic_rotate %23 by %c210_i32 dim 1 : vector<1x256xf32>, i32 -> vector<1x256xf32>
    %c210_i32_148 = arith.constant 210 : i32
    %374 = tpu.dynamic_rotate %26 by %c210_i32_148 dim 1 : vector<1x256xf32>, i32 -> vector<1x256xf32>
    %c43 = arith.constant 43 : index
    %c0_149 = arith.constant 0 : index
    %375 = vector.load %arg4[%c43, %c0_149] : memref<98x256xf32, #tpu.memory_space<vmem>>, vector<1x256xf32>
    %c92 = arith.constant 92 : index
    %c0_150 = arith.constant 0 : index
    %376 = vector.load %arg4[%c92, %c0_150] : memref<98x256xf32, #tpu.memory_space<vmem>>, vector<1x256xf32>
    %377 = arith.mulf %373, %375 : vector<1x256xf32>
    %378 = arith.mulf %374, %376 : vector<1x256xf32>
    %379 = arith.addf %377, %378 : vector<1x256xf32>
    %380 = arith.addf %348, %379 : vector<1x256xf32>
    %c209_i32 = arith.constant 209 : i32
    %381 = tpu.dynamic_rotate %23 by %c209_i32 dim 1 : vector<1x256xf32>, i32 -> vector<1x256xf32>
    %c209_i32_151 = arith.constant 209 : i32
    %382 = tpu.dynamic_rotate %26 by %c209_i32_151 dim 1 : vector<1x256xf32>, i32 -> vector<1x256xf32>
    %c44 = arith.constant 44 : index
    %c0_152 = arith.constant 0 : index
    %383 = vector.load %arg4[%c44, %c0_152] : memref<98x256xf32, #tpu.memory_space<vmem>>, vector<1x256xf32>
    %c93 = arith.constant 93 : index
    %c0_153 = arith.constant 0 : index
    %384 = vector.load %arg4[%c93, %c0_153] : memref<98x256xf32, #tpu.memory_space<vmem>>, vector<1x256xf32>
    %385 = arith.mulf %381, %383 : vector<1x256xf32>
    %386 = arith.mulf %382, %384 : vector<1x256xf32>
    %387 = arith.addf %385, %386 : vector<1x256xf32>
    %388 = arith.addf %356, %387 : vector<1x256xf32>
    %c208_i32 = arith.constant 208 : i32
    %389 = tpu.dynamic_rotate %23 by %c208_i32 dim 1 : vector<1x256xf32>, i32 -> vector<1x256xf32>
    %c208_i32_154 = arith.constant 208 : i32
    %390 = tpu.dynamic_rotate %26 by %c208_i32_154 dim 1 : vector<1x256xf32>, i32 -> vector<1x256xf32>
    %c45 = arith.constant 45 : index
    %c0_155 = arith.constant 0 : index
    %391 = vector.load %arg4[%c45, %c0_155] : memref<98x256xf32, #tpu.memory_space<vmem>>, vector<1x256xf32>
    %c94 = arith.constant 94 : index
    %c0_156 = arith.constant 0 : index
    %392 = vector.load %arg4[%c94, %c0_156] : memref<98x256xf32, #tpu.memory_space<vmem>>, vector<1x256xf32>
    %393 = arith.mulf %389, %391 : vector<1x256xf32>
    %394 = arith.mulf %390, %392 : vector<1x256xf32>
    %395 = arith.addf %393, %394 : vector<1x256xf32>
    %396 = arith.addf %364, %395 : vector<1x256xf32>
    %c207_i32 = arith.constant 207 : i32
    %397 = tpu.dynamic_rotate %23 by %c207_i32 dim 1 : vector<1x256xf32>, i32 -> vector<1x256xf32>
    %c207_i32_157 = arith.constant 207 : i32
    %398 = tpu.dynamic_rotate %26 by %c207_i32_157 dim 1 : vector<1x256xf32>, i32 -> vector<1x256xf32>
    %c46 = arith.constant 46 : index
    %c0_158 = arith.constant 0 : index
    %399 = vector.load %arg4[%c46, %c0_158] : memref<98x256xf32, #tpu.memory_space<vmem>>, vector<1x256xf32>
    %c95 = arith.constant 95 : index
    %c0_159 = arith.constant 0 : index
    %400 = vector.load %arg4[%c95, %c0_159] : memref<98x256xf32, #tpu.memory_space<vmem>>, vector<1x256xf32>
    %401 = arith.mulf %397, %399 : vector<1x256xf32>
    %402 = arith.mulf %398, %400 : vector<1x256xf32>
    %403 = arith.addf %401, %402 : vector<1x256xf32>
    %404 = arith.addf %372, %403 : vector<1x256xf32>
    %c206_i32 = arith.constant 206 : i32
    %405 = tpu.dynamic_rotate %23 by %c206_i32 dim 1 : vector<1x256xf32>, i32 -> vector<1x256xf32>
    %c206_i32_160 = arith.constant 206 : i32
    %406 = tpu.dynamic_rotate %26 by %c206_i32_160 dim 1 : vector<1x256xf32>, i32 -> vector<1x256xf32>
    %c47 = arith.constant 47 : index
    %c0_161 = arith.constant 0 : index
    %407 = vector.load %arg4[%c47, %c0_161] : memref<98x256xf32, #tpu.memory_space<vmem>>, vector<1x256xf32>
    %c96 = arith.constant 96 : index
    %c0_162 = arith.constant 0 : index
    %408 = vector.load %arg4[%c96, %c0_162] : memref<98x256xf32, #tpu.memory_space<vmem>>, vector<1x256xf32>
    %409 = arith.mulf %405, %407 : vector<1x256xf32>
    %410 = arith.mulf %406, %408 : vector<1x256xf32>
    %411 = arith.addf %409, %410 : vector<1x256xf32>
    %412 = arith.addf %380, %411 : vector<1x256xf32>
    %c205_i32 = arith.constant 205 : i32
    %413 = tpu.dynamic_rotate %23 by %c205_i32 dim 1 : vector<1x256xf32>, i32 -> vector<1x256xf32>
    %c205_i32_163 = arith.constant 205 : i32
    %414 = tpu.dynamic_rotate %26 by %c205_i32_163 dim 1 : vector<1x256xf32>, i32 -> vector<1x256xf32>
    %c48 = arith.constant 48 : index
    %c0_164 = arith.constant 0 : index
    %415 = vector.load %arg4[%c48, %c0_164] : memref<98x256xf32, #tpu.memory_space<vmem>>, vector<1x256xf32>
    %c97 = arith.constant 97 : index
    %c0_165 = arith.constant 0 : index
    %416 = vector.load %arg4[%c97, %c0_165] : memref<98x256xf32, #tpu.memory_space<vmem>>, vector<1x256xf32>
    %417 = arith.mulf %413, %415 : vector<1x256xf32>
    %418 = arith.mulf %414, %416 : vector<1x256xf32>
    %419 = arith.addf %417, %418 : vector<1x256xf32>
    %420 = arith.addf %388, %419 : vector<1x256xf32>
    %421 = arith.addf %420, %396 : vector<1x256xf32>
    %422 = arith.addf %404, %412 : vector<1x256xf32>
    %423 = arith.addf %421, %422 : vector<1x256xf32>
    %424 = arith.negf %423 : vector<1x256xf32>
    %425 = math.exp %424 : vector<1x256xf32>
    %cst_166 = arith.constant 1.000000e+00 : f32
    %426 = vector.broadcast %cst_166 : f32 to vector<1x256xf32>
    %427 = arith.addf %426, %425 : vector<1x256xf32>
    %428 = arith.divf %426, %427 : vector<1x256xf32>
    %429 = vector.shape_cast %428 : vector<1x256xf32> to vector<1x1x256xf32>
    %430 = vector.broadcast %429 : vector<1x1x256xf32> to vector<1x16x256xf32>
    %431 = arith.mulf %22, %430 : vector<1x16x256xf32>
    %c0_167 = arith.constant 0 : index
    %c0_168 = arith.constant 0 : index
    %c0_169 = arith.constant 0 : index
    %432 = vector.load %arg5[%c0_167, %c0_168, %c0_169] : memref<1x16x256xf32, #tpu.memory_space<vmem>>, vector<1x16x256xf32>
    tpu.vector_store %arg5[%c0_167, %c0_168, %c0_169], %431 {strides = array<i32>} : memref<1x16x256xf32, #tpu.memory_space<vmem>>, vector<1x16x256xf32>,
    return
  }
  func.func @transform_0(%arg0: i32) -> (i32, i32, i32) {
    %c0_i32 = arith.constant 0 : i32
    %c0_i32_0 = arith.constant 0 : i32
    %c0_i32_1 = arith.constant 0 : i32
    return %arg0, %c0_i32, %c0_i32_0 : i32, i32, i32
  }
  func.func @transform_1(%arg0: i32) -> (i32, i32) {
    %c0_i32 = arith.constant 0 : i32
    %c0_i32_0 = arith.constant 0 : i32
    %c0_i32_1 = arith.constant 0 : i32
    return %c0_i32, %c0_i32_0 : i32, i32
  }
  func.func @transform_2(%arg0: i32) -> (i32, i32) {
    %c0_i32 = arith.constant 0 : i32
    %c0_i32_0 = arith.constant 0 : i32
    %c0_i32_1 = arith.constant 0 : i32
    return %c0_i32, %c0_i32_0 : i32, i32
  }
  func.func @transform_3(%arg0: i32) -> (i32, i32) {
    %c0_i32 = arith.constant 0 : i32
    %c0_i32_0 = arith.constant 0 : i32
    %c0_i32_1 = arith.constant 0 : i32
    return %c0_i32, %c0_i32_0 : i32, i32
  }
  func.func @transform_4(%arg0: i32) -> (i32, i32, i32) {
    %c0_i32 = arith.constant 0 : i32
    %c0_i32_0 = arith.constant 0 : i32
    %c0_i32_1 = arith.constant 0 : i32
    return %arg0, %c0_i32, %c0_i32_0 : i32, i32, i32
  }
}

</mosaic_0001>

<bundles_post_ra>
// kernel: tpu_custom_call.1
= control target key start
LH: loop header
LB: loop body
LE: loop exit
PB: predicated region body
PF: predicated region fallthrough
CT: control target
= control target key end

     0   :  { %9 = vsyncpa [#allocation3], 0  ;;  %s5881_s0 = inlined_call_operand.hbm [shape: f32[2,16,256], index: 0, kind: input, shape index: {}]   ;;  %s5882_s1 = inlined_call_operand.vmem [shape: f32[4,16], index: 1, kind: input, shape index: {}]   ;;  %s5883_s2 = inlined_call_operand.vmem [shape: f32[16,4], index: 2, kind: input, shape index: {}]   ;;  %s5884_s3 = inlined_call_operand.hbm [shape: f32[98,256], index: 3, kind: input, shape index: {}]   ;;  %s5885_s4 = inlined_call_operand.hbm [shape: f32[2,16,256], index: 4, kind: output, shape index: {}]  }
   0x1   :  { %11 = vsyncpa [#allocation3 + $0x1], 0 }
   0x2   :  { %12 = vsyncpa [#allocation6], 0 }
   0x3   :  { %13 = vsyncpa [#allocation4], 0 }
   0x4   :  { %15 = vsyncpa [#allocation4 + $0x1], 0  ;;  %s3286_s15 = smov 0   ;;  %s3288_s16 = smov 0  }
   0x5   :  { %s3290_s17 = smov 0   ;;  %s3292_s18 = smov 0  }
   0x6 LB: > { %s3307_s19 = sadd.s32 4294967295, %s3203_s18   ;;  %s2915_s20 = sadd.s32 4294967294, %s3203_s18   ;;  %s3203_s18 = sphi %s3292_s18, %s6354_s18   ;;  %s3199_s17 = sphi %s3290_s17, %s6353_s17   ;;  %s3195_s16 = sphi %s3288_s16, %s6352_s16   ;;  %s3191_s15 = sphi %s3286_s15, %s6351_s15  }
   0x7   : > { %p41_p0 = scmp.ne.s32.totalorder %s3195_s16, %s3191_s15  ;;  %p5886_p1 = scmp.eq.s32.totalorder %s3307_s19, 0 }
   0x8   : > { %p134_p3 = scmp.eq.s32.totalorder %s2915_s20, 1  ;;  %p2916_p5 = scmp.ge.s32.totalorder %s3203_s18, 1 }
   0x9   : > { %p3316_p4 = por %p5886_p1, %p41_p0  ;;  %p141_p7 = scmp.lt.s32.totalorder %s3203_s18, 3 }
   0xa   : > { %p3321_p6 = por %p134_p3, %p41_p0  ;;  %s3205_s24 = smov [#allocation5]  }
   0xb   : > { %s6035_s21 = scalar_select %p3316_p4, 1, 0 }
   0xc   : > { %s6036_s22 = scalar_select %p3321_p6, 1, 0 }
   0xd   : > { %p3326_p8 = pnand %p2916_p5, %p141_p7  ;;  %s159_s25 = sshll.u32 %s3205_s24, 4  ;;  %s160_s25 = int_to_ptr.vmem [resolvable:$true] %s159_s25 }
   0xe   : > { %s3340_s27 = sadd.s32 1, %s3203_s18   ;;  %s28_s28 = sadd.s32 1, %s3199_s17 }
   0xf   : > { %s6037_s23 = scalar_select %p3326_p8, 1, 0 }
  0x10   : > { %p2966_p9 = pneg %p3326_p8  ;;  %s25_s29 = ssub.s32 %s3203_s18, %s3340_s27 }
  0x11   : > { %s3092_s30 = scalar_lea.vmem %s160_s25, 3328  ;;  %p3100_p5 = scmp.lt.s32.totalorder %s160_s25, %s160_s25 }
  0x12   : > { %p3335_p11 = pnand %p2966_p9, %p5886_p1  ;;  %p3093_p13 = scmp.ne.s32.totalorder %s160_s25, %s3092_s30 }
  0x13   : > { %p3101_p7 = scmp.lt.s32.totalorder %s3092_s30, %s3092_s30 }
  0x14   : > { %p3083_p12 = pneg %p3335_p11 }
  0x15   : > { %p3102_p10 = por %p3101_p7, %p3100_p5 }
  0x16   : > { %p3095_p0 = pnand %p3093_p13, %p3083_p12 }
  0x18   : > { %p3096_p3 = pneg %p3095_p0 }
  0x1a   : > { %p3103_p2 = pnand %p3102_p10, %p3096_p3 }
  0x1c   : > { %3106 = shalt.err (!%p3103_p2)
}
  0x1d   : > { %s3206_s5 = smov 256   ;;  %s3207_s6 = smov 16  }
  0x1e   : > { %2969 = dma.hbm_to_vmem [thread:$0]  (!%p3335_p11), %s5884_s3, 3328, %s160_s25, [#allocation6], %s3206_s5, %s3206_s5, %s3207_s6  }
  0x1f   : > { %p26_p2 = scmp.eq.s32.totalorder %s25_s29, 0  ;;  %p35_p9 = scmp.ne.s32.totalorder %s3199_s17, %s3195_s16 }
  0x20   : > { %p36_p10 = scmp.eq.s32.totalorder %s3203_s18, 0  ;;  %p2979_p12 = scmp.lt.s32.totalorder %s3203_s18, 2 }
  0x21   : > { %s3360_s9 = scalar_select %p26_p2, %s3199_s17, %s28_s28  }
  0x22   : > { %p37_p13 = por %p36_p10, %p35_p9  ;;  %p6039_p0 = scmp.eq.s32.totalorder %s3307_s19, 1 }
  0x23   : > { %s173_s11 = sand.u32 1, %s3199_s17   ;;  %s2939_s12 = sshll.u32 %s3203_s18, 9 }
  0x24   : > { %p3364_p3 = por %p6039_p0, %p35_p9  ;;  %s2919_s13 = sshll.u32 %s173_s11, 5 }
  0x25   : > { %s3373_s24 = scalar_lea.hbm %s5881_s0, %s2939_s12  ;;  %s177_s25 = scalar_lea.vmem [#allocation2], %s2919_s13 }
  0x26   : > { %s6040_s10 = scalar_select %p3364_p3, 1, 0 }
  0x27   : > { %s184_s26 = sshll.u32 %s177_s25, 4  ;;  %p3375_p11 = pnand %p2979_p12, %p37_p13  ;;  %s3379_s26 = int_to_ptr.vmem [resolvable:$true] %s184_s26 }
  0x28   : > { %s3381_s29 = scalar_lea.sflag [#allocation3], %s173_s11  ;;  %s3107_s30 = scalar_lea.hbm %s3373_s24, 512 }
  0x29   : > { %p3108_p5 = scmp.ne.s32.totalorder %s3373_s24, %s3107_s30  ;;  %p3109_p7 = pneg %p3375_p11 }
  0x2a   : > { %s3112_s12 = scalar_lea.hbm %s5881_s0, 1024  ;;  %p3113_p10 = scmp.lt.s32.totalorder %s3373_s24, %s5881_s0 }
  0x2b   : > { %p3110_p2 = pnand %p3109_p7, %p3108_p5  ;;  %p3114_p12 = scmp.lt.s32.totalorder %s3112_s12, %s3107_s30 }
  0x2d   : > { %p3111_p9 = pneg %p3110_p2  ;;  %p3115_p13 = por %p3114_p12, %p3113_p10 }
  0x2f   : > { %p3116_p0 = pnand %p3115_p13, %p3111_p9 }
  0x31   : > { %3119 = shalt.err (!%p3116_p0)
}
  0x32   : > { %s3120_s11 = scalar_lea.vmem %s3379_s26, 512  ;;  %s3208_s20 = smov [#allocation2]  }
  0x33   : > { %p3121_p1 = scmp.ne.s32.totalorder %s3379_s26, %s3120_s11  ;;  %s3125_s25 = sshll.u32 %s3208_s20, 4  ;;  %s3126_s25 = int_to_ptr.vmem [resolvable:$false] %s3125_s25 }
  0x34   : > { %s3127_s7 = scalar_lea.vmem %s3126_s25, 1024  ;;  %p3128_p2 = scmp.lt.s32.totalorder %s3379_s26, %s3126_s25 }
  0x35   : > { %p3123_p6 = pnand %p3121_p1, %p3109_p7  ;;  %p3129_p3 = scmp.lt.s32.totalorder %s3127_s7, %s3120_s11 }
  0x37   : > { %p3124_p5 = pneg %p3123_p6  ;;  %p3130_p4 = por %p3129_p3, %p3128_p2 }
  0x39   : > { %p3131_p8 = pnand %p3130_p4, %p3124_p5 }
  0x3b   : > { %3134 = shalt.err (!%p3131_p8)
}
  0x3c   : > { %2973 = dma.hbm_to_vmem [thread:$0]  (!%p3375_p11), %s3373_s24, 512, %s3379_s26, %s3381_s29, %s3206_s5, %s3206_s5, %s3207_s6  }
  0x3d   : > { %p6042_p1 = scmp.ne.s32.totalorder %s6037_s23, 0 }
  0x3f   : > { %196 = sbr.rel (%p6042_p1) target bundleno = 1356 (0x54c), region = 36 }
  0x44   : > { %s3408_s30 = sand.u32 1, %s3195_s16   ;;  %p6043_p4 = scmp.ne.s32.totalorder %s6035_s21, 0 }
  0x45   : > { %s5890_s8 = sshll.u32 %s3408_s30, 5  ;;  %s199_s12 = scalar_lea.sflag [#allocation3], %s3408_s30 }
  0x46   : > { %s202_s28 = scalar_lea.vmem [#allocation2], %s5890_s8 }
  0x47   : > { %3178 = dma.done.wait (%p6043_p4), %s199_s12, 512  }
  0x48   : > { %3180 = vsyncadd (%p6043_p4), %s199_s12, 4294966784  ;;  %p6044_p6 = scmp.eq.s32.totalorder %s3307_s19, 0 }
  0x4a   : > { %3182 = dma.done.wait (%p6044_p6), [#allocation6], 3328   ;;  %p6045_p8 = pmov %p6044_p6 }
  0x4b   : > { %v3422_v0 = vld [vmem:[%s202_s28] sm:$0xff]  ;;  %v3424_v1 = vld [vmem:[%s202_s28 + $0x8] sm:$0xff]  ;;  %v3426_v2 = vld [vmem:[%s202_s28 + $0x10] sm:$0xff]  ;;  %v3209_v8 = vmov 0.0   ;;  %vm282_vm0 = vcmask 130048   ;;  %vm3210_vm1 = vmmov 0   ;;  %v251_v11 = vlaneseq }
  0x4c   : > { %3184 = vsyncadd (%p6045_p8), [#allocation6], 4294963968  ;;  %v241_v3 = vadd.f32 %v3424_v1, %v3422_v0  ;;  %v235_v4 = vmax.f32 %v3422_v0, %v3424_v1  ;;  %v3432_v5 = vld [vmem:[%s202_s28 + $0x18] sm:$0xff]  ;;  %2946 = vmatprep.subr.mxu0 %v3209_v8  ;;  %v279_v9 = vld [vmem:[%s5882_s1] sm:$0xf]  ;;  %2951 = vmatprep.subr.mxu1 %v3209_v8  ;;  %vm360_vm2 = vcmask 31744  }
  0x4d   : > { %v244_v6 = vadd.f32 %v3432_v5, %v3426_v2  ;;  %v238_v7 = vmax.f32 %v3426_v2, %v3432_v5  ;;  %2947 = vmatpush3.xpose.msk.msra.mxu0 %vm282_vm0, %v279_v9  ;;  %2948 = vmatprep.mubr.msk.f32.mxu0 %vm3210_vm1, %v3209_v8  ;;  %v281_v10 = vld [vmem:[%s5883_s2 + $0x8] sm:$0xff]  ;;  %v3446_v12 = vand.u32 127, %v251_v11  ;;  %v3449_v14 = vshrl.u32 %v251_v11, 7  ;;  %v280_v30 = vld [vmem:[%s5883_s2] sm:$0xff]  ;;  %s3211_s29 = smov 50   ;;  %s3212_s13 = smov 51  }
  0x4e   : > { %242 = vadd.xlane.f32.xlu0 %v241_v3  ;;  %236 = vmax.xlane.f32.xlu1 %v235_v4  ;;  %vm262_vm3 = vcmask 130112   ;;  %vm277_vm4 = vcmask 1040384   ;;  %s3213_s14 = smov 49   ;;  %s3214_s11 = smov 48  }
  0x4f   : > { %2955 = vmatprep.mubr.msk.f32.mxu1 %vm3210_vm1, %v3209_v8  ;;  %2952 = vmatpush3.xpose.msk.msra.mxu1 %vm360_vm2, %v281_v10  ;;  %v257_v13 = vadd.s32 4294967288, %v3446_v12  ;;  %v255_v18 = vsub.s32 %v3446_v12, %v3449_v14  ;;  %v3461_v41 = vsub.s32 0, %v3449_v14  ;;  %s3215_s20 = smov 47   ;;  %s3216_s25 = smov 46   ;;  %vm499_vm5 = vcmp.lt.s32.totalorder %v3446_v12, 51 }
  0x50   : > { %2953 = vmatprep.subr.mxu1 %v3209_v8  ;;  %s3217_s7 = smov 45   ;;  %s3218_s12 = smov 35   ;;  %vm6029_vm6 = vcmp.lt.s32.totalorder %v3446_v12, 77  ;;  %vm545_vm7 = vcmp.lt.s32.totalorder %v3446_v12, 50  ;;  %vm592_vm8 = vcmp.lt.s32.totalorder %v3446_v12, 49  ;;  %vm639_vm9 = vcmp.lt.s32.totalorder %v3446_v12, 48 }
  0x51   : > { %v260_v17 = vsub.s32 %v257_v13, %v3449_v14  ;;  %s3219_s28 = smov 34   ;;  %s3220_s21 = smov 33   ;;  %vm686_vm10 = vcmp.lt.s32.totalorder %v3446_v12, 47  ;;  %vm733_vm11 = vcmp.lt.s32.totalorder %v3446_v12, 46  ;;  %vm780_vm12 = vcmp.lt.s32.totalorder %v3446_v12, 45 }
  0x52   : > { %245 = vadd.xlane.f32.xlu0 %v244_v6  ;;  %239 = vmax.xlane.f32.xlu1 %v238_v7  ;;  %s5891_s23 = smov 32   ;;  %s5893_s5 = smov 31   ;;  %vm827_vm13 = vcmp.lt.s32.totalorder %v3446_v12, 35  ;;  %vm874_vm14 = vcmp.lt.s32.totalorder %v3446_v12, 34  ;;  %vm921_vm15 = vcmp.lt.s32.totalorder %v3446_v12, 33  ;;  %vm1015_vm1 = vcmp.lt.s32.totalorder %v3446_v12, 31 }
  0x53   : > { %2954 = vmatpush3.xpose.msk.msra.mxu1 %vm360_vm2, %v280_v30  ;;  %s5895_s6 = smov 30   ;;  %s5897_s24 = smov 29  }
  0x54   : > { %s5899_s26 = smov 19   ;;  %s5901_s8 = smov 18  }
  0x55   : > { %p6348_p11 = scmp.ne.s32.totalorder %s6040_s10, 0 }
  0xd7   : > { %v243_v15 = vpop.xlane.xlu0 %242  ;;  %v237_v16 = vpop.xlane.xlu1 %236 }
  0xd8   : > { %v247_v19 = vmul.f32 0.00390625, %v243_v15  ;;  %v256_v25 = vrot.slane %v237_v16, %v255_v18 }
  0xda   : > { %v270_v24 = vrot.slane %v247_v19, %v255_v18 }
  0xdb   : > { %v246_v20 = vpop.xlane.xlu0 %245  ;;  %v240_v21 = vpop.xlane.xlu1 %239 }
  0xdc   : > { %v248_v22 = vmul.f32 0.00390625, %v246_v20  ;;  %v261_v23 = vrot.slane %v240_v21, %v260_v17 }
  0xde   : > { %v274_v26 = vrot.slane %v248_v22, %v260_v17  ;;  %v263_v27 = vsel %vm262_vm3, %v261_v23, %v256_v25 }
  0xe0   : > { %v275_v28 = vsel %vm262_vm3, %v274_v26, %v270_v24  ;;  %vm1109_vm3 = vcmp.lt.s32.totalorder %v3446_v12, 29 }
  0xe1   : > { %v278_v29 = vsel %vm277_vm4, %v263_v27, %v275_v28  ;;  %vm1156_vm4 = vcmp.lt.s32.totalorder %v3446_v12, 19 }
  0xe2   : > { %2949 = vmatmul.mubr.msk.f32.vlgmr.msra.gmra.mxu0 %vm282_vm0, %v278_v29  ;;  %vm968_vm0 = vcmp.lt.s32.totalorder %v3446_v12, 32 }
 0x1a2   : > { %v355_v31 = vpop.f32.mrf.mxu0 }
 0x1a3   : > { %v359_v32 = vmax.f32 %v355_v31, 0.0 }
 0x1a4   : > { %v2950_v33 = vpop.f32.mrf.mxu0 }
 0x1a5   : > { %2956 = vmatmul.mubr.msk.f32.vlgmr.msra.gmra.mxu1 %vm360_vm2, %v359_v32  ;;  %vm1062_vm2 = vcmp.lt.s32.totalorder %v3446_v12, 30 }
 0x265   : > { %v436_v34 = vpop.f32.mrf.mxu1 }
 0x266   : > { %v441_v35 = vrot.slane %v436_v34, 1 }
 0x267   : > { %v2957_v36 = vpop.f32.mrf.mxu1 }
 0x268   : > { %v443_v37 = vadd.f32 %v441_v35, %v436_v34 }
 0x26a   : > { %v2931_v38 = vmul.f32 -1.442695, %v443_v37 }
 0x26c   : > { %3068 = vpow2.f32 %v2931_v38 }
 0x279   : > { %v3069_v39 = vpop.eup %3068 }
 0x27a   : > { %v447_v40 = vadd.f32 1.0, %v3069_v39 }
 0x27c   : > { %3070 = vrcp.f32 %v447_v40 }
 0x289   : > { %v3071_v42 = vpop.eup %3070 }
 0x28a   : > { %v453_v43 = vrot.slane %v3071_v42, %v3461_v41 }
 0x28c   : > { %459 = vbcast.lane.b32.xlu1 %v453_v43, 264  ;;  %455 = vbcast.lane.b32.xlu0 %v453_v43, 256 }
 0x2fe   : > { %v460_v44 = vpop.permute.xlu1 %459  ;;  %v456_v45 = vpop.permute.xlu0 %455 }
 0x2ff   : > { %v3465_v46 = vmul.f32 %v460_v44, %v3426_v2  ;;  %v3468_v47 = vmul.f32 %v460_v44, %v3432_v5  ;;  %v3471_v48 = vmul.f32 %v456_v45, %v3422_v0  ;;  %v3474_v49 = vmul.f32 %v456_v45, %v3424_v1 }
 0x301   : > { %6046 = vst [vmem:[#allocation11_spill] sm:$0xff] %v3465_v46  ;;  %6047 = vst [vmem:[#allocation12_spill] sm:$0xff] %v3468_v47  ;;  %v465_v50 = vmax.f32 %v3471_v48, %v3465_v46  ;;  %v472_v51 = vmax.f32 %v3474_v49, %v3468_v47  ;;  %v479_v24 = vadd.f32 %v3465_v46, %v3471_v48 }
 0x302   : > { %6048 = vst [vmem:[#allocation13_spill] sm:$0xff] %v3471_v48  ;;  %6049 = vst [vmem:[#allocation14_spill] sm:$0xff] %v3474_v49  ;;  %v486_v31 = vadd.f32 %v3468_v47, %v3474_v49 }
 0x303   : > { %v466_v52 = vrot.slane %v465_v50, 4  ;;  %v473_v53 = vrot.slane %v472_v51, 4  ;;  %v480_v27 = vrot.slane %v479_v24, 4 }
 0x304   : > { %v487_v35 = vrot.slane %v486_v31, 4 }
 0x305   : > { %v467_v54 = vmax.f32 %v465_v50, %v466_v52  ;;  %v474_v55 = vmax.f32 %v472_v51, %v473_v53  ;;  %v481_v30 = vadd.f32 %v480_v27, %v479_v24 }
 0x306   : > { %v488_v39 = vadd.f32 %v487_v35, %v486_v31 }
 0x307   : > { %v468_v56 = vrot.slane %v467_v54, 2  ;;  %v475_v57 = vrot.slane %v474_v55, 2  ;;  %v482_v34 = vrot.slane %v481_v30, 2 }
 0x308   : > { %v489_v44 = vrot.slane %v488_v39, 2 }
 0x309   : > { %v469_v58 = vmax.f32 %v467_v54, %v468_v56  ;;  %v476_v59 = vmax.f32 %v474_v55, %v475_v57  ;;  %v483_v38 = vadd.f32 %v482_v34, %v481_v30 }
 0x30a   : > { %v490_v52 = vadd.f32 %v489_v44, %v488_v39 }
 0x30b   : > { %v470_v60 = vrot.slane %v469_v58, 1  ;;  %v477_v62 = vrot.slane %v476_v59, 1  ;;  %v484_v43 = vrot.slane %v483_v38, 1 }
 0x30c   : > { %v491_v55 = vrot.slane %v490_v52, 1 }
 0x30d   : > { %v3480_v61 = vmax.f32 %v469_v58, %v470_v60  ;;  %v3486_v63 = vmax.f32 %v476_v59, %v477_v62  ;;  %v485_v51 = vadd.f32 %v484_v43, %v483_v38 }
 0x30e   : > { %v492_v59 = vadd.f32 %v491_v55, %v490_v52 }
 0x30f   : > { %541 = vrot.lane.b32.xlu0 %v3480_v61, %s3211_s29  ;;  %495 = vrot.lane.b32.xlu1 %v3480_v61, %s3212_s13  ;;  %v3748_v56 = vmul.f32 0.0625, %v485_v51 }
 0x310   : > { %v3766_v24 = vmul.f32 0.0625, %v492_v59 }
 0x313   : > { %588 = vrot.lane.b32.xlu0 %v3480_v61, %s3213_s14  ;;  %497 = vrot.lane.b32.xlu1 %v3486_v63, %s3212_s13 }
 0x317   : > { %635 = vrot.lane.b32.xlu0 %v3480_v61, %s3214_s11  ;;  %543 = vrot.lane.b32.xlu1 %v3486_v63, %s3211_s29 }
 0x31b   : > { %682 = vrot.lane.b32.xlu0 %v3480_v61, %s3215_s20  ;;  %590 = vrot.lane.b32.xlu1 %v3486_v63, %s3213_s14 }
 0x31f   : > { %729 = vrot.lane.b32.xlu0 %v3480_v61, %s3216_s25  ;;  %637 = vrot.lane.b32.xlu1 %v3486_v63, %s3214_s11 }
 0x323   : > { %776 = vrot.lane.b32.xlu0 %v3480_v61, %s3217_s7  ;;  %684 = vrot.lane.b32.xlu1 %v3486_v63, %s3215_s20 }
 0x327   : > { %823 = vrot.lane.b32.xlu0 %v3480_v61, %s3218_s12  ;;  %731 = vrot.lane.b32.xlu1 %v3486_v63, %s3216_s25 }
 0x32b   : > { %870 = vrot.lane.b32.xlu0 %v3480_v61, %s3219_s28  ;;  %778 = vrot.lane.b32.xlu1 %v3486_v63, %s3217_s7 }
 0x32f   : > { %917 = vrot.lane.b32.xlu0 %v3480_v61, %s3220_s21  ;;  %825 = vrot.lane.b32.xlu1 %v3486_v63, %s3218_s12 }
 0x333   : > { %964 = vrot.lane.b32.xlu0 %v3480_v61, %s5891_s23  ;;  %872 = vrot.lane.b32.xlu1 %v3486_v63, %s3219_s28 }
 0x337   : > { %1011 = vrot.lane.b32.xlu0 %v3480_v61, %s5893_s5  ;;  %919 = vrot.lane.b32.xlu1 %v3486_v63, %s3220_s21 }
 0x33b   : > { %1058 = vrot.lane.b32.xlu0 %v3480_v61, %s5895_s6  ;;  %966 = vrot.lane.b32.xlu1 %v3486_v63, %s5891_s23  ;;  %s5903_s23 = smov 17  }
 0x33f   : > { %1105 = vrot.lane.b32.xlu0 %v3480_v61, %s5897_s24  ;;  %1013 = vrot.lane.b32.xlu1 %v3486_v63, %s5893_s5  ;;  %s5905_s5 = smov 16  }
 0x343   : > { %1152 = vrot.lane.b32.xlu0 %v3480_v61, %s5899_s26  ;;  %1060 = vrot.lane.b32.xlu1 %v3486_v63, %s5895_s6  ;;  %s5907_s6 = smov 15  }
 0x347   : > { %1199 = vrot.lane.b32.xlu0 %v3480_v61, %s5901_s8  ;;  %1107 = vrot.lane.b32.xlu1 %v3486_v63, %s5897_s24  ;;  %s5909_s24 = smov 14  }
 0x34b   : > { %1246 = vrot.lane.b32.xlu0 %v3480_v61, %s5903_s23  ;;  %1154 = vrot.lane.b32.xlu1 %v3486_v63, %s5899_s26  ;;  %s5911_s26 = smov 13  }
 0x34f   : > { %1293 = vrot.lane.b32.xlu0 %v3480_v61, %s5905_s5  ;;  %1201 = vrot.lane.b32.xlu1 %v3486_v63, %s5901_s8  ;;  %s5913_s8 = smov 3  }
 0x353   : > { %1340 = vrot.lane.b32.xlu0 %v3480_v61, %s5907_s6  ;;  %1248 = vrot.lane.b32.xlu1 %v3486_v63, %s5903_s23  ;;  %s5915_s23 = smov 2  }
 0x357   : > { %1387 = vrot.lane.b32.xlu0 %v3480_v61, %s5909_s24  ;;  %1295 = vrot.lane.b32.xlu1 %v3486_v63, %s5905_s5  ;;  %s5917_s5 = smov 1  }
 0x35b   : > { %1434 = vrot.lane.b32.xlu0 %v3480_v61, %s5911_s26  ;;  %1342 = vrot.lane.b32.xlu1 %v3486_v63, %s5907_s6  ;;  %s5919_s6 = smov 127  }
 0x35f   : > { %1481 = vrot.lane.b32.xlu0 %v3480_v61, %s5913_s8  ;;  %1389 = vrot.lane.b32.xlu1 %v3486_v63, %s5909_s24  ;;  %s3236_s24 = smov 126  }
 0x363   : > { %1528 = vrot.lane.b32.xlu0 %v3480_v61, %s5915_s23  ;;  %1436 = vrot.lane.b32.xlu1 %v3486_v63, %s5911_s26  ;;  %s5921_s26 = smov 125  }
 0x367   : > { %1575 = vrot.lane.b32.xlu0 %v3480_v61, %s5917_s5  ;;  %1483 = vrot.lane.b32.xlu1 %v3486_v63, %s5913_s8  ;;  %s5923_s8 = smov 115  }
 0x36b   : > { %1656 = vrot.lane.b32.xlu0 %v3480_v61, %s5919_s6  ;;  %1530 = vrot.lane.b32.xlu1 %v3486_v63, %s5915_s23  ;;  %s5925_s23 = smov 114  }
 0x36f   : > { %1703 = vrot.lane.b32.xlu0 %v3480_v61, %s3236_s24  ;;  %1577 = vrot.lane.b32.xlu1 %v3486_v63, %s5917_s5  ;;  %s5927_s5 = smov 113  }
 0x373   : > { %1750 = vrot.lane.b32.xlu0 %v3480_v61, %s5921_s26  ;;  %1658 = vrot.lane.b32.xlu1 %v3486_v63, %s5919_s6  ;;  %s5929_s6 = smov 112  }
 0x377   : > { %1797 = vrot.lane.b32.xlu0 %v3480_v61, %s5923_s8  ;;  %1705 = vrot.lane.b32.xlu1 %v3486_v63, %s3236_s24 }
 0x37b   : > { %1844 = vrot.lane.b32.xlu0 %v3480_v61, %s5925_s23  ;;  %1752 = vrot.lane.b32.xlu1 %v3486_v63, %s5921_s26  ;;  %s5931_s26 = smov 111  }
 0x37f   : > { %1891 = vrot.lane.b32.xlu0 %v3480_v61, %s5927_s5  ;;  %1799 = vrot.lane.b32.xlu1 %v3486_v63, %s5923_s8  ;;  %s5933_s8 = smov 110  }
 0x381   : > { %v3600_v0 = vpop.permute.xlu0 %541  ;;  %v3602_v1 = vpop.permute.xlu1 %495 }
 0x383   : > { %1938 = vrot.lane.b32.xlu0 %v3480_v61, %s5929_s6  ;;  %1846 = vrot.lane.b32.xlu1 %v3486_v63, %s5925_s23  ;;  %s5935_s23 = smov 109  }
 0x385   : > { %v3608_v2 = vpop.permute.xlu0 %588  ;;  %v3610_v3 = vpop.permute.xlu1 %497 }
 0x387   : > { %1985 = vrot.lane.b32.xlu0 %v3480_v61, %s5931_s26  ;;  %1893 = vrot.lane.b32.xlu1 %v3486_v63, %s5927_s5  ;;  %s5937_s5 = smov 99  }
 0x389   : > { %v3616_v4 = vpop.permute.xlu0 %635  ;;  %v3618_v5 = vpop.permute.xlu1 %543 }
 0x38b   : > { %2032 = vrot.lane.b32.xlu0 %v3480_v61, %s5933_s8  ;;  %1940 = vrot.lane.b32.xlu1 %v3486_v63, %s5929_s6  ;;  %s5939_s6 = smov 98  }
 0x38d   : > { %v3624_v6 = vpop.permute.xlu0 %682  ;;  %v3626_v7 = vpop.permute.xlu1 %590 }
 0x38f   : > { %2079 = vrot.lane.b32.xlu0 %v3480_v61, %s5935_s23  ;;  %1987 = vrot.lane.b32.xlu1 %v3486_v63, %s5931_s26  ;;  %s5941_s26 = smov 97  }
 0x391   : > { %v3632_v8 = vpop.permute.xlu0 %729  ;;  %v3634_v9 = vpop.permute.xlu1 %637 }
 0x393   : > { %2126 = vrot.lane.b32.xlu0 %v3480_v61, %s5937_s5  ;;  %2034 = vrot.lane.b32.xlu1 %v3486_v63, %s5933_s8  ;;  %s3248_s8 = smov 96  }
 0x395   : > { %v3640_v10 = vpop.permute.xlu0 %776  ;;  %v3642_v11 = vpop.permute.xlu1 %684 }
 0x397   : > { %2173 = vrot.lane.b32.xlu0 %v3480_v61, %s5939_s6  ;;  %2081 = vrot.lane.b32.xlu1 %v3486_v63, %s5935_s23  ;;  %s5943_s23 = smov 95  }
 0x399   : > { %v3648_v13 = vpop.permute.xlu0 %823  ;;  %v3650_v15 = vpop.permute.xlu1 %731 }
 0x39b   : > { %2220 = vrot.lane.b32.xlu0 %v3480_v61, %s5941_s26  ;;  %2128 = vrot.lane.b32.xlu1 %v3486_v63, %s5937_s5  ;;  %s5945_s5 = smov 94  }
 0x39d   : > { %v3656_v16 = vpop.permute.xlu0 %870  ;;  %v3658_v17 = vpop.permute.xlu1 %778 }
 0x39f   : > { %2267 = vrot.lane.b32.xlu0 %v3480_v61, %s3248_s8  ;;  %2175 = vrot.lane.b32.xlu1 %v3486_v63, %s5939_s6  ;;  %s5947_s6 = smov 93  }
 0x3a1   : > { %v3664_v18 = vpop.permute.xlu0 %917  ;;  %v3666_v19 = vpop.permute.xlu1 %825 }
 0x3a3   : > { %2314 = vrot.lane.b32.xlu0 %v3480_v61, %s5943_s23  ;;  %2222 = vrot.lane.b32.xlu1 %v3486_v63, %s5941_s26  ;;  %s5949_s26 = smov 83  }
 0x3a5   : > { %v3672_v20 = vpop.permute.xlu0 %964  ;;  %v3674_v21 = vpop.permute.xlu1 %872 }
 0x3a7   : > { %2361 = vrot.lane.b32.xlu0 %v3480_v61, %s5945_s5  ;;  %2269 = vrot.lane.b32.xlu1 %v3486_v63, %s3248_s8 }
 0x3a9   : > { %v3680_v22 = vpop.permute.xlu0 %1011  ;;  %v3682_v23 = vpop.permute.xlu1 %919 }
 0x3ab   : > { %2408 = vrot.lane.b32.xlu0 %v3480_v61, %s5947_s6  ;;  %2316 = vrot.lane.b32.xlu1 %v3486_v63, %s5943_s23  ;;  %s5951_s23 = smov 82  }
 0x3ad   : > { %v3690_v25 = vpop.permute.xlu0 %1058  ;;  %v3692_v26 = vpop.permute.xlu1 %966 }
 0x3ae   : > { %6050 = vst [vmem:[#allocation15_spill] sm:$0xff] %v3690_v25 }
 0x3af   : > { %2455 = vrot.lane.b32.xlu0 %v3480_v61, %s5949_s26  ;;  %2363 = vrot.lane.b32.xlu1 %v3486_v63, %s5945_s5  ;;  %s5953_s5 = smov 81  }
 0x3b1   : > { %v3698_v28 = vpop.permute.xlu0 %1105  ;;  %v3700_v29 = vpop.permute.xlu1 %1013 }
 0x3b2   : > { %6051 = vst [vmem:[#allocation16_spill] sm:$0xff] %v3698_v28 }
 0x3b3   : > { %2502 = vrot.lane.b32.xlu0 %v3480_v61, %s5951_s23  ;;  %2410 = vrot.lane.b32.xlu1 %v3486_v63, %s5947_s6  ;;  %s3255_s6 = smov 80  }
 0x3b5   : > { %v3708_v32 = vpop.permute.xlu0 %1152  ;;  %v3710_v33 = vpop.permute.xlu1 %1060 }
 0x3b6   : > { %6052 = vst [vmem:[#allocation17_spill] sm:$0xff] %v3708_v32  ;;  %v4069_v32 = vld [vmem:[#allocation5 + $0x10] ss:$8 sm:$0x3] }
 0x3b7   : > { %2549 = vrot.lane.b32.xlu0 %v3480_v61, %s5953_s5  ;;  %2457 = vrot.lane.b32.xlu1 %v3486_v63, %s5949_s26  ;;  %s3256_s26 = smov 79  }
 0x3b9   : > { %v3716_v36 = vpop.permute.xlu0 %1199  ;;  %v3718_v37 = vpop.permute.xlu1 %1107 }
 0x3ba   : > { %6053 = vst [vmem:[#allocation18_spill] sm:$0xff] %v3716_v36  ;;  %6054 = vst [vmem:[#allocation19_spill] sm:$0xff] %v3718_v37 }
 0x3bb   : > { %2596 = vrot.lane.b32.xlu0 %v3480_v61, %s3255_s6  ;;  %2504 = vrot.lane.b32.xlu1 %v3486_v63, %s5951_s23  ;;  %s3257_s23 = smov 78  }
 0x3bd   : > { %v3724_v40 = vpop.permute.xlu0 %1246  ;;  %v3726_v42 = vpop.permute.xlu1 %1154 }
 0x3be   : > { %6055 = vst [vmem:[#allocation20_spill] sm:$0xff] %v3724_v40  ;;  %6056 = vst [vmem:[#allocation21_spill] sm:$0xff] %v3726_v42 }
 0x3bf   : > { %2643 = vrot.lane.b32.xlu0 %v3480_v61, %s3256_s26  ;;  %2551 = vrot.lane.b32.xlu1 %v3486_v63, %s5953_s5  ;;  %s3258_s5 = smov 77  }
 0x3c1   : > { %v3732_v45 = vpop.permute.xlu0 %1293  ;;  %v3734_v50 = vpop.permute.xlu1 %1201 }
 0x3c2   : > { %6057 = vst [vmem:[#allocation22_spill] sm:$0xff] %v3732_v45  ;;  %6058 = vst [vmem:[#allocation23_spill] sm:$0xff] %v3734_v50 }
 0x3c3   : > { %2690 = vrot.lane.b32.xlu0 %v3480_v61, %s3257_s23  ;;  %2598 = vrot.lane.b32.xlu1 %v3486_v63, %s3255_s6 }
 0x3c5   : > { %v3740_v53 = vpop.permute.xlu0 %1340  ;;  %v3742_v54 = vpop.permute.xlu1 %1248 }
 0x3c6   : > { %6059 = vst [vmem:[#allocation24_spill] sm:$0xff] %v3740_v53  ;;  %6060 = vst [vmem:[#allocation25_spill] sm:$0xff] %v3742_v54 }
 0x3c7   : > { %2737 = vrot.lane.b32.xlu0 %v3480_v61, %s3258_s5  ;;  %2645 = vrot.lane.b32.xlu1 %v3486_v63, %s3256_s26 }
 0x3c9   : > { %v3750_v57 = vpop.permute.xlu0 %1387  ;;  %v3752_v58 = vpop.permute.xlu1 %1295 }
 0x3ca   : > { %6061 = vst [vmem:[#allocation26_spill] sm:$0xff] %v3750_v57  ;;  %6062 = vst [vmem:[#allocation27_spill] sm:$0xff] %v3752_v58 }
 0x3cb   : > { %502 = vrot.lane.b32.xlu0 %v3748_v56, %s3212_s13  ;;  %2692 = vrot.lane.b32.xlu1 %v3486_v63, %s3257_s23 }
 0x3cd   : > { %v3758_v60 = vpop.permute.xlu0 %1434  ;;  %v3760_v62 = vpop.permute.xlu1 %1342 }
 0x3ce   : > { %6063 = vst [vmem:[#allocation28_spill] sm:$0xff] %v3758_v60  ;;  %6064 = vst [vmem:[#allocation29_spill] sm:$0xff] %v3760_v62  ;;  %v4021_v62 = vld [vmem:[#allocation5 + $0x4] ss:$8 sm:$0x3] }
 0x3cf   : > { %548 = vrot.lane.b32.xlu0 %v3748_v56, %s3211_s29  ;;  %2739 = vrot.lane.b32.xlu1 %v3486_v63, %s3258_s5 }
 0x3d1   : > { %v3768_v27 = vpop.permute.xlu0 %1481  ;;  %v3770_v30 = vpop.permute.xlu1 %1389 }
 0x3d2   : > { %6065 = vst [vmem:[#allocation30_spill] sm:$0xff] %v3768_v27  ;;  %6066 = vst [vmem:[#allocation31_spill] sm:$0xff] %v3770_v30 }
 0x3d3   : > { %595 = vrot.lane.b32.xlu0 %v3748_v56, %s3213_s14  ;;  %504 = vrot.lane.b32.xlu1 %v3766_v24, %s3212_s13  ;;  %s6086_s13 = smov 31  }
 0x3d5   : > { %v3776_v31 = vpop.permute.xlu0 %1528  ;;  %v3778_v34 = vpop.permute.xlu1 %1436 }
 0x3d6   : > { %6067 = vst [vmem:[#allocation32_spill] sm:$0xff] %v3776_v31  ;;  %6068 = vst [vmem:[#allocation33_spill] sm:$0xff] %v3778_v34 }
 0x3d7   : > { %642 = vrot.lane.b32.xlu0 %v3748_v56, %s3214_s11  ;;  %550 = vrot.lane.b32.xlu1 %v3766_v24, %s3211_s29  ;;  %s6083_s29 = smov 32  }
 0x3d9   : > { %v3784_v35 = vpop.permute.xlu0 %1575  ;;  %v3786_v38 = vpop.permute.xlu1 %1483 }
 0x3da   : > { %6069 = vst [vmem:[#allocation34_spill] sm:$0xff] %v3784_v35  ;;  %6070 = vst [vmem:[#allocation35_spill] sm:$0xff] %v3786_v38  ;;  %v4011_v38 = vld [vmem:[#allocation5 + $0x61] ss:$8 sm:$0x3] }
 0x3db   : > { %689 = vrot.lane.b32.xlu0 %v3748_v56, %s3215_s20  ;;  %597 = vrot.lane.b32.xlu1 %v3766_v24, %s3213_s14  ;;  %s6089_s14 = smov 30  }
 0x3dd   : > { %v3792_v39 = vpop.permute.xlu0 %1656  ;;  %v3794_v43 = vpop.permute.xlu1 %1530 }
 0x3de   : > { %6071 = vst [vmem:[#allocation36_spill] sm:$0xff] %v3792_v39  ;;  %6072 = vst [vmem:[#allocation37_spill] sm:$0xff] %v3794_v43  ;;  %v3987_v39 = vld [vmem:[#allocation5 + $0x1] ss:$8 sm:$0x3] }
 0x3df   : > { %736 = vrot.lane.b32.xlu0 %v3748_v56, %s3216_s25  ;;  %644 = vrot.lane.b32.xlu1 %v3766_v24, %s3214_s11  ;;  %s6092_s11 = smov 29  }
 0x3e1   : > { %v3800_v44 = vpop.permute.xlu0 %1703  ;;  %v3802_v51 = vpop.permute.xlu1 %1577 }
 0x3e2   : > { %6073 = vst [vmem:[#allocation38_spill] sm:$0xff] %v3800_v44  ;;  %6074 = vst [vmem:[#allocation39_spill] sm:$0xff] %v3802_v51  ;;  %v1625_v44 = vld [vmem:[#allocation5 + $0x91] ss:$8 sm:$0x3] }
 0x3e3   : > { %783 = vrot.lane.b32.xlu0 %v3748_v56, %s3217_s7  ;;  %691 = vrot.lane.b32.xlu1 %v3766_v24, %s3215_s20  ;;  %s6095_s20 = smov 19   ;;  %v3993_v51 = vld [vmem:[#allocation5 + $0x2] ss:$8 sm:$0x3] }
 0x3e5   : > { %v3808_v52 = vpop.permute.xlu0 %1750  ;;  %v3810_v55 = vpop.permute.xlu1 %1658 }
 0x3e6   : > { %6075 = vst [vmem:[#allocation40_spill] sm:$0xff] %v3808_v52  ;;  %6076 = vst [vmem:[#allocation41_spill] sm:$0xff] %v3810_v55 }
 0x3e7   : > { %830 = vrot.lane.b32.xlu0 %v3748_v56, %s3218_s12  ;;  %738 = vrot.lane.b32.xlu1 %v3766_v24, %s3216_s25  ;;  %s6098_s25 = smov 18  }
 0x3e9   : > { %v3816_v59 = vpop.permute.xlu0 %1797  ;;  %v3818_v47 = vpop.permute.xlu1 %1705 }
 0x3ea   : > { %6077 = vst [vmem:[#allocation42_spill] sm:$0xff] %v3816_v59  ;;  %6078 = vst [vmem:[#allocation43_spill] sm:$0xff] %v3818_v47  ;;  %v3985_v47 = vld [vmem:[#allocation5] ss:$8 sm:$0x3] }
 0x3eb   : > { %877 = vrot.lane.b32.xlu0 %v3748_v56, %s3219_s28  ;;  %785 = vrot.lane.b32.xlu1 %v3766_v24, %s3217_s7  ;;  %s6101_s7 = smov 17  }
 0x3ed   : > { %v3824_v49 = vpop.permute.xlu0 %1844  ;;  %v3826_v46 = vpop.permute.xlu1 %1752 }
 0x3ee   : > { %6079 = vst [vmem:[#allocation44_spill] sm:$0xff] %v3824_v49  ;;  %6080 = vst [vmem:[#allocation45_spill] sm:$0xff] %v3826_v46 }
 0x3ef   : > { %924 = vrot.lane.b32.xlu0 %v3748_v56, %s3220_s21  ;;  %832 = vrot.lane.b32.xlu1 %v3766_v24, %s3218_s12  ;;  %s6104_s12 = smov 16  }
 0x3f1   : > { %v3832_v48 = vpop.permute.xlu0 %1891  ;;  %v3834_v59 = vpop.permute.xlu1 %1799 }
 0x3f2   : > { %6081 = vst [vmem:[#allocation46_spill] sm:$0xff] %v3832_v48  ;;  %6082 = vst [vmem:[#allocation47_spill] sm:$0xff] %v3834_v59 }
 0x3f3   : > { %971 = vrot.lane.b32.xlu0 %v3748_v56, %s6083_s29  ;;  %879 = vrot.lane.b32.xlu1 %v3766_v24, %s3219_s28  ;;  %s6107_s28 = smov 15  }
 0x3f5   : > { %v3840_v52 = vpop.permute.xlu0 %1938  ;;  %v3842_v49 = vpop.permute.xlu1 %1846 }
 0x3f6   : > { %6084 = vst [vmem:[#allocation48_spill] sm:$0xff] %v3840_v52  ;;  %6085 = vst [vmem:[#allocation49_spill] sm:$0xff] %v3842_v49 }
 0x3f7   : > { %1018 = vrot.lane.b32.xlu0 %v3748_v56, %s6086_s13  ;;  %926 = vrot.lane.b32.xlu1 %v3766_v24, %s3220_s21  ;;  %s6110_s21 = smov 14  }
 0x3f9   : > { %v3848_v46 = vpop.permute.xlu0 %1985  ;;  %v3850_v48 = vpop.permute.xlu1 %1893 }
 0x3fa   : > { %6087 = vst [vmem:[#allocation50_spill] sm:$0xff] %v3848_v46  ;;  %6088 = vst [vmem:[#allocation51_spill] sm:$0xff] %v3850_v48 }
 0x3fb   : > { %1065 = vrot.lane.b32.xlu0 %v3748_v56, %s6089_s14  ;;  %973 = vrot.lane.b32.xlu1 %v3766_v24, %s6083_s29  ;;  %s6113_s29 = smov 13  }
 0x3fd   : > { %v3856_v59 = vpop.permute.xlu0 %2032  ;;  %v3858_v52 = vpop.permute.xlu1 %1940 }
 0x3fe   : > { %6090 = vst [vmem:[#allocation52_spill] sm:$0xff] %v3856_v59  ;;  %6091 = vst [vmem:[#allocation53_spill] sm:$0xff] %v3858_v52 }
 0x3ff   : > { %1112 = vrot.lane.b32.xlu0 %v3748_v56, %s6092_s11  ;;  %1020 = vrot.lane.b32.xlu1 %v3766_v24, %s6086_s13  ;;  %s6116_s13 = smov 3  }
 0x401   : > { %v3864_v49 = vpop.permute.xlu0 %2079  ;;  %v3866_v46 = vpop.permute.xlu1 %1987 }
 0x402   : > { %6093 = vst [vmem:[#allocation54_spill] sm:$0xff] %v3864_v49  ;;  %6094 = vst [vmem:[#allocation55_spill] sm:$0xff] %v3866_v46 }
 0x403   : > { %1159 = vrot.lane.b32.xlu0 %v3748_v56, %s6095_s20  ;;  %1067 = vrot.lane.b32.xlu1 %v3766_v24, %s6089_s14  ;;  %s6119_s14 = smov 2  }
 0x405   : > { %v3872_v48 = vpop.permute.xlu0 %2126  ;;  %v3874_v59 = vpop.permute.xlu1 %2034 }
 0x406   : > { %6096 = vst [vmem:[#allocation56_spill] sm:$0xff] %v3872_v48  ;;  %6097 = vst [vmem:[#allocation57_spill] sm:$0xff] %v3874_v59 }
 0x407   : > { %1206 = vrot.lane.b32.xlu0 %v3748_v56, %s6098_s25  ;;  %1114 = vrot.lane.b32.xlu1 %v3766_v24, %s6092_s11  ;;  %s6122_s11 = smov 1  }
 0x409   : > { %v3880_v52 = vpop.permute.xlu0 %2173  ;;  %v3882_v49 = vpop.permute.xlu1 %2081 }
 0x40a   : > { %6099 = vst [vmem:[#allocation58_spill] sm:$0xff] %v3880_v52  ;;  %6100 = vst [vmem:[#allocation59_spill] sm:$0xff] %v3882_v49 }
 0x40b   : > { %1253 = vrot.lane.b32.xlu0 %v3748_v56, %s6101_s7  ;;  %1161 = vrot.lane.b32.xlu1 %v3766_v24, %s6095_s20  ;;  %s6125_s20 = smov 127  }
 0x40d   : > { %v3888_v46 = vpop.permute.xlu0 %2220  ;;  %v3890_v48 = vpop.permute.xlu1 %2128 }
 0x40e   : > { %6102 = vst [vmem:[#allocation60_spill] sm:$0xff] %v3888_v46  ;;  %6103 = vst [vmem:[#allocation61_spill] sm:$0xff] %v3890_v48 }
 0x40f   : > { %1300 = vrot.lane.b32.xlu0 %v3748_v56, %s6104_s12  ;;  %1208 = vrot.lane.b32.xlu1 %v3766_v24, %s6098_s25  ;;  %s6130_s25 = smov 125  }
 0x411   : > { %v3896_v59 = vpop.permute.xlu0 %2267  ;;  %v3898_v52 = vpop.permute.xlu1 %2175 }
 0x412   : > { %6105 = vst [vmem:[#allocation62_spill] sm:$0xff] %v3896_v59  ;;  %6106 = vst [vmem:[#allocation63_spill] sm:$0xff] %v3898_v52 }
 0x413   : > { %1347 = vrot.lane.b32.xlu0 %v3748_v56, %s6107_s28  ;;  %1255 = vrot.lane.b32.xlu1 %v3766_v24, %s6101_s7  ;;  %s6133_s7 = smov 115  }
 0x415   : > { %v3904_v49 = vpop.permute.xlu0 %2314  ;;  %v3906_v46 = vpop.permute.xlu1 %2222 }
 0x416   : > { %6108 = vst [vmem:[#allocation64_spill] sm:$0xff] %v3904_v49  ;;  %6109 = vst [vmem:[#allocation65_spill] sm:$0xff] %v3906_v46 }
 0x417   : > { %1394 = vrot.lane.b32.xlu0 %v3748_v56, %s6110_s21  ;;  %1302 = vrot.lane.b32.xlu1 %v3766_v24, %s6104_s12 }
 0x419   : > { %v3912_v48 = vpop.permute.xlu0 %2361  ;;  %v3914_v59 = vpop.permute.xlu1 %2269 }
 0x41a   : > { %6111 = vst [vmem:[#allocation66_spill] sm:$0xff] %v3912_v48  ;;  %6112 = vst [vmem:[#allocation67_spill] sm:$0xff] %v3914_v59 }
 0x41b   : > { %1441 = vrot.lane.b32.xlu0 %v3748_v56, %s6113_s29  ;;  %1349 = vrot.lane.b32.xlu1 %v3766_v24, %s6107_s28  ;;  %s6135_s28 = smov 114  }
 0x41d   : > { %v3920_v52 = vpop.permute.xlu0 %2408  ;;  %v3922_v49 = vpop.permute.xlu1 %2316 }
 0x41e   : > { %6114 = vst [vmem:[#allocation68_spill] sm:$0xff] %v3920_v52  ;;  %6115 = vst [vmem:[#allocation69_spill] sm:$0xff] %v3922_v49 }
 0x41f   : > { %1488 = vrot.lane.b32.xlu0 %v3748_v56, %s6116_s13  ;;  %1396 = vrot.lane.b32.xlu1 %v3766_v24, %s6110_s21  ;;  %s6140_s21 = smov 112  }
 0x421   : > { %v3928_v46 = vpop.permute.xlu0 %2455  ;;  %v3930_v48 = vpop.permute.xlu1 %2363 }
 0x422   : > { %6117 = vst [vmem:[#allocation70_spill] sm:$0xff] %v3928_v46  ;;  %6118 = vst [vmem:[#allocation71_spill] sm:$0xff] %v3930_v48 }
 0x423   : > { %1535 = vrot.lane.b32.xlu0 %v3748_v56, %s6119_s14  ;;  %1443 = vrot.lane.b32.xlu1 %v3766_v24, %s6113_s29  ;;  %s6143_s29 = smov 111  }
 0x425   : > { %v3936_v59 = vpop.permute.xlu0 %2502  ;;  %v3938_v52 = vpop.permute.xlu1 %2410 }
 0x426   : > { %6120 = vst [vmem:[#allocation72_spill] sm:$0xff] %v3936_v59  ;;  %6121 = vst [vmem:[#allocation73_spill] sm:$0xff] %v3938_v52 }
 0x427   : > { %1582 = vrot.lane.b32.xlu0 %v3748_v56, %s6122_s11  ;;  %1490 = vrot.lane.b32.xlu1 %v3766_v24, %s6116_s13  ;;  %s6144_s13 = smov 110  }
 0x429   : > { %v3944_v49 = vpop.permute.xlu0 %2549  ;;  %v3946_v46 = vpop.permute.xlu1 %2457 }
 0x42a   : > { %6123 = vst [vmem:[#allocation74_spill] sm:$0xff] %v3944_v49  ;;  %6124 = vst [vmem:[#allocation75_spill] sm:$0xff] %v3946_v46 }
 0x42b   : > { %1663 = vrot.lane.b32.xlu0 %v3748_v56, %s6125_s20  ;;  %1537 = vrot.lane.b32.xlu1 %v3766_v24, %s6119_s14  ;;  %s6145_s14 = smov 109  }
 0x42d   : > { %v3952_v48 = vpop.permute.xlu0 %2596  ;;  %v3954_v59 = vpop.permute.xlu1 %2504 }
 0x42e   : > { %6126 = vst [vmem:[#allocation76_spill] sm:$0xff] %v3952_v48  ;;  %6127 = vst [vmem:[#allocation77_spill] sm:$0xff] %v3954_v59 }
 0x42f   : > { %1710 = vrot.lane.b32.xlu0 %v3748_v56, %s3236_s24  ;;  %1584 = vrot.lane.b32.xlu1 %v3766_v24, %s6122_s11  ;;  %s6150_s11 = smov 99  }
 0x431   : > { %v3960_v52 = vpop.permute.xlu0 %2643  ;;  %v3962_v49 = vpop.permute.xlu1 %2551 }
 0x432   : > { %6128 = vst [vmem:[#allocation78_spill] sm:$0xff] %v3960_v52  ;;  %6129 = vst [vmem:[#allocation79_spill] sm:$0xff] %v3962_v49  ;;  %v3979_v49 = vsub.s32 1, %v3449_v14 }
 0x433   : > { %1757 = vrot.lane.b32.xlu0 %v3748_v56, %s6130_s25  ;;  %1665 = vrot.lane.b32.xlu1 %v3766_v24, %s6125_s20  ;;  %s6155_s20 = smov 98  }
 0x434   : > { %v1647_v14 = vrot.slane %v1625_v44, %v3979_v49  ;;  %v519_v27 = vrot.slane %v3985_v47, %v3979_v49  ;;  %v566_v60 = vrot.slane %v3987_v39, %v3979_v49 }
 0x435   : > { %v3968_v46 = vpop.permute.xlu0 %2690  ;;  %v3970_v48 = vpop.permute.xlu1 %2598 }
 0x436   : > { %6131 = vst [vmem:[#allocation80_spill] sm:$0xff] %v3968_v46  ;;  %6132 = vst [vmem:[#allocation81_spill] sm:$0xff] %v3970_v48  ;;  %v1623_v46 = vld [vmem:[#allocation5 + $0x30] ss:$8 sm:$0x3]  ;;  %v1651_v53 = vmul.f32 %v1647_v14, %v3766_v24 }
 0x437   : > { %1804 = vrot.lane.b32.xlu0 %v3748_v56, %s6133_s7  ;;  %1712 = vrot.lane.b32.xlu1 %v3766_v24, %s3236_s24  ;;  %v2751_v48 = vld [vmem:[#allocation5 + $0x60] ss:$8 sm:$0x3]  ;;  %v1630_v31 = vrot.slane %v1623_v46, %v3461_v41  ;;  %v1634_v43 = vrot.slane %v1623_v46, %v3979_v49  ;;  %s6137_s24 = smov 113  }
 0x438   : > { %v4036_v14 = vld [vmem:[#allocation5 + $0x5] ss:$8 sm:$0x3] }
 0x439   : > { %v2738_v59 = vpop.permute.xlu0 %2737  ;;  %v3976_v52 = vpop.permute.xlu1 %2645  ;;  %v1638_v58 = vmul.f32 %v1634_v43, %v3486_v63  ;;  %v1637_v34 = vmul.f32 %v1630_v31, %v3480_v61  ;;  %v532_v61 = vrot.slane %v4011_v38, %v3979_v49  ;;  %v613_v63 = vrot.slane %v3993_v51, %v3979_v49 }
 0x43a   : > { %6134 = vst [vmem:[#allocation82_spill] sm:$0xff] %v3976_v52  ;;  %v1643_v52 = vrot.slane %v1625_v44, %v3461_v41 }
 0x43b   : > { %1851 = vrot.lane.b32.xlu0 %v3748_v56, %s6135_s28  ;;  %1759 = vrot.lane.b32.xlu1 %v3766_v24, %s6130_s25  ;;  %v4063_v36 = vadd.f32 %v1651_v53, %v1638_v58  ;;  %v546_v53 = vsel %vm545_vm7, %v3600_v0, %v3618_v5  ;;  %v4082_v58 = vld [vmem:[#allocation5 + $0x11] ss:$8 sm:$0x3]  ;;  %s6158_s25 = smov 97  }
 0x43c   : > { %v1650_v30 = vmul.f32 %v1643_v52, %v3748_v56  ;;  %v500_v52 = vsel %vm499_vm5, %v3602_v1, %v3610_v3 }
 0x43d   : > { %v503_v55 = vpop.permute.xlu0 %502  ;;  %v3989_v35 = vpop.permute.xlu1 %2692  ;;  %6141 = vst [vmem:[#allocation86_spill] sm:$0xff] %v4063_v36  ;;  %v523_v50 = vmul.f32 %v519_v27, %v500_v52  ;;  %v570_v52 = vmul.f32 %v566_v60, %v546_v53  ;;  %v594_v53 = vsel %vm592_vm8, %v3626_v7, %v3608_v2 }
 0x43e   : > { %6136 = vst [vmem:[#allocation83_spill] sm:$0xff] %v3989_v35  ;;  %v2762_v35 = vrot.slane %v2751_v48, %v3979_v49  ;;  %v4017_v48 = vld [vmem:[#allocation5 + $0x3] ss:$8 sm:$0x3]  ;;  %v4065_v31 = vadd.f32 %v1650_v30, %v1637_v34  ;;  %v593_v30 = vsel %vm592_vm8, %v3608_v2, %v3626_v7  ;;  %v6146_v7 = vrot.slane %v3985_v47, %v3461_v41 }
 0x43f   : > { %1898 = vrot.lane.b32.xlu0 %v3748_v56, %s6137_s24  ;;  %1806 = vrot.lane.b32.xlu1 %v3766_v24, %s6133_s7  ;;  %v4108_v34 = vld [vmem:[#allocation5 + $0x13] ss:$8 sm:$0x3]  ;;  %v617_v37 = vmul.f32 %v613_v63, %v593_v30  ;;  %v6148_v30 = vrot.slane %v3993_v51, %v3461_v41  ;;  %v687_v47 = vsel %vm686_vm10, %v3624_v6, %v3642_v11  ;;  %s6162_s7 = smov 95  }
 0x440   : > { %6142 = vst [vmem:[#allocation87_spill] sm:$0xff] %v4065_v31  ;;  %v4106_v31 = vld [vmem:[#allocation5 + $0x12] ss:$8 sm:$0x3]  ;;  %v1036_v25 = vrot.slane %v4108_v34, %v3979_v49  ;;  %v528_v51 = vrot.slane %v4011_v38, %v3461_v41 }
 0x441   : > { %v549_v57 = vpop.permute.xlu0 %548  ;;  %v2740_v44 = vpop.permute.xlu1 %2739 }
 0x442   : > { %v4025_v46 = vsel %vm6029_vm6, %v2738_v59, %v2740_v44  ;;  %v2743_v45 = vsel %vm6029_vm6, %v2740_v44, %v2738_v59  ;;  %v4059_v44 = vld [vmem:[#allocation5 + $0x6] ss:$8 sm:$0x3]  ;;  %vm2647_vm6 = vcmp.lt.s32.totalorder %v3446_v12, 79 }
 0x443   : > { %6138 = vst [vmem:[#allocation84_spill] sm:$0xff] %v4025_v46  ;;  %v4038_v40 = vmul.f32 %v2762_v35, %v2743_v45  ;;  %1945 = vrot.lane.b32.xlu0 %v3748_v56, %s6140_s21  ;;  %1853 = vrot.lane.b32.xlu1 %v3766_v24, %s6135_s28  ;;  %v4053_v35 = vld [vmem:[#allocation5 + $0x62] ss:$8 sm:$0x3]  ;;  %s6165_s28 = smov 94  }
 0x445   : > { %6139 = vst [vmem:[#allocation85_spill] sm:$0xff] %v4038_v40  ;;  %v4061_v40 = vld [vmem:[#allocation5 + $0x7] ss:$8 sm:$0x3]  ;;  %v596_v46 = vpop.permute.xlu0 %595  ;;  %v505_v54 = vpop.permute.xlu1 %504 }
 0x446   : > { %v506_v43 = vsel %vm499_vm5, %v503_v55, %v505_v54  ;;  %v4075_v59 = vsel %vm499_vm5, %v505_v54, %v503_v55  ;;  %v579_v54 = vrot.slane %v4053_v35, %v3979_v49 }
 0x447   : > { %v536_v27 = vmul.f32 %v532_v61, %v506_v43  ;;  %1992 = vrot.lane.b32.xlu0 %v3748_v56, %s6143_s29  ;;  %1900 = vrot.lane.b32.xlu1 %v3766_v24, %s6137_s24  ;;  %v4098_v61 = vld [vmem:[#allocation5 + $0x63] ss:$8 sm:$0x3]  ;;  %s6171_s24 = smov 83  }
 0x448   : > { %v626_v60 = vrot.slane %v4098_v61, %v3979_v49 }
 0x449   : > { %v4110_v36 = vadd.f32 %v536_v27, %v523_v50  ;;  %v643_v55 = vpop.permute.xlu0 %642  ;;  %v551_v42 = vpop.permute.xlu1 %550 }
 0x44a   : > { %v552_v43 = vsel %vm545_vm7, %v549_v57, %v551_v42  ;;  %v4118_v45 = vsel %vm545_vm7, %v551_v42, %v549_v57  ;;  %v547_v42 = vsel %vm545_vm7, %v3618_v5, %v3600_v0  ;;  %v640_v0 = vsel %vm639_vm9, %v3616_v4, %v3634_v9 }
 0x44b   : > { %v583_v50 = vmul.f32 %v579_v54, %v552_v43  ;;  %2039 = vrot.lane.b32.xlu0 %v3748_v56, %s6144_s13  ;;  %1947 = vrot.lane.b32.xlu1 %v3766_v24, %s6140_s21  ;;  %v4139_v54 = vld [vmem:[#allocation5 + $0x64] ss:$8 sm:$0x3]  ;;  %v501_v43 = vsel %vm499_vm5, %v3610_v3, %v3602_v1  ;;  %vm1203_vm5 = vcmp.lt.s32.totalorder %v3446_v12, 18  ;;  %s6174_s21 = smov 82   ;;  %vm1250_vm7 = vcmp.lt.s32.totalorder %v3446_v12, 17 }
 0x44c   : > { %v673_v5 = vrot.slane %v4139_v54, %v3979_v49 }
 0x44d   : > { %v4153_v57 = vadd.f32 %v583_v50, %v570_v52  ;;  %v690_v27 = vpop.permute.xlu0 %689  ;;  %v598_v28 = vpop.permute.xlu1 %597  ;;  %v4185_v52 = vmul.f32 %v6148_v30, %v594_v53  ;;  %v641_v50 = vsel %vm639_vm9, %v3634_v9, %v3616_v4  ;;  %v6149_v4 = vrot.slane %v4017_v48, %v3979_v49 }
 0x44e   : > { %v599_v1 = vsel %vm592_vm8, %v596_v46, %v598_v28  ;;  %v4161_v3 = vsel %vm592_vm8, %v598_v28, %v596_v46  ;;  %v522_v28 = vmul.f32 %v6146_v7, %v501_v43  ;;  %v6147_v46 = vrot.slane %v3987_v39, %v3461_v41 }
 0x44f   : > { %v630_v2 = vmul.f32 %v626_v60, %v599_v1  ;;  %2086 = vrot.lane.b32.xlu0 %v3748_v56, %s6145_s14  ;;  %1994 = vrot.lane.b32.xlu1 %v3766_v24, %s6143_s29  ;;  %v698_v60 = vld [vmem:[#allocation5 + $0x65] ss:$8 sm:$0x3]  ;;  %v688_v39 = vsel %vm686_vm10, %v3642_v11, %v3624_v6  ;;  %v664_v9 = vmul.f32 %v6149_v4, %v640_v0  ;;  %v745_v0 = vld [vmem:[#allocation5 + $0x66] ss:$8 sm:$0x3] }
 0x450   : > { %v4180_v63 = vmul.f32 %v6147_v46, %v547_v42  ;;  %v735_v1 = vsel %vm733_vm11, %v3650_v15, %v3632_v8  ;;  %v720_v38 = vrot.slane %v698_v60, %v3979_v49  ;;  %v6153_v30 = vrot.slane %v4021_v62, %v3979_v49  ;;  %s6177_s29 = smov 81  }
 0x451   : > { %v4201_v42 = vadd.f32 %v630_v2, %v617_v37  ;;  %v737_v53 = vpop.permute.xlu0 %736  ;;  %v645_v43 = vpop.permute.xlu1 %644  ;;  %v716_v37 = vrot.slane %v698_v60, %v3461_v41  ;;  %v6151_v2 = vrot.slane %v4017_v48, %v3461_v41  ;;  %v734_v4 = vsel %vm733_vm11, %v3632_v8, %v3650_v15 }
 0x452   : > { %v646_v7 = vsel %vm639_vm9, %v643_v55, %v645_v43  ;;  %v4214_v6 = vsel %vm639_vm9, %v645_v43, %v643_v55  ;;  %v6152_v55 = vrot.slane %v4021_v62, %v3461_v41  ;;  %v711_v43 = vmul.f32 %v6153_v30, %v687_v47 }
 0x453   : > { %v677_v11 = vmul.f32 %v673_v5, %v646_v7  ;;  %2133 = vrot.lane.b32.xlu0 %v3748_v56, %s6150_s11  ;;  %2041 = vrot.lane.b32.xlu1 %v3766_v24, %s6144_s13  ;;  %v4226_v46 = vmul.f32 %v6151_v2, %v641_v50  ;;  %v782_v48 = vsel %vm780_vm12, %v3658_v17, %v3640_v10  ;;  %vm1297_vm8 = vcmp.lt.s32.totalorder %v3446_v12, 16 }
 0x454   : > { %v710_v5 = vmul.f32 %v6152_v55, %v688_v39  ;;  %v535_v50 = vmul.f32 %v528_v51, %v4075_v59  ;;  %v575_v60 = vrot.slane %v4053_v35, %v3461_v41  ;;  %v6154_v47 = vrot.slane %v4036_v14, %v3461_v41 }
 0x455   : > { %v4245_v39 = vadd.f32 %v677_v11, %v664_v9  ;;  %v784_v7 = vpop.permute.xlu0 %783  ;;  %v692_v62 = vpop.permute.xlu1 %691  ;;  %v763_v55 = vrot.slane %v745_v0, %v3461_v41  ;;  %v767_v51 = vrot.slane %v745_v0, %v3979_v49  ;;  %v792_v9 = vld [vmem:[#allocation5 + $0x67] ss:$8 sm:$0x3]  ;;  %v622_v30 = vrot.slane %v4098_v61, %v3461_v41 }
 0x456   : > { %v757_v2 = vmul.f32 %v6154_v47, %v735_v1  ;;  %v693_v8 = vsel %vm686_vm10, %v690_v27, %v692_v62  ;;  %v694_v15 = vsel %vm686_vm10, %v692_v62, %v690_v27  ;;  %v6156_v1 = vrot.slane %v4036_v14, %v3979_v49 }
 0x457   : > { %v723_v59 = vmul.f32 %v716_v37, %v694_v15  ;;  %v724_v35 = vmul.f32 %v720_v38, %v693_v8  ;;  %2180 = vrot.lane.b32.xlu0 %v3748_v56, %s6155_s20  ;;  %2088 = vrot.lane.b32.xlu1 %v3766_v24, %s6145_s14  ;;  %v781_v27 = vsel %vm780_vm12, %v3640_v10, %v3658_v17  ;;  %vm1344_vm9 = vcmp.lt.s32.totalorder %v3446_v12, 15 }
 0x458   : > { %v758_v11 = vmul.f32 %v6156_v1, %v734_v4  ;;  %v6157_v37 = vrot.slane %v4059_v44, %v3461_v41  ;;  %v537_v0 = vadd.f32 %v535_v50, %v522_v28  ;;  %v582_v62 = vmul.f32 %v575_v60, %v4118_v45 }
 0x459   : > { %v725_v47 = vadd.f32 %v723_v59, %v710_v5  ;;  %v726_v14 = vadd.f32 %v724_v35, %v711_v43  ;;  %v831_v4 = vpop.permute.xlu0 %830  ;;  %v739_v8 = vpop.permute.xlu1 %738  ;;  %v810_v17 = vrot.slane %v792_v9, %v3461_v41  ;;  %v839_v43 = vld [vmem:[#allocation5 + $0x70] ss:$8 sm:$0x3]  ;;  %v6159_v50 = vrot.slane %v4059_v44, %v3979_v49 }
 0x45a   : > { %v804_v38 = vmul.f32 %v6157_v37, %v782_v48  ;;  %v740_v15 = vsel %vm733_vm11, %v737_v53, %v739_v8  ;;  %v741_v10 = vsel %vm733_vm11, %v739_v8, %v737_v53  ;;  %v814_v48 = vrot.slane %v792_v9, %v3979_v49 }
 0x45b   : > { %v4281_v61 = vadd.f32 %v725_v47, %v537_v0  ;;  %v4284_v28 = vadd.f32 %v726_v14, %v4110_v36  ;;  %v770_v45 = vmul.f32 %v763_v55, %v741_v10  ;;  %v771_v5 = vmul.f32 %v767_v51, %v740_v15  ;;  %2227 = vrot.lane.b32.xlu0 %v3748_v56, %s6158_s25  ;;  %v4335_v14 = vld [vmem:[#allocation5 + $0x14] ss:$8 sm:$0x3] }
 0x45c   : > { %v805_v60 = vmul.f32 %v6159_v50, %v781_v27  ;;  %v828_v53 = vsel %vm827_vm13, %v3648_v13, %v3666_v19  ;;  %v829_v36 = vsel %vm827_vm13, %v3666_v19, %v3648_v13  ;;  %v669_v55 = vrot.slane %v4139_v54, %v3461_v41  ;;  %2135 = vrot.lane.b32.xlu1 %v3766_v24, %s6150_s11  ;;  %v933_v50 = vld [vmem:[#allocation5 + $0x72] ss:$8 sm:$0x3] }
 0x45d   : > { %v584_v59 = vadd.f32 %v582_v62, %v4180_v63  ;;  %v629_v44 = vmul.f32 %v622_v30, %v4161_v3  ;;  %v772_v35 = vadd.f32 %v770_v45, %v757_v2  ;;  %v773_v51 = vadd.f32 %v771_v5, %v758_v11  ;;  %v878_v9 = vpop.permute.xlu0 %877  ;;  %v786_v1 = vpop.permute.xlu1 %785  ;;  %v886_v11 = vld [vmem:[#allocation5 + $0x71] ss:$8 sm:$0x3] }
 0x45e   : > { %v787_v27 = vsel %vm780_vm12, %v784_v7, %v786_v1  ;;  %v788_v13 = vsel %vm780_vm12, %v786_v1, %v784_v7  ;;  %v857_v19 = vrot.slane %v839_v43, %v3461_v41  ;;  %v861_v54 = vrot.slane %v839_v43, %v3979_v49 }
 0x45f   : > { %v4312_v37 = vadd.f32 %v772_v35, %v584_v59  ;;  %v4315_v3 = vadd.f32 %v773_v51, %v4153_v57  ;;  %v817_v63 = vmul.f32 %v810_v17, %v788_v13  ;;  %v818_v2 = vmul.f32 %v814_v48, %v787_v27  ;;  %2274 = vrot.lane.b32.xlu0 %v3748_v56, %s3248_s8 }
 0x460   : > { %v6160_v30 = vrot.slane %v4061_v40, %v3461_v41  ;;  %v6161_v7 = vrot.slane %v4061_v40, %v3979_v49  ;;  %v875_v57 = vsel %vm874_vm14, %v3656_v16, %v3674_v21  ;;  %v876_v47 = vsel %vm874_vm14, %v3674_v21, %v3656_v16  ;;  %2182 = vrot.lane.b32.xlu1 %v3766_v24, %s6155_s20 }
 0x461   : > { %v631_v8 = vadd.f32 %v629_v44, %v4185_v52  ;;  %v676_v40 = vmul.f32 %v669_v55, %v4214_v6  ;;  %v819_v15 = vadd.f32 %v817_v63, %v804_v38  ;;  %v820_v10 = vadd.f32 %v818_v2, %v805_v60  ;;  %v925_v17 = vpop.permute.xlu0 %924  ;;  %v833_v48 = vpop.permute.xlu1 %832  ;;  %v4371_v44 = vld [vmem:[#allocation5 + $0x15] ss:$8 sm:$0x3] }
 0x462   : > { %v851_v0 = vmul.f32 %v6160_v30, %v829_v36  ;;  %v852_v62 = vmul.f32 %v6161_v7, %v828_v53  ;;  %v834_v45 = vsel %vm827_vm13, %v831_v4, %v833_v48  ;;  %v835_v16 = vsel %vm827_vm13, %v833_v48, %v831_v4 }
 0x463   : > { %v904_v21 = vrot.slane %v886_v11, %v3461_v41  ;;  %v908_v5 = vrot.slane %v886_v11, %v3979_v49  ;;  %v4346_v43 = vadd.f32 %v819_v15, %v631_v8  ;;  %v4349_v52 = vadd.f32 %v820_v10, %v4201_v42  ;;  %2321 = vrot.lane.b32.xlu0 %v3748_v56, %s6162_s7  ;;  %v980_v11 = vld [vmem:[#allocation5 + $0x73] ss:$8 sm:$0x3] }
 0x464   : > { %v864_v6 = vmul.f32 %v857_v19, %v835_v16  ;;  %v865_v38 = vmul.f32 %v861_v54, %v834_v45  ;;  %v6163_v60 = vrot.slane %v4069_v32, %v3461_v41  ;;  %v6164_v4 = vrot.slane %v4069_v32, %v3979_v49  ;;  %2229 = vrot.lane.b32.xlu1 %v3766_v24, %s6158_s25  ;;  %s3259_s25 = smov [#allocation7]  }
 0x465   : > { %v922_v42 = vsel %vm921_vm15, %v3664_v18, %v3682_v23  ;;  %v1079_v55 = vrot.slane %v4335_v14, %v3461_v41  ;;  %v923_v59 = vsel %vm921_vm15, %v3682_v23, %v3664_v18  ;;  %v678_v32 = vadd.f32 %v676_v40, %v4226_v46  ;;  %v972_v1 = vpop.permute.xlu0 %971  ;;  %v880_v27 = vpop.permute.xlu1 %879 }
 0x466   : > { %v898_v53 = vmul.f32 %v6163_v60, %v876_v47  ;;  %v899_v36 = vmul.f32 %v6164_v4, %v875_v57  ;;  %v866_v35 = vadd.f32 %v864_v6, %v851_v0  ;;  %v867_v51 = vadd.f32 %v865_v38, %v852_v62  ;;  %v4408_v47 = vld [vmem:[#allocation5 + $0x16] ss:$8 sm:$0x3]  ;;  %v1027_v38 = vld [vmem:[#allocation5 + $0x74] ss:$8 sm:$0x3] }
 0x467   : > { %v881_v13 = vsel %vm874_vm14, %v878_v9, %v880_v27  ;;  %v882_v19 = vsel %vm874_vm14, %v880_v27, %v878_v9  ;;  %v951_v54 = vrot.slane %v933_v50, %v3461_v41  ;;  %v955_v18 = vrot.slane %v933_v50, %v3979_v49  ;;  %2368 = vrot.lane.b32.xlu0 %v3748_v56, %s6165_s28 }
 0x468   : > { %v4381_v23 = vadd.f32 %v866_v35, %v678_v32  ;;  %v4384_v46 = vadd.f32 %v867_v51, %v4245_v39  ;;  %v911_v63 = vmul.f32 %v904_v21, %v882_v19  ;;  %v912_v2 = vmul.f32 %v908_v5, %v881_v13  ;;  %2276 = vrot.lane.b32.xlu1 %v3766_v24, %s3248_s8  ;;  %s6168_s8 = smov 93  }
 0x469   : > { %v6166_v30 = vrot.slane %v4082_v58, %v3461_v41  ;;  %v6167_v9 = vrot.slane %v4082_v58, %v3979_v49  ;;  %v1083_v62 = vrot.slane %v4335_v14, %v3979_v49  ;;  %v1126_v39 = vrot.slane %v4371_v44, %v3461_v41  ;;  %v1019_v15 = vpop.permute.xlu0 %1018  ;;  %v927_v10 = vpop.permute.xlu1 %926 }
 0x46a   : > { %v969_v57 = vsel %vm968_vm0, %v3672_v20, %v3692_v26  ;;  %v970_v58 = vsel %vm968_vm0, %v3692_v26, %v3672_v20  ;;  %v913_v8 = vadd.f32 %v911_v63, %v898_v53  ;;  %v914_v40 = vadd.f32 %v912_v2, %v899_v36  ;;  %v4445_v36 = vld [vmem:[#allocation5 + $0x17] ss:$8 sm:$0x3]  ;;  %v1074_v63 = vld [vmem:[#allocation5 + $0x75] ss:$8 sm:$0x3] }
 0x46b   : > { %v945_v0 = vmul.f32 %v6166_v30, %v923_v59  ;;  %v946_v7 = vmul.f32 %v6167_v9, %v922_v42  ;;  %v928_v48 = vsel %vm921_vm15, %v925_v17, %v927_v10  ;;  %v929_v45 = vsel %vm921_vm15, %v927_v10, %v925_v17  ;;  %2415 = vrot.lane.b32.xlu0 %v3748_v56, %s6168_s8  ;;  %v6173_v30 = vld [vmem:[#allocation15_spill] sm:$0xff] }
 0x46c   : > { %v998_v16 = vrot.slane %v980_v11, %v3461_v41  ;;  %v1002_v21 = vrot.slane %v980_v11, %v3979_v49  ;;  %v4418_v20 = vadd.f32 %v913_v8, %v4281_v61  ;;  %v4421_v26 = vadd.f32 %v914_v40, %v4284_v28  ;;  %2323 = vrot.lane.b32.xlu1 %v3766_v24, %s6162_s7  ;;  %s3139_s7 = sshll.u32 %s3259_s25, 4  ;;  %s3140_s7 = int_to_ptr.vmem [resolvable:$false] %s3139_s7 }
 0x46d   : > { %v958_v5 = vmul.f32 %v951_v54, %v929_v45  ;;  %v959_v6 = vmul.f32 %v955_v18, %v928_v48  ;;  %v6169_v50 = vrot.slane %v4106_v31, %v3461_v41  ;;  %v6170_v60 = vrot.slane %v4106_v31, %v3979_v49  ;;  %v1066_v32 = vpop.permute.xlu0 %1065  ;;  %v974_v35 = vpop.permute.xlu1 %973 }
 0x46e   : > { %v1130_v61 = vrot.slane %v4371_v44, %v3979_v49  ;;  %v1173_v28 = vrot.slane %v4408_v47, %v3461_v41  ;;  %v1016_v4 = vsel %vm1015_vm1, %v3680_v22, %v3700_v29  ;;  %v1017_v31 = vsel %vm1015_vm1, %v3700_v29, %v3680_v22 }
 0x46f   : > { %v992_v17 = vmul.f32 %v6169_v50, %v970_v58  ;;  %v993_v53 = vmul.f32 %v6170_v60, %v969_v57  ;;  %v960_v42 = vadd.f32 %v958_v5, %v945_v0  ;;  %v961_v59 = vadd.f32 %v959_v6, %v946_v7  ;;  %2462 = vrot.lane.b32.xlu0 %v3748_v56, %s6171_s24  ;;  %v1121_v5 = vld [vmem:[#allocation5 + $0x76] ss:$8 sm:$0x3] }
 0x470   : > { %v975_v51 = vsel %vm968_vm0, %v972_v1, %v974_v35  ;;  %v976_v27 = vsel %vm968_vm0, %v974_v35, %v972_v1  ;;  %v1045_v13 = vrot.slane %v1027_v38, %v3461_v41  ;;  %v1049_v19 = vrot.slane %v1027_v38, %v3979_v49  ;;  %2370 = vrot.lane.b32.xlu1 %v3766_v24, %s6165_s28  ;;  %v6175_v38 = vld [vmem:[#allocation19_spill] sm:$0xff]  ;;  %v6176_v50 = vld [vmem:[#allocation16_spill] sm:$0xff]  ;;  %s3141_s28 = scalar_lea.vmem %s3140_s7, 1024 }
 0x471   : > { %v4455_v22 = vadd.f32 %v960_v42, %v4312_v37  ;;  %v4458_v29 = vadd.f32 %v961_v59, %v4315_v3  ;;  %v1005_v54 = vmul.f32 %v998_v16, %v976_v27  ;;  %v1006_v18 = vmul.f32 %v1002_v21, %v975_v51  ;;  %v1113_v57 = vpop.permute.xlu0 %1112  ;;  %v1021_v58 = vpop.permute.xlu1 %1020 }
 0x472   : > { %v6172_v2 = vrot.slane %v4108_v34, %v3461_v41  ;;  %v1040_v11 = vmul.f32 %v1036_v25, %v1016_v4  ;;  %v1177_v37 = vrot.slane %v4408_v47, %v3979_v49  ;;  %v1220_v3 = vrot.slane %v4445_v36, %v3461_v41  ;;  %v4482_v25 = vld [vmem:[#allocation5 + $0x20] ss:$8 sm:$0x3] }
 0x473   : > { %v1063_v0 = vsel %vm1062_vm2, %v6173_v30, %v3710_v33  ;;  %v1064_v34 = vsel %vm1062_vm2, %v3710_v33, %v6173_v30  ;;  %v1007_v9 = vadd.f32 %v1005_v54, %v992_v17  ;;  %v1008_v7 = vadd.f32 %v1006_v18, %v993_v53  ;;  %2509 = vrot.lane.b32.xlu0 %v3748_v56, %s6174_s21  ;;  %v1168_v54 = vld [vmem:[#allocation5 + $0x77] ss:$8 sm:$0x3] }
 0x474   : > { %v1039_v1 = vmul.f32 %v6172_v2, %v1017_v31  ;;  %v1022_v8 = vsel %vm1015_vm1, %v1019_v15, %v1021_v58  ;;  %v1023_v40 = vsel %vm1015_vm1, %v1021_v58, %v1019_v15  ;;  %v1092_v10 = vrot.slane %v1074_v63, %v3461_v41  ;;  %2417 = vrot.lane.b32.xlu1 %v3766_v24, %s6168_s8  ;;  %v6179_v2 = vld [vmem:[#allocation17_spill] sm:$0xff] }
 0x475   : > { %v1096_v48 = vrot.slane %v1074_v63, %v3979_v49  ;;  %v4492_v33 = vadd.f32 %v1007_v9, %v4346_v43  ;;  %v4495_v45 = vadd.f32 %v1008_v7, %v4349_v52  ;;  %v1052_v16 = vmul.f32 %v1045_v13, %v1023_v40  ;;  %v1160_v53 = vpop.permute.xlu0 %1159  ;;  %v1068_v4 = vpop.permute.xlu1 %1067  ;;  %v6178_v63 = vld [vmem:[#allocation21_spill] sm:$0xff] }
 0x476   : > { %v1053_v21 = vmul.f32 %v1049_v19, %v1022_v8  ;;  %v1086_v15 = vmul.f32 %v1079_v55, %v1064_v34  ;;  %v1087_v6 = vmul.f32 %v1083_v62, %v1063_v0  ;;  %v1224_v43 = vrot.slane %v4445_v36, %v3979_v49  ;;  %v4519_v55 = vld [vmem:[#allocation5 + $0x21] ss:$8 sm:$0x3] }
 0x477   : > { %v1267_v52 = vrot.slane %v4482_v25, %v3461_v41  ;;  %v1110_v17 = vsel %vm1109_vm3, %v6176_v50, %v6175_v38  ;;  %v1111_v14 = vsel %vm1109_vm3, %v6175_v38, %v6176_v50  ;;  %v1054_v62 = vadd.f32 %v1052_v16, %v1039_v1  ;;  %2556 = vrot.lane.b32.xlu0 %v3748_v56, %s6177_s29  ;;  %v1215_v16 = vld [vmem:[#allocation5 + $0x80] ss:$8 sm:$0x3] }
 0x478   : > { %v1055_v60 = vadd.f32 %v1053_v21, %v1040_v11  ;;  %v1069_v31 = vsel %vm1062_vm2, %v1066_v32, %v1068_v4  ;;  %v1070_v42 = vsel %vm1062_vm2, %v1068_v4, %v1066_v32  ;;  %v1139_v59 = vrot.slane %v1121_v5, %v3461_v41  ;;  %2464 = vrot.lane.b32.xlu1 %v3766_v24, %s6171_s24 }
 0x479   : > { %v1143_v35 = vrot.slane %v1121_v5, %v3979_v49  ;;  %v4529_v51 = vadd.f32 %v1054_v62, %v4381_v23  ;;  %v1099_v13 = vmul.f32 %v1092_v10, %v1070_v42  ;;  %v1100_v19 = vmul.f32 %v1096_v48, %v1069_v31  ;;  %v1207_v30 = vpop.permute.xlu0 %1206  ;;  %v1115_v0 = vpop.permute.xlu1 %1114  ;;  %v6180_v5 = vld [vmem:[#allocation23_spill] sm:$0xff] }
 0x47a   : > { %v4532_v27 = vadd.f32 %v1055_v60, %v4384_v46  ;;  %v1133_v32 = vmul.f32 %v1126_v39, %v1111_v14  ;;  %v1134_v18 = vmul.f32 %v1130_v61, %v1110_v17  ;;  %v1271_v23 = vrot.slane %v4482_v25, %v3979_v49  ;;  %v4556_v39 = vld [vmem:[#allocation5 + $0x22] ss:$8 sm:$0x3] }
 0x47b   : > { %v1314_v46 = vrot.slane %v4519_v55, %v3461_v41  ;;  %v1157_v1 = vsel %vm1156_vm4, %v6179_v2, %v6178_v63  ;;  %v1158_v44 = vsel %vm1156_vm4, %v6178_v63, %v6179_v2  ;;  %v1101_v61 = vadd.f32 %v1099_v13, %v1086_v15  ;;  %2603 = vrot.lane.b32.xlu0 %v3748_v56, %s3255_s6  ;;  %v6181_v15 = vld [vmem:[#allocation18_spill] sm:$0xff] }
 0x47c   : > { %v1102_v11 = vadd.f32 %v1100_v19, %v1087_v6  ;;  %v1116_v34 = vsel %vm1109_vm3, %v1113_v57, %v1115_v0  ;;  %v1117_v9 = vsel %vm1109_vm3, %v1115_v0, %v1113_v57  ;;  %v1186_v7 = vrot.slane %v1168_v54, %v3461_v41  ;;  %2511 = vrot.lane.b32.xlu1 %v3766_v24, %s6174_s21  ;;  %v1262_v13 = vld [vmem:[#allocation5 + $0x81] ss:$8 sm:$0x3] }
 0x47d   : > { %v1190_v58 = vrot.slane %v1168_v54, %v3979_v49  ;;  %v4566_v8 = vadd.f32 %v1101_v61, %v4418_v20  ;;  %v1146_v10 = vmul.f32 %v1139_v59, %v1117_v9  ;;  %v1147_v48 = vmul.f32 %v1143_v35, %v1116_v34  ;;  %v1254_v50 = vpop.permute.xlu0 %1253  ;;  %v1162_v17 = vpop.permute.xlu1 %1161  ;;  %v6182_v54 = vld [vmem:[#allocation25_spill] sm:$0xff] }
 0x47e   : > { %v4569_v40 = vadd.f32 %v1102_v11, %v4421_v26  ;;  %v1180_v57 = vmul.f32 %v1173_v28, %v1158_v44  ;;  %v1181_v21 = vmul.f32 %v1177_v37, %v1157_v1  ;;  %v1318_v20 = vrot.slane %v4519_v55, %v3979_v49  ;;  %v4593_v28 = vld [vmem:[#allocation5 + $0x23] ss:$8 sm:$0x3] }
 0x47f   : > { %v1361_v26 = vrot.slane %v4556_v39, %v3461_v41  ;;  %v1204_v6 = vsel %vm1203_vm5, %v6181_v15, %v6180_v5  ;;  %v1205_v47 = vsel %vm1203_vm5, %v6180_v5, %v6181_v15  ;;  %v1148_v37 = vadd.f32 %v1146_v10, %v1133_v32  ;;  %2650 = vrot.lane.b32.xlu0 %v3748_v56, %s3256_s26  ;;  %v6183_v32 = vld [vmem:[#allocation20_spill] sm:$0xff]  ;;  %v1309_v10 = vld [vmem:[#allocation5 + $0x82] ss:$8 sm:$0x3] }
 0x480   : > { %v1149_v38 = vadd.f32 %v1147_v48, %v1134_v18  ;;  %v1163_v14 = vsel %vm1156_vm4, %v1160_v53, %v1162_v17  ;;  %v1164_v62 = vsel %vm1156_vm4, %v1162_v17, %v1160_v53  ;;  %v1233_v60 = vrot.slane %v1215_v16, %v3461_v41  ;;  %2558 = vrot.lane.b32.xlu1 %v3766_v24, %s6177_s29 }
 0x481   : > { %v1237_v4 = vrot.slane %v1215_v16, %v3979_v49  ;;  %v4603_v31 = vadd.f32 %v1148_v37, %v4455_v22  ;;  %v1193_v59 = vmul.f32 %v1186_v7, %v1164_v62  ;;  %v1194_v35 = vmul.f32 %v1190_v58, %v1163_v14  ;;  %v1301_v2 = vpop.permute.xlu0 %1300  ;;  %v1209_v1 = vpop.permute.xlu1 %1208  ;;  %v6184_v16 = vld [vmem:[#allocation27_spill] sm:$0xff] }
 0x482   : > { %v4606_v42 = vadd.f32 %v1149_v38, %v4458_v29  ;;  %v1227_v53 = vmul.f32 %v1220_v3, %v1205_v47  ;;  %v1228_v19 = vmul.f32 %v1224_v43, %v1204_v6  ;;  %v1365_v22 = vrot.slane %v4556_v39, %v3979_v49  ;;  %v4630_v3 = vld [vmem:[#allocation5 + $0x24] ss:$8 sm:$0x3] }
 0x483   : > { %v1408_v29 = vrot.slane %v4593_v28, %v3461_v41  ;;  %v1251_v18 = vsel %vm1250_vm7, %v6183_v32, %v6182_v54  ;;  %v1252_v36 = vsel %vm1250_vm7, %v6182_v54, %v6183_v32  ;;  %v1195_v43 = vadd.f32 %v1193_v59, %v1180_v57  ;;  %2697 = vrot.lane.b32.xlu0 %v3748_v56, %s3257_s23  ;;  %v6185_v57 = vld [vmem:[#allocation22_spill] sm:$0xff] }
 0x484   : > { %v1196_v63 = vadd.f32 %v1194_v35, %v1181_v21  ;;  %vm1391_vm10 = vcmp.lt.s32.totalorder %v3446_v12, 14  ;;  %v1210_v44 = vsel %vm1203_vm5, %v1207_v30, %v1209_v1  ;;  %v1211_v61 = vsel %vm1203_vm5, %v1209_v1, %v1207_v30  ;;  %2605 = vrot.lane.b32.xlu1 %v3766_v24, %s3255_s6  ;;  %v1356_v59 = vld [vmem:[#allocation5 + $0x83] ss:$8 sm:$0x3] }
 0x485   : > { %v1280_v11 = vrot.slane %v1262_v13, %v3461_v41  ;;  %v1284_v0 = vrot.slane %v1262_v13, %v3979_v49  ;;  %v4640_v34 = vadd.f32 %v1195_v43, %v4492_v33  ;;  %v1240_v7 = vmul.f32 %v1233_v60, %v1211_v61  ;;  %v1348_v15 = vpop.permute.xlu0 %1347  ;;  %v1256_v6 = vpop.permute.xlu1 %1255  ;;  %v6186_v13 = vld [vmem:[#allocation29_spill] sm:$0xff] }
 0x486   : > { %v4643_v9 = vadd.f32 %v1196_v63, %v4495_v45  ;;  %v1241_v58 = vmul.f32 %v1237_v4, %v1210_v44  ;;  %v1274_v30 = vmul.f32 %v1267_v52, %v1252_v36  ;;  %v1275_v48 = vmul.f32 %v1271_v23, %v1251_v18  ;;  %v4667_v52 = vld [vmem:[#allocation5 + $0x25] ss:$8 sm:$0x3] }
 0x487   : > { %v1412_v33 = vrot.slane %v4593_v28, %v3979_v49  ;;  %v1455_v45 = vrot.slane %v4630_v3, %v3461_v41  ;;  %v1298_v21 = vsel %vm1297_vm8, %v6185_v57, %v6184_v16  ;;  %v1299_v25 = vsel %vm1297_vm8, %v6184_v16, %v6185_v57  ;;  %2744 = vrot.lane.b32.xlu0 %v3748_v56, %s3258_s5  ;;  %v6187_v56 = vld [vmem:[#allocation24_spill] sm:$0xff] }
 0x488   : > { %v1242_v23 = vadd.f32 %v1240_v7, %v1227_v53  ;;  %v1243_v5 = vadd.f32 %v1241_v58, %v1228_v19  ;;  %vm1438_vm11 = vcmp.lt.s32.totalorder %v3446_v12, 13  ;;  %v1257_v47 = vsel %vm1250_vm7, %v1254_v50, %v1256_v6  ;;  %2652 = vrot.lane.b32.xlu1 %v3766_v24, %s3256_s26 }
 0x489   : > { %v1258_v37 = vsel %vm1250_vm7, %v1256_v6, %v1254_v50  ;;  %v1327_v38 = vrot.slane %v1309_v10, %v3461_v41  ;;  %v1331_v17 = vrot.slane %v1309_v10, %v3979_v49  ;;  %v1288_v4 = vmul.f32 %v1284_v0, %v1257_v47  ;;  %v1395_v54 = vpop.permute.xlu0 %1394  ;;  %v1303_v32 = vpop.permute.xlu1 %1302  ;;  %v1403_v0 = vld [vmem:[#allocation5 + $0x84] ss:$8 sm:$0x3] }
 0x48a   : > { %v4677_v14 = vadd.f32 %v1242_v23, %v4529_v51  ;;  %v4680_v62 = vadd.f32 %v1243_v5, %v4532_v27  ;;  %v1287_v60 = vmul.f32 %v1280_v11, %v1258_v37  ;;  %v1321_v50 = vmul.f32 %v1314_v46, %v1299_v25  ;;  %v4704_v46 = vld [vmem:[#allocation5 + $0x26] ss:$8 sm:$0x3] }
 0x48b   : > { %v1322_v35 = vmul.f32 %v1318_v20, %v1298_v21  ;;  %v1459_v51 = vrot.slane %v4630_v3, %v3979_v49  ;;  %v1502_v27 = vrot.slane %v4667_v52, %v3461_v41  ;;  %v1345_v53 = vsel %vm1344_vm9, %v6187_v56, %v6186_v13  ;;  %v6189_v10 = vld [vmem:[#allocation26_spill] sm:$0xff] }
 0x48c   : > { %v1346_v55 = vsel %vm1344_vm9, %v6186_v13, %v6187_v56  ;;  %v1289_v20 = vadd.f32 %v1287_v60, %v1274_v30  ;;  %v1290_v19 = vadd.f32 %v1288_v4, %v1275_v48  ;;  %vm1485_vm12 = vcmp.lt.s32.totalorder %v3446_v12, 3  ;;  %2699 = vrot.lane.b32.xlu1 %v3766_v24, %s3257_s23  ;;  %s2940_s23 = sshll.u32 %s3307_s19, 9  ;;  %s2819_s19 = scalar_lea.sflag [#allocation4], %s3408_s30 }
 0x48d   : > { %v1304_v18 = vsel %vm1297_vm8, %v1301_v2, %v1303_v32  ;;  %v1305_v36 = vsel %vm1297_vm8, %v1303_v32, %v1301_v2  ;;  %v1374_v43 = vrot.slane %v1356_v59, %v3461_v41  ;;  %v1378_v63 = vrot.slane %v1356_v59, %v3979_v49  ;;  %v1442_v16 = vpop.permute.xlu0 %1441  ;;  %v1350_v57 = vpop.permute.xlu1 %1349  ;;  %v6191_v59 = vld [vmem:[#allocation28_spill] sm:$0xff]  ;;  %s5833_s11 = scalar_lea.hbm %s5885_s4, %s2940_s23 }
 0x48e   : > { %v4714_v1 = vadd.f32 %v1289_v20, %v4566_v8  ;;  %v4717_v44 = vadd.f32 %v1290_v19, %v4569_v40  ;;  %v1334_v61 = vmul.f32 %v1327_v38, %v1305_v36  ;;  %v1335_v11 = vmul.f32 %v1331_v17, %v1304_v18  ;;  %v6188_v40 = vld [vmem:[#allocation31_spill] sm:$0xff]  ;;  %v1450_v17 = vld [vmem:[#allocation5 + $0x85] ss:$8 sm:$0x3] }
 0x48f   : > { %v1368_v7 = vmul.f32 %v1361_v26, %v1346_v55  ;;  %v1369_v2 = vmul.f32 %v1365_v22, %v1345_v53  ;;  %v1506_v58 = vrot.slane %v4667_v52, %v3979_v49  ;;  %v1549_v8 = vrot.slane %v4704_v46, %v3461_v41  ;;  %v4739_v26 = vld [vmem:[#allocation5 + $0x27] ss:$8 sm:$0x3] }
 0x490   : > { %v1392_v30 = vsel %vm1391_vm10, %v6189_v10, %v6188_v40  ;;  %v1393_v39 = vsel %vm1391_vm10, %v6188_v40, %v6189_v10  ;;  %v1336_v22 = vadd.f32 %v1334_v61, %v1321_v50  ;;  %v1337_v48 = vadd.f32 %v1335_v11, %v1322_v35  ;;  %2746 = vrot.lane.b32.xlu1 %v3766_v24, %s3258_s5  ;;  %v6192_v11 = vld [vmem:[#allocation35_spill] sm:$0xff]  ;;  %s6343_s5 = sshll.u32 %s3408_s30, 5 }
 0x491   : > { %vm1532_vm13 = vcmp.lt.s32.totalorder %v3446_v12, 2  ;;  %v1351_v21 = vsel %vm1344_vm9, %v1348_v15, %v1350_v57  ;;  %v1352_v25 = vsel %vm1344_vm9, %v1350_v57, %v1348_v15  ;;  %v1421_v23 = vrot.slane %v1403_v0, %v3461_v41  ;;  %v1489_v13 = vpop.permute.xlu0 %1488  ;;  %v1397_v56 = vpop.permute.xlu1 %1396  ;;  %s230_s6 = scalar_lea.vmem [#allocation7], %s6343_s5 }
 0x492   : > { %v1425_v5 = vrot.slane %v1403_v0, %v3979_v49  ;;  %v4749_v6 = vadd.f32 %v1336_v22, %v4603_v31  ;;  %v4752_v47 = vadd.f32 %v1337_v48, %v4606_v42  ;;  %v1381_v37 = vmul.f32 %v1374_v43, %v1352_v25  ;;  %v6190_v42 = vld [vmem:[#allocation33_spill] sm:$0xff]  ;;  %s2832_s26 = sshll.u32 %s230_s6, 4  ;;  %s5837_s26 = int_to_ptr.vmem [resolvable:$true] %s2832_s26 }
 0x493   : > { %v1382_v38 = vmul.f32 %v1378_v63, %v1351_v21  ;;  %v1415_v60 = vmul.f32 %v1408_v29, %v1393_v39  ;;  %v1416_v15 = vmul.f32 %v1412_v33, %v1392_v30  ;;  %v1553_v4 = vrot.slane %v4704_v46, %v3979_v49  ;;  %v4775_v29 = vld [vmem:[#allocation5 + $0x31] ss:$8 sm:$0x3]  ;;  %v1497_v43 = vld [vmem:[#allocation5 + $0x86] ss:$8 sm:$0x3]  ;;  %p3142_p10 = scmp.lt.s32.totalorder %s5837_s26, %s3140_s7 }
 0x494   : > { %v1596_v31 = vrot.slane %v4739_v26, %v3461_v41  ;;  %v1439_v50 = vsel %vm1438_vm11, %v6191_v59, %v6190_v42  ;;  %v1440_v28 = vsel %vm1438_vm11, %v6190_v42, %v6191_v59  ;;  %vm1579_vm14 = vcmp.lt.s32.totalorder %v3446_v12, 1  ;;  %s3135_s20 = scalar_lea.vmem %s5837_s26, 512 }
 0x495   : > { %v1383_v33 = vadd.f32 %v1381_v37, %v1368_v7  ;;  %v1384_v35 = vadd.f32 %v1382_v38, %v1369_v2  ;;  %v1398_v24 = vsel %vm1391_vm10, %v1395_v54, %v1397_v56  ;;  %v1399_v53 = vsel %vm1391_vm10, %v1397_v56, %v1395_v54  ;;  %v4807_v7 = vld [vmem:[#allocation5 + $0x32] ss:$8 sm:$0x3]  ;;  %v1536_v2 = vpop.permute.xlu0 %1535  ;;  %v1444_v40 = vpop.permute.xlu1 %1443  ;;  %v6194_v38 = vld [vmem:[#allocation37_spill] sm:$0xff]  ;;  %p3136_p3 = scmp.ne.s32.totalorder %s5837_s26, %s3135_s20  ;;  %p3143_p12 = scmp.lt.s32.totalorder %s3141_s28, %s3135_s20 }
 0x496   : > { %v1468_v55 = vrot.slane %v1450_v17, %v3461_v41  ;;  %v1472_v20 = vrot.slane %v1450_v17, %v3979_v49  ;;  %v1428_v18 = vmul.f32 %v1421_v23, %v1399_v53  ;;  %v1429_v36 = vmul.f32 %v1425_v5, %v1398_v24  ;;  %v1544_v23 = vld [vmem:[#allocation5 + $0x87] ss:$8 sm:$0x3]  ;;  %v1591_v53 = vld [vmem:[#allocation5 + $0x90] ss:$8 sm:$0x3] }
 0x497   : > { %v4784_v19 = vadd.f32 %v1383_v33, %v4640_v34  ;;  %v4787_v32 = vadd.f32 %v1384_v35, %v4643_v9  ;;  %v1462_v63 = vmul.f32 %v1455_v45, %v1440_v28  ;;  %v1463_v54 = vmul.f32 %v1459_v51, %v1439_v50  ;;  %v6193_v9 = vld [vmem:[#allocation30_spill] sm:$0xff]  ;;  %p3137_p7 = pnand %p3136_p3, %p6348_p11  ;;  %p3144_p13 = por %p3143_p12, %p3142_p10 }
 0x498   : > { %v1600_v61 = vrot.slane %v4739_v26, %v3979_v49  ;;  %v1677_v34 = vrot.slane %v4775_v29, %v3461_v41  ;;  %v1486_v0 = vsel %vm1485_vm12, %v6193_v9, %v6192_v11  ;;  %v1487_v45 = vsel %vm1485_vm12, %v6192_v11, %v6193_v9 }
 0x499   : > { %v1430_v3 = vadd.f32 %v1428_v18, %v1415_v60  ;;  %v1431_v51 = vadd.f32 %v1429_v36, %v1416_v15  ;;  %vm1660_vm15 = vcmp.lt.s32.totalorder %v3446_v12, 127  ;;  %v1445_v10 = vsel %vm1438_vm11, %v1442_v16, %v1444_v40  ;;  %v1583_v52 = vpop.permute.xlu0 %1582  ;;  %v6196_v18 = vld [vmem:[#allocation39_spill] sm:$0xff]  ;;  %v6197_v36 = vld [vmem:[#allocation34_spill] sm:$0xff]  ;;  %p3138_p9 = pneg %p3137_p7 }
 0x49a   : > { %v1446_v30 = vsel %vm1438_vm11, %v1444_v40, %v1442_v16  ;;  %v1515_v39 = vrot.slane %v1497_v43, %v3461_v41  ;;  %v1519_v22 = vrot.slane %v1497_v43, %v3979_v49  ;;  %v1476_v25 = vmul.f32 %v1472_v20, %v1445_v10 }
 0x49b   : > { %v4817_v48 = vadd.f32 %v1430_v3, %v4677_v14  ;;  %v4820_v57 = vadd.f32 %v1431_v51, %v4680_v62  ;;  %v1475_v21 = vmul.f32 %v1468_v55, %v1446_v30  ;;  %v1509_v5 = vmul.f32 %v1502_v27, %v1487_v45  ;;  %v6195_v62 = vld [vmem:[#allocation32_spill] sm:$0xff]  ;;  %p3145_p0 = pnand %p3144_p13, %p3138_p9 }
 0x49c   : > { %v1510_v16 = vmul.f32 %v1506_v58, %v1486_v0  ;;  %v1681_v37 = vrot.slane %v4775_v29, %v3979_v49  ;;  %v1724_v14 = vrot.slane %v4807_v7, %v3461_v41  ;;  %v1533_v17 = vsel %vm1532_vm13, %v6195_v62, %v6194_v38  ;;  %v1491_v58 = vpop.permute.xlu1 %1490 }
 0x49d   : > { %v1534_v27 = vsel %vm1532_vm13, %v6194_v38, %v6195_v62  ;;  %v1477_v60 = vadd.f32 %v1475_v21, %v1462_v63  ;;  %v1478_v15 = vadd.f32 %v1476_v25, %v1463_v54  ;;  %vm1707_vm0 = vcmp.lt.s32.totalorder %v3446_v12, 126  ;;  %v1664_v46 = vpop.permute.xlu0 %1663 }
 0x49e   : > { %v1492_v42 = vsel %vm1485_vm12, %v1489_v13, %v1491_v58  ;;  %v1493_v59 = vsel %vm1485_vm12, %v1491_v58, %v1489_v13  ;;  %v1562_v50 = vrot.slane %v1544_v23, %v3461_v41  ;;  %v1566_v28 = vrot.slane %v1544_v23, %v3979_v49  ;;  %v6199_v23 = vld [vmem:[#allocation41_spill] sm:$0xff] }
 0x49f   : > { %v4848_v33 = vadd.f32 %v1477_v60, %v4714_v1  ;;  %v1480_v35 = vadd.f32 %v1478_v15, %v4717_v44  ;;  %v1522_v56 = vmul.f32 %v1515_v39, %v1493_v59  ;;  %v1523_v24 = vmul.f32 %v1519_v22, %v1492_v42  ;;  %v4864_v44 = vld [vmem:[#allocation5 + $0x33] ss:$8 sm:$0x3]  ;;  %v1672_v39 = vld [vmem:[#allocation5 + $0x92] ss:$8 sm:$0x3] }
 0x4a0   : > { %v1556_v55 = vmul.f32 %v1549_v8, %v1534_v27  ;;  %v1557_v20 = vmul.f32 %v1553_v4, %v1533_v17  ;;  %v1580_v13 = vsel %vm1579_vm14, %v6197_v36, %v6196_v18  ;;  %v1728_v43 = vrot.slane %v4807_v7, %v3979_v49  ;;  %v1538_v8 = vpop.permute.xlu1 %1537  ;;  %v6198_v4 = vld [vmem:[#allocation86_spill] sm:$0xff] }
 0x4a1   : > { %v1581_v1 = vsel %vm1579_vm14, %v6196_v18, %v6197_v36  ;;  %v1524_v63 = vadd.f32 %v1522_v56, %v1509_v5  ;;  %v1525_v54 = vadd.f32 %v1523_v24, %v1510_v16  ;;  %v4867_v11 = vadd.f32 %v6198_v4, %v1480_v35  ;;  %v6200_v5 = vld [vmem:[#allocation36_spill] sm:$0xff]  ;;  %v6201_v24 = vld [vmem:[#allocation43_spill] sm:$0xff] }
 0x4a2   : > { %vm1754_vm1 = vcmp.lt.s32.totalorder %v3446_v12, 125  ;;  %v1539_v9 = vsel %vm1532_vm13, %v1536_v2, %v1538_v8  ;;  %v1540_v0 = vsel %vm1532_vm13, %v1538_v8, %v1536_v2  ;;  %v1609_v45 = vrot.slane %v1591_v53, %v3461_v41  ;;  %v4893_v16 = vld [vmem:[#allocation5 + $0x34] ss:$8 sm:$0x3] }
 0x4a3   : > { %v1613_v3 = vrot.slane %v1591_v53, %v3979_v49  ;;  %v1526_v51 = vadd.f32 %v1524_v63, %v4749_v6  ;;  %v1527_v40 = vadd.f32 %v1525_v54, %v4752_v47  ;;  %v1569_v10 = vmul.f32 %v1562_v50, %v1540_v0  ;;  %v1719_v50 = vld [vmem:[#allocation5 + $0x93] ss:$8 sm:$0x3]  ;;  %v6202_v53 = vld [vmem:[#allocation38_spill] sm:$0xff] }
 0x4a4   : > { %v1570_v30 = vmul.f32 %v1566_v28, %v1539_v9  ;;  %v1603_v22 = vmul.f32 %v1596_v31, %v1581_v1  ;;  %v1604_v21 = vmul.f32 %v1600_v61, %v1580_v13  ;;  %v1771_v25 = vrot.slane %v4864_v44, %v3461_v41  ;;  %v1711_v61 = vpop.permute.xlu0 %1710  ;;  %v1585_v38 = vpop.permute.xlu1 %1584  ;;  %v1766_v4 = vld [vmem:[#allocation5 + $0x94] ss:$8 sm:$0x3] }
 0x4a5   : > { %v1775_v2 = vrot.slane %v4864_v44, %v3979_v49  ;;  %v1661_v6 = vsel %vm1660_vm15, %v6200_v5, %v6199_v23  ;;  %v1662_v47 = vsel %vm1660_vm15, %v6199_v23, %v6200_v5  ;;  %v1571_v26 = vadd.f32 %v1569_v10, %v1556_v55  ;;  %v4919_v55 = vld [vmem:[#allocation5 + $0x35] ss:$8 sm:$0x3] }
 0x4a6   : > { %v1572_v31 = vadd.f32 %v1570_v30, %v1557_v20  ;;  %vm1801_vm2 = vcmp.lt.s32.totalorder %v3446_v12, 115  ;;  %v1586_v62 = vsel %vm1579_vm14, %v1583_v52, %v1585_v38  ;;  %v1587_v17 = vsel %vm1579_vm14, %v1585_v38, %v1583_v52 }
 0x4a7   : > { %v1690_v27 = vrot.slane %v1672_v39, %v3461_v41  ;;  %v1694_v60 = vrot.slane %v1672_v39, %v3979_v49  ;;  %v1573_v15 = vadd.f32 %v1571_v26, %v4784_v19  ;;  %v1616_v42 = vmul.f32 %v1609_v45, %v1587_v17  ;;  %v6203_v45 = vld [vmem:[#allocation45_spill] sm:$0xff] }
 0x4a8   : > { %v1574_v58 = vadd.f32 %v1572_v31, %v4787_v32  ;;  %v1617_v59 = vmul.f32 %v1613_v3, %v1586_v62  ;;  %v1684_v28 = vmul.f32 %v1677_v34, %v1661_v6  ;;  %v1685_v35 = vmul.f32 %v1681_v37, %v1662_v47  ;;  %v1758_v37 = vpop.permute.xlu0 %1757  ;;  %v1666_v20 = vpop.permute.xlu1 %1665  ;;  %v6204_v3 = vld [vmem:[#allocation40_spill] sm:$0xff]  ;;  %v6205_v62 = vld [vmem:[#allocation47_spill] sm:$0xff] }
 0x4a9   : > { %v1818_v56 = vrot.slane %v4893_v16, %v3461_v41  ;;  %v1822_v52 = vrot.slane %v4893_v16, %v3979_v49  ;;  %v1708_v19 = vsel %vm1707_vm0, %v6202_v53, %v6201_v24  ;;  %v1709_v32 = vsel %vm1707_vm0, %v6201_v24, %v6202_v53  ;;  %v1813_v16 = vld [vmem:[#allocation5 + $0x95] ss:$8 sm:$0x3] }
 0x4aa   : > { %v1618_v29 = vadd.f32 %v1616_v42, %v1603_v22  ;;  %v1619_v34 = vadd.f32 %v1617_v59, %v1604_v21  ;;  %v1667_v18 = vsel %vm1660_vm15, %v1664_v46, %v1666_v20  ;;  %v1668_v36 = vsel %vm1660_vm15, %v1666_v20, %v1664_v46 }
 0x4ab   : > { %v1737_v13 = vrot.slane %v1719_v50, %v3461_v41  ;;  %v1741_v1 = vrot.slane %v1719_v50, %v3979_v49  ;;  %v1697_v54 = vmul.f32 %v1690_v27, %v1667_v18  ;;  %v1698_v8 = vmul.f32 %v1694_v60, %v1668_v36  ;;  %v6207_v18 = vld [vmem:[#allocation49_spill] sm:$0xff]  ;;  %v6208_v36 = vld [vmem:[#allocation44_spill] sm:$0xff] }
 0x4ac   : > { %v1620_v44 = vadd.f32 %v1618_v29, %v4817_v48  ;;  %v1621_v63 = vadd.f32 %v1619_v34, %v4820_v57  ;;  %v1731_v9 = vmul.f32 %v1724_v14, %v1708_v19  ;;  %v1732_v0 = vmul.f32 %v1728_v43, %v1709_v32  ;;  %v1805_v7 = vpop.permute.xlu0 %1804  ;;  %v1713_v14 = vpop.permute.xlu1 %1712  ;;  %v1860_v32 = vld [vmem:[#allocation5 + $0x96] ss:$8 sm:$0x3] }
 0x4ad   : > { %vm1848_vm3 = vcmp.lt.s32.totalorder %v3446_v12, 114  ;;  %v1865_v46 = vrot.slane %v4919_v55, %v3461_v41  ;;  %v1755_v48 = vsel %vm1754_vm1, %v6204_v3, %v6203_v45  ;;  %v1756_v57 = vsel %vm1754_vm1, %v6203_v45, %v6204_v3 }
 0x4ae   : > { %v1699_v10 = vadd.f32 %v1697_v54, %v1684_v28  ;;  %v1700_v30 = vadd.f32 %v1698_v8, %v1685_v35  ;;  %v1714_v43 = vsel %vm1707_vm0, %v1711_v61, %v1713_v14  ;;  %v1715_v39 = vsel %vm1707_vm0, %v1713_v14, %v1711_v61  ;;  %v6206_v61 = vld [vmem:[#allocation42_spill] sm:$0xff] }
 0x4af   : > { %v1784_v22 = vrot.slane %v1766_v4, %v3461_v41  ;;  %v1788_v21 = vrot.slane %v1766_v4, %v3979_v49  ;;  %v1744_v6 = vmul.f32 %v1737_v13, %v1714_v43  ;;  %v1745_v47 = vmul.f32 %v1741_v1, %v1715_v39  ;;  %v6211_v14 = vld [vmem:[#allocation46_spill] sm:$0xff] }
 0x4b0   : > { %v4949_v23 = vadd.f32 %v1699_v10, %v1526_v51  ;;  %v4951_v5 = vadd.f32 %v1700_v30, %v1527_v40  ;;  %v1778_v26 = vmul.f32 %v1771_v25, %v1755_v48  ;;  %v1779_v31 = vmul.f32 %v1775_v2, %v1756_v57  ;;  %v1905_v40 = vld [vmem:[#allocation5 + $0x36] ss:$8 sm:$0x3]  ;;  %v1852_v25 = vpop.permute.xlu0 %1851  ;;  %v1760_v2 = vpop.permute.xlu1 %1759  ;;  %v1907_v48 = vld [vmem:[#allocation5 + $0x97] ss:$8 sm:$0x3] }
 0x4b1   : > { %v1869_v38 = vrot.slane %v4919_v55, %v3979_v49  ;;  %vm1895_vm4 = vcmp.lt.s32.totalorder %v3446_v12, 113  ;;  %v1802_v17 = vsel %vm1801_vm2, %v6206_v61, %v6205_v62  ;;  %v1803_v51 = vsel %vm1801_vm2, %v6205_v62, %v6206_v61  ;;  %v6210_v30 = vld [vmem:[#allocation51_spill] sm:$0xff] }
 0x4b2   : > { %v1746_v27 = vadd.f32 %v1744_v6, %v1731_v9  ;;  %v1747_v60 = vadd.f32 %v1745_v47, %v1732_v0  ;;  %v1761_v42 = vsel %vm1754_vm1, %v1758_v37, %v1760_v2  ;;  %v1762_v59 = vsel %vm1754_vm1, %v1760_v2, %v1758_v37 }
 0x4b3   : > { %v1831_v50 = vrot.slane %v1813_v16, %v3461_v41  ;;  %v1835_v28 = vrot.slane %v1813_v16, %v3979_v49  ;;  %v1791_v53 = vmul.f32 %v1784_v22, %v1761_v42  ;;  %v1792_v19 = vmul.f32 %v1788_v21, %v1762_v59  ;;  %v6214_v59 = vld [vmem:[#allocation48_spill] sm:$0xff] }
 0x4b4   : > { %v4970_v35 = vadd.f32 %v1746_v27, %v1573_v15  ;;  %v4972_v24 = vadd.f32 %v1747_v60, %v1574_v58  ;;  %v1825_v55 = vmul.f32 %v1818_v56, %v1802_v17  ;;  %v1826_v29 = vmul.f32 %v1822_v52, %v1803_v51  ;;  %v1899_v1 = vpop.permute.xlu0 %1898  ;;  %v1807_v54 = vpop.permute.xlu1 %1806  ;;  %v5020_v17 = vld [vmem:[#allocation5 + $0xa0] ss:$8 sm:$0x3] }
 0x4b5   : > { %v1912_v34 = vrot.slane %v1905_v40, %v3461_v41  ;;  %v1916_v20 = vrot.slane %v1905_v40, %v3979_v49  ;;  %v1849_v37 = vsel %vm1848_vm3, %v6208_v36, %v6207_v18  ;;  %v1850_v15 = vsel %vm1848_vm3, %v6207_v18, %v6208_v36  ;;  %v5044_v18 = vld [vmem:[#allocation5 + $0xa1] ss:$8 sm:$0x3] }
 0x4b6   : > { %v1793_v58 = vadd.f32 %v1791_v53, %v1778_v26  ;;  %v1794_v13 = vadd.f32 %v1792_v19, %v1779_v31  ;;  %v1808_v56 = vsel %vm1801_vm2, %v1805_v7, %v1807_v54  ;;  %v1809_v52 = vsel %vm1801_vm2, %v1807_v54, %v1805_v7  ;;  %v5003_v7 = vld [vmem:[#allocation5 + $0x37] ss:$8 sm:$0x3] }
 0x4b7   : > { %v1878_v8 = vrot.slane %v1860_v32, %v3461_v41  ;;  %v1882_v4 = vrot.slane %v1860_v32, %v3979_v49  ;;  %v1838_v45 = vmul.f32 %v1831_v50, %v1808_v56  ;;  %v1839_v3 = vmul.f32 %v1835_v28, %v1809_v52  ;;  %v6215_v50 = vld [vmem:[#allocation53_spill] sm:$0xff] }
 0x4b8   : > { %v4990_v9 = vadd.f32 %v1793_v58, %v1620_v44  ;;  %v4992_v0 = vadd.f32 %v1794_v13, %v1621_v63  ;;  %v1872_v57 = vmul.f32 %v1865_v46, %v1849_v37  ;;  %v1873_v10 = vmul.f32 %v1869_v38, %v1850_v15  ;;  %v6212_v63 = vld [vmem:[#allocation87_spill] sm:$0xff]  ;;  %v5007_v21 = vpop.permute.xlu0 %1945  ;;  %v1854_v6 = vpop.permute.xlu1 %1853  ;;  %v5036_v32 = vld [vmem:[#allocation5 + $0x40] ss:$8 sm:$0x3] }
 0x4b9   : > { %v1896_v43 = vsel %vm1895_vm4, %v6211_v14, %v6210_v30  ;;  %vm1942_vm5 = vcmp.lt.s32.totalorder %v3446_v12, 112  ;;  %v1897_v44 = vsel %vm1895_vm4, %v6210_v30, %v6211_v14  ;;  %v1654_v39 = vadd.f32 %v6212_v63, %v4848_v33  ;;  %v5089_v63 = vld [vmem:[#allocation5 + $0x43] ss:$8 sm:$0x3] }
 0x4ba   : > { %6209 = vst [vmem:[#allocation15_spill] sm:$0xff] %v4990_v9  ;;  %v1840_v22 = vadd.f32 %v1838_v45, %v1825_v55  ;;  %v1841_v46 = vadd.f32 %v1839_v3, %v1826_v29  ;;  %v1855_v47 = vsel %vm1848_vm3, %v1852_v25, %v1854_v6  ;;  %v1856_v16 = vsel %vm1848_vm3, %v1854_v6, %v1852_v25  ;;  %v6219_v45 = vld [vmem:[#allocation55_spill] sm:$0xff]  ;;  %v5097_v6 = vld [vmem:[#allocation5 + $0x45] ss:$8 sm:$0x3] }
 0x4bb   : > { %v1925_v26 = vrot.slane %v1907_v48, %v3461_v41  ;;  %v1929_v31 = vrot.slane %v1907_v48, %v3979_v49  ;;  %v1885_v33 = vmul.f32 %v1878_v8, %v1855_v47  ;;  %v1886_v61 = vmul.f32 %v1882_v4, %v1856_v16  ;;  %v6218_v4 = vld [vmem:[#allocation50_spill] sm:$0xff] }
 0x4bc   : > { %v5015_v38 = vadd.f32 %v1840_v22, %v1654_v39  ;;  %v5018_v62 = vadd.f32 %v1841_v46, %v4867_v11  ;;  %v1963_v51 = vrot.slane %v5003_v7, %v3979_v49  ;;  %v1919_v40 = vmul.f32 %v1912_v34, %v1896_v43  ;;  %v5024_v2 = vpop.permute.xlu0 %1992  ;;  %v1901_v42 = vpop.permute.xlu1 %1900  ;;  %v5071_v48 = vld [vmem:[#allocation5 + $0xa2] ss:$8 sm:$0x3]  ;;  %v5095_v46 = vld [vmem:[#allocation5 + $0x44] ss:$8 sm:$0x3] }
 0x4bd   : > { %v1920_v27 = vmul.f32 %v1916_v20, %v1897_v44  ;;  %v1887_v60 = vadd.f32 %v1885_v33, %v1872_v57  ;;  %v1888_v25 = vadd.f32 %v1886_v61, %v1873_v10  ;;  %v1944_v11 = vsel %vm1942_vm5, %v6215_v50, %v6214_v59  ;;  %v6221_v33 = vld [vmem:[#allocation57_spill] sm:$0xff]  ;;  %v6229_v57 = vld [vmem:[#allocation58_spill] sm:$0xff]  ;;  %v6230_v43 = vld [vmem:[#allocation63_spill] sm:$0xff] }
 0x4be   : > { %6213 = vst [vmem:[#allocation19_spill] sm:$0xff] %v5015_v38  ;;  %v1902_v28 = vsel %vm1895_vm4, %v1899_v1, %v1901_v42  ;;  %v1903_v53 = vsel %vm1895_vm4, %v1901_v42, %v1899_v1  ;;  %v1976_v19 = vrot.slane %v5020_v17, %v3979_v49  ;;  %vm1989_vm7 = vcmp.lt.s32.totalorder %v3446_v12, 111  ;;  %v5057_v1 = vld [vmem:[#allocation5 + $0x41] ss:$8 sm:$0x3] }
 0x4bf   : > { %v5039_v55 = vadd.f32 %v1887_v60, %v4949_v23  ;;  %v5042_v29 = vadd.f32 %v1888_v25, %v4951_v5  ;;  %v1932_v34 = vmul.f32 %v1925_v26, %v1902_v28  ;;  %v1933_v20 = vmul.f32 %v1929_v31, %v1903_v53  ;;  %v6220_v31 = vld [vmem:[#allocation52_spill] sm:$0xff]  ;;  %v5120_v25 = vld [vmem:[#allocation5 + $0x46] ss:$8 sm:$0x3] }
 0x4c0   : > { %v5047_v15 = vpop.permute.xlu0 %2039  ;;  %v5049_v58 = vpop.permute.xlu1 %1947  ;;  %v1967_v13 = vmul.f32 %v1963_v51, %v1944_v11  ;;  %v2010_v23 = vrot.slane %v5036_v32, %v3979_v49  ;;  %v2023_v8 = vrot.slane %v5044_v18, %v3979_v49  ;;  %v1991_v3 = vsel %vm1989_vm7, %v6219_v45, %v6218_v4  ;;  %v5189_v53 = vld [vmem:[#allocation5 + $0x55] ss:$8 sm:$0x3]  ;;  %v5191_v51 = vld [vmem:[#allocation5 + $0x56] ss:$8 sm:$0x3] }
 0x4c1   : > { %6216 = vst [vmem:[#allocation16_spill] sm:$0xff] %v5039_v55  ;;  %v1934_v36 = vadd.f32 %v1932_v34, %v1919_v40  ;;  %v1935_v37 = vadd.f32 %v1933_v20, %v1920_v27  ;;  %v1950_v5 = vsel %vm1942_vm5, %v5049_v58, %v5007_v21  ;;  %vm2036_vm8 = vcmp.lt.s32.totalorder %v3446_v12, 110  ;;  %v5113_v27 = vld [vmem:[#allocation5 + $0xa3] ss:$8 sm:$0x3] }
 0x4c2   : > { %v1980_v52 = vmul.f32 %v1976_v19, %v1950_v5  ;;  %v2057_v44 = vrot.slane %v5057_v1, %v3979_v49  ;;  %vm2083_vm9 = vcmp.lt.s32.totalorder %v3446_v12, 109  ;;  %v2014_v22 = vmul.f32 %v2010_v23, %v1991_v3  ;;  %v5132_v20 = vld [vmem:[#allocation5 + $0x47] ss:$8 sm:$0x3]  ;;  %v6225_v19 = vld [vmem:[#allocation56_spill] sm:$0xff] }
 0x4c3   : > { %v5060_v54 = vadd.f32 %v1934_v36, %v4970_v35  ;;  %v5063_v56 = vadd.f32 %v1935_v37, %v4972_v24  ;;  %v5078_v24 = vld [vmem:[#allocation5 + $0x42] ss:$8 sm:$0x3]  ;;  %v2070_v26 = vrot.slane %v5071_v48, %v3979_v49  ;;  %v2038_v61 = vsel %vm2036_vm8, %v6221_v33, %v6220_v31  ;;  %v5134_v36 = vld [vmem:[#allocation5 + $0x50] ss:$8 sm:$0x3] }
 0x4c4   : > { %v1982_v10 = vadd.f32 %v1980_v52, %v1967_v13  ;;  %v5080_v30 = vpop.permute.xlu0 %2086  ;;  %v5082_v14 = vpop.permute.xlu1 %1994  ;;  %v2104_v40 = vrot.slane %v5078_v24, %v3979_v49  ;;  %vm2130_vm10 = vcmp.lt.s32.totalorder %v3446_v12, 99  ;;  %vm6030_vm11 = vcmp.lt.s32.totalorder %v3446_v12, 98  ;;  %v5140_v23 = vld [vmem:[#allocation5 + $0x51] ss:$8 sm:$0x3]  ;;  %v6223_v3 = vld [vmem:[#allocation54_spill] sm:$0xff] }
 0x4c5   : > { %6217 = vst [vmem:[#allocation21_spill] sm:$0xff] %v5060_v54  ;;  %v1997_v39 = vsel %vm1989_vm7, %v5082_v14, %v5024_v2  ;;  %v2061_v13 = vmul.f32 %v2057_v44, %v2038_v61  ;;  %vm2224_vm12 = vcmp.lt.s32.totalorder %v3446_v12, 97  ;;  %vm2271_vm13 = vcmp.lt.s32.totalorder %v3446_v12, 96  ;;  %v6226_v35 = vld [vmem:[#allocation61_spill] sm:$0xff] }
 0x4c6   : > { %v5100_v47 = vadd.f32 %v1982_v10, %v4992_v0  ;;  %v2027_v16 = vmul.f32 %v2023_v8, %v1997_v39  ;;  %v2117_v8 = vrot.slane %v5113_v27, %v3979_v49  ;;  %v6224_v10 = vld [vmem:[#allocation59_spill] sm:$0xff]  ;;  %vm2318_vm14 = vcmp.lt.s32.totalorder %v3446_v12, 95 }
 0x4c7   : > { %v2085_v39 = vsel %vm2083_vm9, %v6224_v10, %v6223_v3  ;;  %v5180_v0 = vld [vmem:[#allocation5 + $0x54] ss:$8 sm:$0x3]  ;;  %vm2365_vm15 = vcmp.lt.s32.totalorder %v3446_v12, 94  ;;  %vm2412_vm0 = vcmp.lt.s32.totalorder %v3446_v12, 93  ;;  %vm2459_vm1 = vcmp.lt.s32.totalorder %v3446_v12, 83 }
 0x4c8   : > { %v2029_v42 = vadd.f32 %v2027_v16, %v2014_v22  ;;  %v5122_v11 = vpop.permute.xlu0 %2133  ;;  %v5124_v28 = vpop.permute.xlu1 %2041  ;;  %v5172_v16 = vld [vmem:[#allocation5 + $0xa4] ss:$8 sm:$0x3]  ;;  %v5226_v54 = vld [vmem:[#allocation5 + $0x57] ss:$8 sm:$0x3]  ;;  %v6231_v9 = vrot.slane %v5003_v7, %v3461_v41 }
 0x4c9   : > { %6222 = vst [vmem:[#allocation17_spill] sm:$0xff] %v5122_v11  ;;  %v2044_v37 = vsel %vm2036_vm8, %v5124_v28, %v5047_v15  ;;  %vm2506_vm2 = vcmp.lt.s32.totalorder %v3446_v12, 82  ;;  %vm2553_vm3 = vcmp.lt.s32.totalorder %v3446_v12, 81  ;;  %vm2600_vm4 = vcmp.lt.s32.totalorder %v3446_v12, 80 }
 0x4ca   : > { %v5143_v5 = vadd.f32 %v2029_v42, %v5018_v62  ;;  %v2074_v52 = vmul.f32 %v2070_v26, %v2044_v37  ;;  %v5157_v62 = vld [vmem:[#allocation5 + $0x52] ss:$8 sm:$0x3]  ;;  %v5166_v37 = vld [vmem:[#allocation5 + $0x53] ss:$8 sm:$0x3]  ;;  %v2164_v42 = vrot.slane %v5172_v16, %v3979_v49 }
 0x4cc   : > { %v2076_v34 = vadd.f32 %v2074_v52, %v2061_v13  ;;  %v5168_v44 = vpop.permute.xlu0 %2180  ;;  %v5170_v22 = vpop.permute.xlu1 %2088  ;;  %v2108_v52 = vmul.f32 %v2104_v40, %v2085_v39  ;;  %v5216_v39 = vld [vmem:[#allocation5 + $0xa5] ss:$8 sm:$0x3] }
 0x4cd   : > { %v2091_v13 = vsel %vm2083_vm9, %v5170_v22, %v5080_v30  ;;  %v2211_v55 = vrot.slane %v5216_v39, %v3979_v49 }
 0x4ce   : > { %v5194_v26 = vadd.f32 %v2076_v34, %v5042_v29  ;;  %v2121_v61 = vmul.f32 %v2117_v8, %v2091_v13  ;;  %v2132_v29 = vsel %vm2130_vm10, %v6226_v35, %v6225_v19 }
 0x4d0   : > { %v2123_v13 = vadd.f32 %v2121_v61, %v2108_v52  ;;  %v5214_v40 = vpop.permute.xlu0 %2227  ;;  %v5228_v8 = vpop.permute.xlu1 %2135  ;;  %v1943_v61 = vsel %vm1942_vm5, %v6214_v59, %v6215_v50  ;;  %v1990_v52 = vsel %vm1989_vm7, %v6218_v4, %v6219_v45  ;;  %v6228_v59 = vrot.slane %v5089_v63, %v3979_v49 }
 0x4d1   : > { %6227 = vst [vmem:[#allocation23_spill] sm:$0xff] %v5214_v40  ;;  %v2138_v60 = vsel %vm2130_vm10, %v5228_v8, %v5122_v11  ;;  %v2179_v4 = vsel %vm6030_vm11, %v6230_v43, %v6229_v57  ;;  %v5289_v11 = vmul.f32 %v6231_v9, %v1943_v61  ;;  %v6235_v9 = vld [vmem:[#allocation60_spill] sm:$0xff] }
 0x4d2   : > { %v5241_v34 = vadd.f32 %v2123_v13, %v5063_v56  ;;  %v2155_v50 = vmul.f32 %v6228_v59, %v2132_v29  ;;  %v2168_v45 = vmul.f32 %v2164_v42, %v2138_v60  ;;  %v2037_v56 = vsel %vm2036_vm8, %v6220_v31, %v6221_v33  ;;  %v5264_v59 = vld [vmem:[#allocation5 + $0x60] ss:$8 sm:$0x3]  ;;  %v5270_v42 = vld [vmem:[#allocation5 + $0xa6] ss:$8 sm:$0x3] }
 0x4d3   : > { %v2084_v31 = vsel %vm2083_vm9, %v6223_v3, %v6224_v10  ;;  %v2131_v33 = vsel %vm2130_vm10, %v6225_v19, %v6226_v35  ;;  %v2178_v29 = vsel %vm6030_vm11, %v6229_v57, %v6230_v43  ;;  %v6232_v3 = vrot.slane %v5036_v32, %v3461_v41  ;;  %v6236_v57 = vld [vmem:[#allocation65_spill] sm:$0xff] }
 0x4d4   : > { %v5268_v60 = vpop.permute.xlu0 %2274  ;;  %v2170_v38 = vadd.f32 %v2168_v45, %v2155_v50  ;;  %v5284_v13 = vpop.permute.xlu1 %2182  ;;  %v6234_v35 = vrot.slane %v5095_v46, %v3979_v49  ;;  %v2226_v32 = vsel %vm2224_vm12, %v6236_v57, %v6235_v9  ;;  %v6237_v50 = vrot.slane %v5057_v1, %v3461_v41  ;;  %v5337_v1 = vld [vmem:[#allocation5 + $0xa7] ss:$8 sm:$0x3] }
 0x4d5   : > { %v5294_v10 = vmul.f32 %v6232_v3, %v1990_v52  ;;  %v2185_v7 = vsel %vm6030_vm11, %v5284_v13, %v5168_v44  ;;  %v2258_v52 = vrot.slane %v5270_v42, %v3979_v49  ;;  %v6238_v45 = vrot.slane %v5078_v24, %v3461_v41 }
 0x4d6   : > { %v2202_v19 = vmul.f32 %v6234_v35, %v2179_v4  ;;  %v5311_v43 = vadd.f32 %v2170_v38, %v5100_v47  ;;  %v2215_v61 = vmul.f32 %v2211_v55, %v2185_v7  ;;  %v5318_v4 = vmul.f32 %v6237_v50, %v2037_v56  ;;  %v6245_v56 = vld [vmem:[#allocation67_spill] sm:$0xff] }
 0x4d7   : > { %6233 = vst [vmem:[#allocation18_spill] sm:$0xff] %v5294_v10  ;;  %v5323_v3 = vmul.f32 %v6238_v45, %v2084_v31  ;;  %v6240_v35 = vrot.slane %v5089_v63, %v3461_v41  ;;  %v6242_v38 = vrot.slane %v5095_v46, %v3461_v41  ;;  %v2225_v24 = vsel %vm2224_vm12, %v6235_v9, %v6236_v57  ;;  %v6246_v31 = vld [vmem:[#allocation62_spill] sm:$0xff]  ;;  %v6249_v9 = vld [vmem:[#allocation69_spill] sm:$0xff]  ;;  %v6250_v57 = vld [vmem:[#allocation64_spill] sm:$0xff] }
 0x4d8   : > { %v5335_v47 = vpop.permute.xlu0 %2321  ;;  %v2272_v63 = vsel %vm2271_vm13, %v6246_v31, %v6245_v56  ;;  %v2273_v46 = vsel %vm2271_vm13, %v6245_v56, %v6246_v31  ;;  %v6248_v7 = vrot.slane %v5097_v6, %v3979_v49  ;;  %v2319_v45 = vsel %vm2318_vm14, %v6250_v57, %v6249_v9 }
 0x4d9   : > { %6239 = vst [vmem:[#allocation25_spill] sm:$0xff] %v5323_v3  ;;  %v5328_v10 = vmul.f32 %v6240_v35, %v2131_v33  ;;  %v5333_v55 = vmul.f32 %v6242_v38, %v2178_v29  ;;  %6244 = vst [vmem:[#allocation22_spill] sm:$0xff] %v5335_v47  ;;  %v2217_v29 = vadd.f32 %v2215_v61, %v2202_v19  ;;  %v5352_v33 = vpop.permute.xlu1 %2229  ;;  %vm2694_vm11 = vcmp.lt.s32.totalorder %v3446_v12, 78  ;;  %v6251_v61 = vld [vmem:[#allocation71_spill] sm:$0xff]  ;;  %v6252_v38 = vld [vmem:[#allocation66_spill] sm:$0xff] }
 0x4da   : > { %6247 = vst [vmem:[#allocation29_spill] sm:$0xff] %v5352_v33  ;;  %v2249_v50 = vmul.f32 %v6248_v7, %v2226_v32  ;;  %v2320_v35 = vsel %vm2318_vm14, %v6249_v9, %v6250_v57  ;;  %v2232_v19 = vsel %vm2224_vm12, %v5352_v33, %v5214_v40  ;;  %v2366_v32 = vsel %vm2365_vm15, %v6252_v38, %v6251_v61 }
 0x4db   : > { %6241 = vst [vmem:[#allocation20_spill] sm:$0xff] %v5328_v10  ;;  %6243 = vst [vmem:[#allocation27_spill] sm:$0xff] %v5333_v55  ;;  %v5375_v56 = vadd.f32 %v2217_v29, %v5143_v5  ;;  %v2262_v31 = vmul.f32 %v2258_v52, %v2232_v19  ;;  %v2305_v7 = vrot.slane %v5337_v1, %v3979_v49  ;;  %v5398_v29 = vld [vmem:[#allocation5 + $0xb0] ss:$8 sm:$0x3] }
 0x4dc   : > { %v6253_v9 = vrot.slane %v5097_v6, %v3461_v41  ;;  %v6255_v55 = vrot.slane %v5120_v25, %v3461_v41  ;;  %v6257_v33 = vrot.slane %v5120_v25, %v3979_v49  ;;  %v2367_v5 = vsel %vm2365_vm15, %v6251_v61, %v6252_v38  ;;  %v5396_v52 = vpop.permute.xlu0 %2368  ;;  %v6258_v6 = vld [vmem:[#allocation73_spill] sm:$0xff] }
 0x4dd   : > { %v5412_v61 = vpop.permute.xlu1 %2276  ;;  %v6262_v38 = vrot.slane %v5132_v20, %v3461_v41  ;;  %v6294_v3 = vrot.slane %v5189_v53, %v3979_v49 }
 0x4de   : > { %v5382_v57 = vmul.f32 %v6253_v9, %v2225_v24  ;;  %v5387_v40 = vmul.f32 %v6255_v55, %v2272_v63  ;;  %v2296_v10 = vmul.f32 %v6257_v33, %v2273_v46  ;;  %v6259_v24 = vld [vmem:[#allocation68_spill] sm:$0xff]  ;;  %v6260_v55 = vld [vmem:[#allocation75_spill] sm:$0xff]  ;;  %v6261_v63 = vld [vmem:[#allocation70_spill] sm:$0xff]  ;;  %v2264_v33 = vadd.f32 %v2262_v31, %v2249_v50 }
 0x4df   : > { %v2413_v19 = vsel %vm2412_vm0, %v6259_v24, %v6258_v6  ;;  %v2414_v25 = vsel %vm2412_vm0, %v6258_v6, %v6259_v24  ;;  %v2460_v46 = vsel %vm2459_vm1, %v6261_v63, %v6260_v55  ;;  %v5417_v9 = vmul.f32 %v6262_v38, %v2319_v45 }
 0x4e0   : > { %6254 = vst [vmem:[#allocation24_spill] sm:$0xff] %v5382_v57  ;;  %6256 = vst [vmem:[#allocation31_spill] sm:$0xff] %v5387_v40  ;;  %v6264_v57 = vrot.slane %v5132_v20, %v3979_v49  ;;  %v6265_v6 = vrot.slane %v5134_v36, %v3461_v41  ;;  %v2279_v50 = vsel %vm2271_vm13, %v5412_v61, %v5268_v60 }
 0x4e1   : > { %6263 = vst [vmem:[#allocation26_spill] sm:$0xff] %v5417_v9  ;;  %v2461_v45 = vsel %vm2459_vm1, %v6260_v55, %v6261_v63  ;;  %v5436_v31 = vadd.f32 %v2264_v33, %v5194_v26  ;;  %v2309_v20 = vmul.f32 %v2305_v7, %v2279_v50  ;;  %v6268_v38 = vrot.slane %v5140_v23, %v3461_v41  ;;  %v5458_v63 = vpop.permute.xlu0 %2415  ;;  %v5460_v33 = vld [vmem:[#allocation5 + $0xb1] ss:$8 sm:$0x3] }
 0x4e2   : > { %v2343_v40 = vmul.f32 %v6264_v57, %v2320_v35  ;;  %v5425_v24 = vmul.f32 %v6265_v6, %v2366_v32  ;;  %v2352_v35 = vrot.slane %v5398_v29, %v3979_v49  ;;  %v6267_v32 = vrot.slane %v5134_v36, %v3979_v49  ;;  %v6273_v36 = vld [vmem:[#allocation77_spill] sm:$0xff] }
 0x4e3   : > { %v5446_v6 = vmul.f32 %v6268_v38, %v2413_v19  ;;  %v6271_v26 = vrot.slane %v5157_v62, %v3461_v41  ;;  %v2311_v50 = vadd.f32 %v2309_v20, %v2296_v10  ;;  %v6278_v38 = vrot.slane %v5157_v62, %v3979_v49 }
 0x4e4   : > { %6266 = vst [vmem:[#allocation33_spill] sm:$0xff] %v5425_v24  ;;  %v2390_v57 = vmul.f32 %v6267_v32, %v2367_v5  ;;  %v6270_v24 = vrot.slane %v5140_v23, %v3979_v49  ;;  %v6274_v5 = vld [vmem:[#allocation72_spill] sm:$0xff]  ;;  %v5474_v32 = vpop.permute.xlu1 %2323  ;;  %v6283_v9 = vrot.slane %v5166_v37, %v3979_v49 }
 0x4e5   : > { %6269 = vst [vmem:[#allocation28_spill] sm:$0xff] %v5446_v6  ;;  %v5456_v7 = vmul.f32 %v6271_v26, %v2460_v46  ;;  %v2507_v19 = vsel %vm2506_vm2, %v6274_v5, %v6273_v36  ;;  %v2508_v23 = vsel %vm2506_vm2, %v6273_v36, %v6274_v5  ;;  %6277 = vst [vmem:[#allocation30_spill] sm:$0xff] %v5474_v32  ;;  %v6280_v36 = vld [vmem:[#allocation76_spill] sm:$0xff] }
 0x4e6   : > { %v5451_v55 = vmul.f32 %v6270_v24, %v2414_v25  ;;  %v6275_v25 = vld [vmem:[#allocation79_spill] sm:$0xff]  ;;  %v6276_v24 = vld [vmem:[#allocation74_spill] sm:$0xff]  ;;  %v5479_v26 = vmul.f32 %v6278_v38, %v2461_v45  ;;  %v2326_v10 = vsel %vm2318_vm14, %v5474_v32, %v5335_v47  ;;  %v5498_v45 = vadd.f32 %v2311_v50, %v5241_v34 }
 0x4e7   : > { %6272 = vst [vmem:[#allocation35_spill] sm:$0xff] %v5456_v7  ;;  %v2554_v46 = vsel %vm2553_vm3, %v6276_v24, %v6275_v25  ;;  %v2555_v6 = vsel %vm2553_vm3, %v6275_v25, %v6276_v24  ;;  %v6279_v7 = vld [vmem:[#allocation81_spill] sm:$0xff]  ;;  %v2356_v20 = vmul.f32 %v2352_v35, %v2326_v10  ;;  %v2399_v25 = vrot.slane %v5460_v33, %v3979_v49  ;;  %v6287_v34 = vld [vmem:[#allocation82_spill] sm:$0xff]  ;;  %v5521_v10 = vpop.permute.xlu0 %2462  ;;  %v5523_v32 = vld [vmem:[#allocation5 + $0xb2] ss:$8 sm:$0x3] }
 0x4e8   : > { %v2601_v5 = vsel %vm2600_vm4, %v6280_v36, %v6279_v7  ;;  %v2602_v62 = vsel %vm2600_vm4, %v6279_v7, %v6280_v36  ;;  %v6281_v24 = vrot.slane %v5166_v37, %v3461_v41  ;;  %v5510_v47 = vmul.f32 %v6283_v9, %v2508_v23  ;;  %v6288_v35 = vld [vmem:[#allocation78_spill] sm:$0xff]  ;;  %v6289_v9 = vld [vmem:[#allocation83_spill] sm:$0xff] }
 0x4e9   : > { %v6285_v7 = vrot.slane %v5180_v0, %v3461_v41  ;;  %v2648_v50 = vsel %vm2647_vm6, %v6288_v35, %v6287_v34  ;;  %v2649_v37 = vsel %vm2647_vm6, %v6287_v34, %v6288_v35  ;;  %v6292_v34 = vrot.slane %v5189_v53, %v3461_v41 }
 0x4ea   : > { %v5505_v38 = vmul.f32 %v6281_v24, %v2507_v19  ;;  %6284 = vst [vmem:[#allocation32_spill] sm:$0xff] %v5510_v47  ;;  %v6290_v19 = vld [vmem:[#allocation80_spill] sm:$0xff]  ;;  %v2358_v24 = vadd.f32 %v2356_v20, %v2343_v40  ;;  %v5552_v47 = vmul.f32 %v6294_v3, %v2602_v62  ;;  %v6296_v53 = vrot.slane %v5191_v51, %v3979_v49 }
 0x4eb   : > { %v5515_v36 = vmul.f32 %v6285_v7, %v2554_v46  ;;  %v2695_v23 = vsel %vm2694_vm11, %v6290_v19, %v6289_v9  ;;  %v2696_v46 = vsel %vm2694_vm11, %v6289_v9, %v6290_v19  ;;  %v5537_v7 = vpop.permute.xlu1 %2370  ;;  %v5547_v35 = vmul.f32 %v6292_v34, %v2601_v5 }
 0x4ec   : > { %6282 = vst [vmem:[#allocation37_spill] sm:$0xff] %v5505_v38  ;;  %v2373_v40 = vsel %vm2365_vm15, %v5537_v7, %v5396_v52  ;;  %v5564_v20 = vadd.f32 %v2358_v24, %v5311_v43  ;;  %v5571_v3 = vmul.f32 %v6296_v53, %v2649_v37  ;;  %v6297_v62 = vrot.slane %v5226_v54, %v3461_v41  ;;  %v5587_v24 = vld [vmem:[#allocation5 + $0xb3] ss:$8 sm:$0x3] }
 0x4ed   : > { %6286 = vst [vmem:[#allocation39_spill] sm:$0xff] %v5515_v36  ;;  %v6291_v36 = vrot.slane %v5180_v0, %v3979_v49  ;;  %6293 = vst [vmem:[#allocation34_spill] sm:$0xff] %v5547_v35  ;;  %v6295_v0 = vrot.slane %v5191_v51, %v3461_v41  ;;  %v2403_v5 = vmul.f32 %v2399_v25, %v2373_v40  ;;  %v5585_v25 = vpop.permute.xlu0 %2509  ;;  %v6300_v51 = vld [vmem:[#allocation84_spill] sm:$0xff] }
 0x4ee   : > { %v5576_v9 = vmul.f32 %v6297_v62, %v2695_v23  ;;  %v1972_v43 = vrot.slane %v5020_v17, %v3461_v41  ;;  %v6301_v37 = vrot.slane %v5264_v59, %v3461_v41  ;;  %v2019_v23 = vrot.slane %v5044_v18, %v3461_v41  ;;  %v5618_v53 = vld [vmem:[#allocation5 + $0xb4] ss:$8 sm:$0x3] }
 0x4ef   : > { %v5542_v38 = vmul.f32 %v6291_v36, %v2555_v6  ;;  %v5561_v6 = vmul.f32 %v6295_v0, %v2648_v50  ;;  %v2446_v36 = vrot.slane %v5523_v32, %v3979_v49  ;;  %v6298_v50 = vrot.slane %v5226_v54, %v3979_v49  ;;  %v5599_v40 = vpop.permute.xlu1 %2417 }
 0x4f0   : > { %v5593_v34 = vmul.f32 %v6301_v37, %v6300_v51  ;;  %v2066_v54 = vrot.slane %v5071_v48, %v3461_v41  ;;  %v2113_v17 = vrot.slane %v5113_v27, %v3461_v41  ;;  %v2160_v0 = vrot.slane %v5172_v16, %v3461_v41 }
 0x4f1   : > { %v5581_v19 = vmul.f32 %v6298_v50, %v2696_v46  ;;  %v2405_v46 = vadd.f32 %v2403_v5, %v2390_v57  ;;  %v2207_v59 = vrot.slane %v5216_v39, %v3461_v41  ;;  %v2420_v18 = vsel %vm2412_vm0, %v5599_v40, %v5458_v63  ;;  %v5665_v50 = vld [vmem:[#allocation5 + $0xb7] ss:$8 sm:$0x3]  ;;  %v6303_v39 = vld [vmem:[#allocation17_spill] sm:$0xff] }
 0x4f2   : > { %6302 = vst [vmem:[#allocation41_spill] sm:$0xff] %v5593_v34  ;;  %v2450_v5 = vmul.f32 %v2446_v36, %v2420_v18  ;;  %v2493_v27 = vrot.slane %v5587_v24, %v3979_v49  ;;  %v2301_v16 = vrot.slane %v5337_v1, %v3461_v41  ;;  %v1949_v36 = vsel %vm1942_vm5, %v5007_v21, %v5049_v58 }
 0x4f3   : > { %6299 = vst [vmem:[#allocation86_spill] sm:$0xff] %v5581_v19  ;;  %v5614_v57 = vadd.f32 %v2405_v46, %v5375_v56  ;;  %v5628_v56 = vld [vmem:[#allocation5 + $0xb5] ss:$8 sm:$0x3]  ;;  %v1996_v1 = vsel %vm1989_vm7, %v5024_v2, %v5082_v14  ;;  %v2043_v51 = vsel %vm2036_vm8, %v5047_v15, %v5124_v28  ;;  %v5643_v46 = vpop.permute.xlu0 %2556  ;;  %v2465_v18 = vpop.permute.xlu1 %2464  ;;  %v2540_v58 = vrot.slane %v5618_v53, %v3979_v49  ;;  %v6314_v19 = vld [vmem:[#allocation29_spill] sm:$0xff] }
 0x4f4   : > { %v2452_v37 = vadd.f32 %v2450_v5, %v5451_v55  ;;  %v2467_v21 = vsel %vm2459_vm1, %v2465_v18, %v5521_v10  ;;  %v5654_v14 = vld [vmem:[#allocation5 + $0xb6] ss:$8 sm:$0x3]  ;;  %v2090_v15 = vsel %vm2083_vm9, %v5080_v30, %v5170_v22  ;;  %v1979_v2 = vmul.f32 %v1972_v43, %v1949_v36  ;;  %v5678_v43 = vld [vmem:[#allocation5 + $0xc0] ss:$8 sm:$0x3] }
 0x4f5   : > { %v2497_v55 = vmul.f32 %v2493_v27, %v2467_v21  ;;  %v2026_v62 = vmul.f32 %v2019_v23, %v1996_v1  ;;  %v2073_v48 = vmul.f32 %v2066_v54, %v2043_v51  ;;  %v2137_v34 = vsel %vm2130_vm10, %v6303_v39, %v5228_v8  ;;  %v5687_v39 = vld [vmem:[#allocation5 + $0xc1] ss:$8 sm:$0x3] }
 0x4f6   : > { %v5661_v28 = vadd.f32 %v2452_v37, %v5436_v31  ;;  %v2587_v22 = vrot.slane %v5628_v56, %v3979_v49  ;;  %v2634_v27 = vrot.slane %v5654_v14, %v3979_v49  ;;  %v2120_v23 = vmul.f32 %v2113_v17, %v2090_v15  ;;  %v6305_v15 = vld [vmem:[#allocation18_spill] sm:$0xff] }
 0x4f7   : > { %v2499_v35 = vadd.f32 %v2497_v55, %v5479_v26  ;;  %v2512_v30 = vpop.permute.xlu1 %2511  ;;  %v2677_v8 = vrot.slane %v5665_v50, %v3461_v41  ;;  %v2681_v26 = vrot.slane %v5665_v50, %v3979_v49  ;;  %v2167_v36 = vmul.f32 %v2160_v0, %v2137_v34  ;;  %v2604_v51 = vpop.permute.xlu0 %2603  ;;  %v6307_v0 = vld [vmem:[#allocation25_spill] sm:$0xff] }
 0x4f8   : > { %v2514_v54 = vsel %vm2506_vm2, %v2512_v30, %v5585_v25  ;;  %vm6304_vm5 = vcmp.lt.s32.totalorder %v3446_v12, 98  ;;  %v1981_v21 = vadd.f32 %v1979_v2, %v5289_v11  ;;  %v2028_v55 = vadd.f32 %v2026_v62, %v6305_v15  ;;  %v6313_v11 = vld [vmem:[#allocation16_spill] sm:$0xff]  ;;  %v6315_v2 = vld [vmem:[#allocation23_spill] sm:$0xff] }
 0x4f9   : > { %v2184_v1 = vsel %vm6304_vm5, %v5168_v44, %v5284_v13  ;;  %v5694_v17 = vadd.f32 %v2499_v35, %v5498_v45  ;;  %v2544_v37 = vmul.f32 %v2540_v58, %v2514_v54  ;;  %v2075_v31 = vadd.f32 %v2073_v48, %v5318_v4  ;;  %v6306_v44 = vld [vmem:[#allocation32_spill] sm:$0xff]  ;;  %v6309_v58 = vld [vmem:[#allocation30_spill] sm:$0xff] }
 0x4fa   : > { %v2278_v34 = vsel %vm2271_vm13, %v5268_v60, %v5412_v61  ;;  %v2728_v35 = vrot.slane %v5678_v43, %v3979_v49  ;;  %v2122_v62 = vadd.f32 %v2120_v23, %v6307_v0  ;;  %v2214_v4 = vmul.f32 %v2207_v59, %v2184_v1  ;;  %v6308_v60 = vld [vmem:[#allocation20_spill] sm:$0xff]  ;;  %v6310_v54 = vld [vmem:[#allocation22_spill] sm:$0xff]  ;;  %v6311_v23 = vld [vmem:[#allocation15_spill] sm:$0xff] }
 0x4fb   : > { %v2546_v13 = vadd.f32 %v2544_v37, %v6306_v44  ;;  %v2559_v45 = vpop.permute.xlu1 %2558  ;;  %v2169_v61 = vadd.f32 %v2167_v36, %v6308_v60  ;;  %v2325_v37 = vsel %vm2318_vm14, %v6310_v54, %v6309_v58  ;;  %v1983_v59 = vadd.f32 %v1981_v21, %v6311_v23  ;;  %v6312_v1 = vld [vmem:[#allocation19_spill] sm:$0xff] }
 0x4fc   : > { %v2561_v48 = vsel %vm2553_vm3, %v2559_v45, %v5643_v46  ;;  %v2030_v0 = vadd.f32 %v2028_v55, %v6312_v1  ;;  %v2077_v50 = vadd.f32 %v2075_v31, %v6313_v11  ;;  %v2308_v5 = vmul.f32 %v2301_v16, %v2278_v34  ;;  %v6316_v31 = vld [vmem:[#allocation27_spill] sm:$0xff] }
 0x4fd   : > { %v5722_v15 = vadd.f32 %v2546_v13, %v5564_v20  ;;  %v2591_v44 = vmul.f32 %v2587_v22, %v2561_v48  ;;  %v2231_v36 = vsel %vm2224_vm12, %v6315_v2, %v6314_v19  ;;  %v2372_v60 = vsel %vm2365_vm15, %v5396_v52, %v5537_v7  ;;  %v2651_v22 = vpop.permute.xlu0 %2650  ;;  %v6318_v7 = vld [vmem:[#allocation21_spill] sm:$0xff] }
 0x4fe   : > { %v2466_v20 = vsel %vm2459_vm1, %v5521_v10, %v2465_v18  ;;  %v2216_v16 = vadd.f32 %v2214_v4, %v6316_v31  ;;  %v6317_v34 = vrot.slane %v5398_v29, %v3461_v41  ;;  %v2513_v19 = vsel %vm2506_vm2, %v5585_v25, %v2512_v30  ;;  %v6320_v29 = vld [vmem:[#allocation31_spill] sm:$0xff]  ;;  %v6329_v31 = vld [vmem:[#allocation33_spill] sm:$0xff] }
 0x4ff   : > { %v2593_v21 = vadd.f32 %v2591_v44, %v5542_v38  ;;  %v2606_v55 = vpop.permute.xlu1 %2605  ;;  %v2124_v11 = vadd.f32 %v2122_v62, %v6318_v7  ;;  %v2171_v10 = vadd.f32 %v2169_v61, %v1983_v59  ;;  %v6319_v4 = vrot.slane %v5270_v42, %v3461_v41 }
 0x500   : > { %v2355_v13 = vmul.f32 %v6317_v34, %v2325_v37  ;;  %v2608_v52 = vsel %vm2600_vm4, %v2606_v55, %v2604_v51  ;;  %v2310_v2 = vadd.f32 %v2308_v5, %v6320_v29  ;;  %v6321_v58 = vrot.slane %v5460_v33, %v3461_v41  ;;  %v6324_v37 = vld [vmem:[#allocation26_spill] sm:$0xff]  ;;  %v6334_v29 = vld [vmem:[#allocation39_spill] sm:$0xff] }
 0x501   : > { %v5750_v18 = vadd.f32 %v2593_v21, %v5614_v57  ;;  %v2638_v38 = vmul.f32 %v2634_v27, %v2608_v52  ;;  %v2261_v48 = vmul.f32 %v6319_v4, %v2231_v36  ;;  %v6322_v30 = vrot.slane %v5587_v24, %v3461_v41  ;;  %v6327_v36 = vld [vmem:[#allocation35_spill] sm:$0xff]  ;;  %v6333_v4 = vld [vmem:[#allocation28_spill] sm:$0xff] }
 0x502   : > { %v2402_v25 = vmul.f32 %v6321_v58, %v2372_v60  ;;  %v2419_v57 = vsel %vm2412_vm0, %v5458_v63, %v5599_v40  ;;  %v6323_v27 = vrot.slane %v5618_v53, %v3461_v41  ;;  %v2560_v5 = vsel %vm2553_vm3, %v5643_v46, %v2559_v45  ;;  %v2698_v40 = vpop.permute.xlu0 %2697  ;;  %v6325_v45 = vld [vmem:[#allocation24_spill] sm:$0xff] }
 0x503   : > { %v2496_v54 = vmul.f32 %v6322_v30, %v2466_v20  ;;  %v2640_v33 = vadd.f32 %v2638_v38, %v5552_v47  ;;  %v2653_v62 = vpop.permute.xlu1 %2652  ;;  %v2218_v61 = vadd.f32 %v2216_v16, %v2030_v0  ;;  %v2357_v24 = vadd.f32 %v2355_v13, %v6324_v37 }
 0x504   : > { %v2543_v42 = vmul.f32 %v6323_v27, %v2513_v19  ;;  %v2654_v44 = vsel %vm2647_vm6, %v2651_v22, %v2653_v62  ;;  %v2655_v63 = vsel %vm2647_vm6, %v2653_v62, %v2651_v22  ;;  %v2607_v53 = vsel %vm2600_vm4, %v2604_v51, %v2606_v55  ;;  %v6330_v51 = vld [vmem:[#allocation37_spill] sm:$0xff] }
 0x505   : > { %v2642_v23 = vadd.f32 %v2640_v33, %v5661_v28  ;;  %v2684_v59 = vmul.f32 %v2677_v8, %v2654_v44  ;;  %v2685_v46 = vmul.f32 %v2681_v26, %v2655_v63  ;;  %v2263_v47 = vadd.f32 %v2261_v48, %v6325_v45 }
 0x506   : > { %v6326_v1 = vrot.slane %v5523_v32, %v3461_v41  ;;  %v2498_v60 = vadd.f32 %v2496_v54, %v6327_v36  ;;  %v6328_v20 = vrot.slane %v5628_v56, %v3461_v41  ;;  %v2312_v21 = vadd.f32 %v2310_v2, %v2124_v11  ;;  %v6335_v54 = vld [vmem:[#allocation86_spill] sm:$0xff] }
 0x507   : > { %v2404_v16 = vadd.f32 %v2402_v25, %v6329_v31  ;;  %v2545_v55 = vadd.f32 %v2543_v42, %v6330_v51  ;;  %v2687_v28 = vadd.f32 %v2685_v46, %v5571_v3  ;;  %v2700_v8 = vpop.permute.xlu1 %2699  ;;  %v6331_v26 = vrot.slane %v5654_v14, %v3461_v41  ;;  %v2745_v25 = vpop.permute.xlu0 %2744  ;;  %v6344_v51 = vld [vmem:[#allocation13_spill] sm:$0xff] }
 0x508   : > { %v2449_v0 = vmul.f32 %v6326_v1, %v2419_v57  ;;  %v2590_v22 = vmul.f32 %v6328_v20, %v2560_v5  ;;  %v2686_v32 = vadd.f32 %v2684_v59, %v5561_v6  ;;  %v2701_v13 = vsel %vm2694_vm11, %v2698_v40, %v2700_v8  ;;  %v6342_v59 = vld [vmem:[#allocation85_spill] sm:$0xff] }
 0x509   : > { %v2637_v34 = vmul.f32 %v6331_v26, %v2607_v53  ;;  %v2702_v56 = vsel %vm2694_vm11, %v2700_v8, %v2698_v40  ;;  %v2359_v19 = vadd.f32 %v2357_v24, %v2171_v10  ;;  %v2689_v52 = vadd.f32 %v2687_v28, %v5694_v17  ;;  %v6336_v17 = vld [vmem:[#allocation34_spill] sm:$0xff]  ;;  %v6341_v40 = vld [vmem:[#allocation41_spill] sm:$0xff]  ;;  %v6345_v28 = vld [vmem:[#allocation11_spill] sm:$0xff] }
 0x50a   : > { %v6332_v7 = vrot.slane %v5678_v43, %v3461_v41  ;;  %v2732_v11 = vmul.f32 %v2728_v35, %v2702_v56  ;;  %v2265_v38 = vadd.f32 %v2263_v47, %v2077_v50  ;;  %v2451_v14 = vadd.f32 %v2449_v0, %v6333_v4  ;;  %v6346_v26 = vld [vmem:[#allocation14_spill] sm:$0xff] }
 0x50b   : > { %v2500_v48 = vadd.f32 %v2498_v60, %v2312_v21  ;;  %v2592_v6 = vadd.f32 %v2590_v22, %v6334_v29  ;;  %v2406_v2 = vadd.f32 %v2404_v16, %v2218_v61  ;;  %v2547_v58 = vadd.f32 %v2545_v55, %v2359_v19  ;;  %v2747_v57 = vpop.permute.xlu1 %2746 }
 0x50c   : > { %v2731_v3 = vmul.f32 %v6332_v7, %v2701_v13  ;;  %v2734_v10 = vadd.f32 %v2732_v11, %v6335_v54  ;;  %v2639_v27 = vadd.f32 %v2637_v34, %v6336_v17  ;;  %vm6337_vm6 = vcmp.lt.s32.totalorder %v3446_v12, 77 }
 0x50d   : > { %v2688_v42 = vadd.f32 %v2686_v32, %v2500_v48  ;;  %v2748_v43 = vsel %vm6337_vm6, %v2745_v25, %v2747_v57  ;;  %vm6338_vm7 = vmmov %vm6337_vm6  ;;  %v6339_v33 = vrot.slane %v5687_v39, %v3461_v41  ;;  %v2453_v37 = vadd.f32 %v2451_v14, %v2265_v38  ;;  %v6347_v32 = vld [vmem:[#allocation12_spill] sm:$0xff] }
 0x50e   : > { %v2733_v30 = vadd.f32 %v2731_v3, %v5576_v9  ;;  %v2749_v50 = vsel %vm6338_vm7, %v2747_v57, %v2745_v25  ;;  %v2736_v5 = vadd.f32 %v2734_v10, %v5722_v15  ;;  %v6340_v9 = vrot.slane %v5687_v39, %v3979_v49 }
 0x50f   : > { %v2778_v62 = vmul.f32 %v6339_v33, %v2748_v43  ;;  %v2594_v24 = vadd.f32 %v2592_v6, %v2406_v2  ;;  %v2641_v46 = vadd.f32 %v2639_v27, %v2453_v37 }
 0x510   : > { %v2735_v35 = vadd.f32 %v2733_v30, %v2547_v58  ;;  %v2779_v61 = vmul.f32 %v6340_v9, %v2749_v50  ;;  %v2787_v63 = vadd.f32 %v2736_v5, %v2689_v52 }
 0x511   : > { %v2780_v53 = vadd.f32 %v2778_v62, %v6341_v40 }
 0x512   : > { %v2786_v44 = vadd.f32 %v2735_v35, %v2688_v42  ;;  %v2781_v12 = vadd.f32 %v2779_v61, %v6342_v59 }
 0x513   : > { %v2782_v45 = vadd.f32 %v2780_v53, %v2594_v24 }
 0x514   : > { %v2783_v15 = vadd.f32 %v2781_v12, %v5750_v18 }
 0x515   : > { %v2784_v47 = vadd.f32 %v2782_v45, %v2641_v46 }
 0x516   : > { %v2785_v1 = vadd.f32 %v2783_v15, %v2642_v23 }
 0x517   : > { %v2788_v0 = vadd.f32 %v2786_v44, %v2784_v47 }
 0x518   : > { %v2789_v36 = vadd.f32 %v2787_v63, %v2785_v1 }
 0x519   : > { %v2932_v49 = vmul.f32 -1.442695, %v2788_v0 }
 0x51a   : > { %v2933_v39 = vmul.f32 -1.442695, %v2789_v36 }
 0x51b   : > { %3072 = vpow2.f32 %v2932_v49 }
 0x51c   : > { %3074 = vpow2.f32 %v2933_v39 }
 0x528   : > { %v3073_v60 = vpop.eup %3072 }
 0x529   : > { %v3075_v20 = vpop.eup %3074  ;;  %v2796_v22 = vadd.f32 1.0, %v3073_v60 }
 0x52a   : > { %v2797_v21 = vadd.f32 1.0, %v3075_v20 }
 0x52b   : > { %3076 = vrcp.f32 %v2796_v22 }
 0x52c   : > { %3078 = vrcp.f32 %v2797_v21 }
 0x538   : > { %v3077_v31 = vpop.eup %3076 }
 0x539   : > { %v3079_v18 = vpop.eup %3078  ;;  %v2805_v16 = vrot.slane %v3077_v31, %v3461_v41 }
 0x53a   : > { %v2809_v23 = vrot.slane %v3079_v18, %v3461_v41 }
 0x53b   : > { %v2810_v55 = vmul.f32 %v2805_v16, %v6344_v51  ;;  %v2812_v8 = vmul.f32 %v2805_v16, %v6345_v28 }
 0x53c   : > { %v2811_v34 = vmul.f32 %v2809_v23, %v6346_v26  ;;  %v2813_v13 = vmul.f32 %v2809_v23, %v6347_v32 }
 0x53d   : > { %2814 = vst [vmem:[%s230_s6] sm:$0xff] %v2810_v55  ;;  %2816 = vst [vmem:[%s230_s6 + $0x10] sm:$0xff] %v2812_v8 }
 0x53e   : > { %2815 = vst [vmem:[%s230_s6 + $0x8] sm:$0xff] %v2811_v34  ;;  %2817 = vst [vmem:[%s230_s6 + $0x18] sm:$0xff] %v2813_v13 }
 0x53f   : > { %3148 = shalt.err (!%p3145_p0)
}
 0x540   : > { %s3149_s8 = scalar_lea.hbm %s5833_s11, 512  ;;  %s3153_s29 = scalar_lea.hbm %s5885_s4, 1024 }
 0x541   : > { %p3150_p5 = scmp.ne.s32.totalorder %s5833_s11, %s3149_s8  ;;  %p3154_p4 = scmp.lt.s32.totalorder %s5833_s11, %s5885_s4 }
 0x542   : > { %p3155_p6 = scmp.lt.s32.totalorder %s3153_s29, %s3149_s8 }
 0x543   : > { %p3151_p2 = pnand %p3150_p5, %p6348_p11 }
 0x544   : > { %p3156_p8 = por %p3155_p6, %p3154_p4 }
 0x545   : > { %p3152_p1 = pneg %p3151_p2 }
 0x547   : > { %p3157_p3 = pnand %p3156_p8, %p3152_p1 }
 0x549   : > { %3160 = shalt.err (!%p3157_p3)
}
 0x54a   : > { %s3260_s6 = smov 256  }
 0x54b   : > { %2964 = dma.vmem_to_hbm [thread:$0]  (%p6348_p11), %s5837_s26, 512, %s5833_s11, %s2819_s19, %s3260_s6, %s3260_s6, %s6104_s12  }
 0x54c PF: > { %s2847_s13 = sand.u32 1, %s3191_s15   ;;  %p6349_p7 = scmp.ne.s32.totalorder %s6036_s22, 0 }
 0x54d   : > { %p6350_p9 = scmp.ge.s32.totalorder %s3203_s18, 2  ;;  %s2848_s14 = scalar_lea.sflag [#allocation4], %s2847_s13 }
 0x54f   : > { %p2975_p10 = pnand %p6350_p9, %p6349_p7 }
 0x551   : > { %p2976_p12 = pneg %p2975_p10 }
 0x553   : > { %3186 = dma.done.wait (%p2976_p12), %s2848_s14, 512  }
 0x554   : > { %3188 = vsyncadd (%p2976_p12), %s2848_s14, 4294966784  ;;  %p18_p13 = scmp.ge.s32.totalorder %s3340_s27, 4   ;;  %s6351_s15 = smov %s3195_s16 }
 0x555   : > { %s6352_s16 = smov %s3199_s17  ;;  %s6353_s17 = smov %s3360_s9 }
 0x556   : > { %s6354_s18 = smov %s3340_s27  ;;  %20 = sbr.rel (!%p18_p13) target bundleno = 6 (0x6), region = 182 }
 0x55b   :  { %2853 = vsyncpa [#allocation3], 1 }
 0x55c   :  { %2855 = vsyncpa [#allocation3 + $0x1], 1 }
 0x55d   :  { %2856 = vsyncpa [#allocation6], 1 }
 0x55e   :  { %2857 = vsyncpa [#allocation4], 1 }
 0x55f   :  { %2859 = vsyncpa [#allocation4 + $0x1], 1 }

</bundles_post_ra>
